<compile_context>
chip_gen: v6e
topology: v6e:2x2x1
jax: 0.10.0
libtpu: 0.0.40
codegen_flags: <defaults>
</compile_context>

<pallas_src>
import jax
import jax.numpy as jnp
from jax.experimental import pallas as pl
from jax.experimental.pallas import tpu as pltpu

INPUT_DIM = 2
RNN_HIDDEN = 32
FC_HIDDEN = 64
SEQ_LEN = 8
FEAT = 1 + SEQ_LEN * INPUT_DIM + 1        # 18 input features per row
GATES = 4 * RNN_HIDDEN                    # 128 gate pre-activations per step
N_PRE = SEQ_LEN * GATES + FC_HIDDEN       # 1088 rows produced by the prologue matmul
COST_ROW = SEQ_LEN * INPUT_DIM            # 16: row of the repacked input holding `cost`
ND_ROW = COST_ROW + 1                     # 17: row holding `next_diff`
ONES_ROW = COST_ROW + 2                   # 18: constant-ones row (carries all biases)
K_IN = 24                                 # 19 live rows padded to a sublane-friendly 24
MAX_B_TILE = 512                          # lane/MXU-N tile (sweepable 512/1024)
MIN_B_TILE = 256


def _sigmoid1(x):
    # sigmoid(x) == 0.5 * tanh(0.5 * x) + 0.5 : one EUP transcendental instead of exp+recip.
    return 0.5 * jnp.tanh(0.5 * x) + 0.5


def lstm_fc_kernel(xin_ref, wext_ref, whh_ref, w1h_ref, w2c_ref, b2_ref,
                   out_ref, gx_ref):
    """Full forward for one batch tile (batch on the lane axis)."""
    H = RNN_HIDDEN
    bt = xin_ref.shape[1]

    # Prologue: gate pre-activations for all 8 steps + fused LSTM bias + fc1's
    # cost/next_diff/bias terms — ONE bf16 MXU matmul, stored to bf16 scratch.
    gx_ref[...] = jnp.dot(wext_ref[...], xin_ref[...],
                          preferred_element_type=jnp.float32).astype(gx_ref.dtype)

    whh = whh_ref[...]                    # (4H, H) bf16 — resident for the whole loop
    h = jnp.zeros((H, bt), jnp.float32)
    c = jnp.zeros((H, bt), jnp.float32)

    # Static unroll over the fixed sequence length; only h @ W_hh is on the serial path.
    # TODO(synk): if a wider B_TILE shows vreg spills, switch to
    # lax.fori_loop(0, SEQ_LEN, body, (h, c), unroll=True) with a pl.ds gx slice.
    for t in range(SEQ_LEN):
        gates = (gx_ref[t * GATES:(t + 1) * GATES, :].astype(jnp.float32)
                 + jnp.dot(whh, h.astype(whh.dtype),
                           preferred_element_type=jnp.float32))
        i_g = _sigmoid1(gates[0 * H:1 * H, :])   # sublane slices (multiples of 8)
        f_g = _sigmoid1(gates[1 * H:2 * H, :])
        g_g = jnp.tanh(gates[2 * H:3 * H, :])
        o_g = _sigmoid1(gates[3 * H:4 * H, :])
        c = f_g * c + i_g * g_g
        h = o_g * jnp.tanh(c)

    # fc1: h-part matmul + the cost/next_diff/bias terms already computed in the prologue.
    z1 = (jnp.dot(w1h_ref[...], h.astype(w1h_ref.dtype),
                  preferred_element_type=jnp.float32)
          + gx_ref[SEQ_LEN * GATES:SEQ_LEN * GATES + FC_HIDDEN, :].astype(jnp.float32))
    z1 = jnp.maximum(z1, 0.0)                                   # ReLU

    # fc2: VPU broadcast-multiply + sublane (XLU) reduce instead of an M=1 MXU matmul.
    out_ref[...] = (jnp.sum(w2c_ref[...] * z1, axis=0, keepdims=True) + b2_ref[...])


def init_raw_params(key):
    """PyTorch-shaped parameters (LSTM + 2-layer MLP head)."""
    ks = jax.random.split(key, 8)
    s_lstm = 1.0 / jnp.sqrt(RNN_HIDDEN)
    s_fc1 = 1.0 / jnp.sqrt(RNN_HIDDEN + 2)
    s_fc2 = 1.0 / jnp.sqrt(FC_HIDDEN)
    u = lambda k, shape, s: jax.random.uniform(k, shape, jnp.float32, -s, s)
    return {
        "w_ih": u(ks[0], (GATES, INPUT_DIM), s_lstm),            # (128, 2)
        "w_hh": u(ks[1], (GATES, RNN_HIDDEN), s_lstm),           # (128, 32)
        "b_ih": u(ks[2], (GATES,), s_lstm),
        "b_hh": u(ks[3], (GATES,), s_lstm),
        "fc1_w": u(ks[4], (FC_HIDDEN, RNN_HIDDEN + 2), s_fc1),   # (64, 34)
        "fc1_b": u(ks[5], (FC_HIDDEN,), s_fc1),
        "fc2_w": u(ks[6], (1, FC_HIDDEN), s_fc2),                # (1, 64)
        "fc2_b": u(ks[7], (1,), s_fc2),
    }


def prepare_kernel_params(raw, mxu_dtype=jnp.bfloat16):
    """One-time host-side repacking into the kernel's batch-on-lanes layout."""
    # Extended block-diagonal weight: rows 0..1023 are the 8 per-step W_ih blocks plus the
    # fused LSTM bias on the ones column; rows 1024..1087 carry fc1's cost/next_diff
    # columns and fc1 bias.  Columns 19..23 are zero padding.
    wext = jnp.zeros((N_PRE, K_IN), jnp.float32)
    for t in range(SEQ_LEN):
        wext = wext.at[t * GATES:(t + 1) * GATES,
                       t * INPUT_DIM:(t + 1) * INPUT_DIM].set(raw["w_ih"])
    wext = wext.at[0:SEQ_LEN * GATES, ONES_ROW].set(
        jnp.tile(raw["b_ih"] + raw["b_hh"], SEQ_LEN))
    base = SEQ_LEN * GATES
    fc1_w = raw["fc1_w"]
    wext = wext.at[base:base + FC_HIDDEN, COST_ROW].set(fc1_w[:, RNN_HIDDEN])
    wext = wext.at[base:base + FC_HIDDEN, ND_ROW].set(fc1_w[:, RNN_HIDDEN + 1])
    wext = wext.at[base:base + FC_HIDDEN, ONES_ROW].set(raw["fc1_b"])
    return {
        "wext": wext.astype(mxu_dtype),                          # (1088, 24) bf16
        "whh": raw["w_hh"].astype(mxu_dtype),                    # (128, 32) bf16
        "w1h": fc1_w[:, :RNN_HIDDEN].astype(mxu_dtype),          # (64, 32) bf16
        "w2c": raw["fc2_w"].reshape(FC_HIDDEN, 1),               # (64, 1) f32 (VPU path)
        "b2": raw["fc2_b"].reshape(1, 1),                        # (1, 1) f32
    }


def _pick_b_tile(B):
    """Largest tile <= MAX_B_TILE that still yields >= 2 grid tiles for B > MIN_B_TILE
    (keeps both v7x TensorCores busy); never below MIN_B_TILE lanes."""
    if B <= MIN_B_TILE:
        return MIN_B_TILE
    return max(MIN_B_TILE, min(MAX_B_TILE, pl.next_power_of_2(pl.cdiv(B, 2))))


def player_performance_forward(x, kp, b_tile=None):
    B = x.shape[0]
    if b_tile is None:
        b_tile = _pick_b_tile(B)
    nb = pl.cdiv(B, b_tile)
    b_pad = nb * b_tile

    # Glue (pure JAX): repack once to batch-on-lanes, append ones row + zero pad rows,
    # pad B to the tile size, and cast to bf16 (halves the only batched DMA).
    xt = x.T.astype(jnp.float32)                                  # (18, B)
    xin = jnp.concatenate(
        [xt[1:FEAT - 1],                                          # 16 seq rows (time-major)
         xt[0:1],                                                 # cost
         xt[FEAT - 1:FEAT],                                       # next_diff
         jnp.ones((1, B), jnp.float32),                           # ones (carries biases)
         jnp.zeros((K_IN - FEAT - 1, B), jnp.float32)], axis=0)   # pad to 24 rows
    if b_pad != B:
        xin = jnp.pad(xin, ((0, 0), (0, b_pad - B)))
    xin = xin.astype(kp["wext"].dtype)                            # (24, B_pad) bf16

    batched = lambda rows: pl.BlockSpec((rows, b_tile), lambda i: (0, i))
    resident = lambda a: pl.BlockSpec(a.shape, lambda i: (0, 0))  # VMEM-resident weights

    param_bytes = sum(int(v.size) * v.dtype.itemsize for v in kp.values())
    cost = pl.CostEstimate(
        flops=2 * b_pad * (N_PRE * K_IN
                           + SEQ_LEN * GATES * RNN_HIDDEN
                           + FC_HIDDEN * RNN_HIDDEN + FC_HIDDEN),
        transcendentals=b_pad * SEQ_LEN * 5 * RNN_HIDDEN,
        bytes_accessed=int(xin.size) * 2 + b_pad * 4 + param_bytes * nb)

    out_t = pl.pallas_call(
        lstm_fc_kernel,
        out_shape=jax.ShapeDtypeStruct((1, b_pad), jnp.float32),
        grid=(nb,),
        in_specs=[batched(K_IN),
                  resident(kp["wext"]), resident(kp["whh"]),
                  resident(kp["w1h"]), resident(kp["w2c"]), resident(kp["b2"])],
        out_specs=batched(1),
        scratch_shapes=[pltpu.VMEM((N_PRE, b_tile), jnp.bfloat16)],
        compiler_params=pltpu.CompilerParams(dimension_semantics=("parallel",)),
        cost_estimate=cost,
    )(xin, kp["wext"], kp["whh"], kp["w1h"], kp["w2c"], kp["b2"])

    return out_t[:, :B].T                                         # (B, 1)


def reference_forward(x, raw):
    """Pure-JAX f32 reference mirroring the PyTorch module."""
    B = x.shape[0]
    H = RNN_HIDDEN
    cost = x[:, 0:1]
    nd = x[:, -1:]
    seq = x[:, 1:-1].reshape(B, SEQ_LEN, INPUT_DIM)
    wih_t = raw["w_ih"].T
    whh_t = raw["w_hh"].T
    b = (raw["b_ih"] + raw["b_hh"])[None, :]
    h = jnp.zeros((B, H), jnp.float32)
    c = jnp.zeros((B, H), jnp.float32)
    for t in range(SEQ_LEN):
        gates = seq[:, t] @ wih_t + h @ whh_t + b
        i_g = jax.nn.sigmoid(gates[:, 0 * H:1 * H])
        f_g = jax.nn.sigmoid(gates[:, 1 * H:2 * H])
        g_g = jnp.tanh(gates[:, 2 * H:3 * H])
        o_g = jax.nn.sigmoid(gates[:, 3 * H:4 * H])
        c = f_g * c + i_g * g_g
        h = o_g * jnp.tanh(c)
    combined = jnp.concatenate([h, cost, nd], axis=1)
    z1 = jnp.maximum(combined @ raw["fc1_w"].T + raw["fc1_b"], 0.0)
    return z1 @ raw["fc2_w"].T + raw["fc2_b"]


if __name__ == "__main__":
    key = jax.random.PRNGKey(0)
    k_param, k_x = jax.random.split(key)

    raw = init_raw_params(k_param)
    kp = prepare_kernel_params(raw)

    B = 2
    x = jax.random.normal(k_x, (B, FEAT), jnp.float32)

    fwd = jax.jit(player_performance_forward)
    out = jax.block_until_ready(fwd(x, kp))
    ref = jax.block_until_ready(reference_forward(x, raw))

    assert out.shape == (B, 1), out.shape
    # bf16 operands on the recurrence / prologue / fc1 (f32 MXU accumulation) vs. the pure
    # f32 reference — tolerance relaxed accordingly.
    assert jnp.allclose(out, ref, atol=5e-2, rtol=5e-2), (out, ref)
    print("KERNEL_OK")
</pallas_src>

<mosaic_0001>
module attributes {stable_mosaic.version = 11 : i64} {
  func.func @lstm_fc_kernel(%arg0: i32, %arg1: memref<24x256xbf16, #tpu.memory_space<vmem>>, %arg2: memref<1088x24xbf16, #tpu.memory_space<vmem>>, %arg3: memref<128x32xbf16, #tpu.memory_space<vmem>>, %arg4: memref<64x32xbf16, #tpu.memory_space<vmem>>, %arg5: memref<64x1xf32, #tpu.memory_space<vmem>>, %arg6: memref<1x1xf32, #tpu.memory_space<vmem>>, %arg7: memref<1x256xf32, #tpu.memory_space<vmem>>, %arg8: memref<1088x256xbf16, #tpu.memory_space<vmem>>) attributes {dimension_semantics = [#tpu.dimension_semantics<parallel>], iteration_bounds = array<i64: 1>, scalar_prefetch = 0 : i64, scratch_operands = 1 : i64, tpu.core_type = #tpu.core_type<tc>, window_params = [{transform_indices = @transform_0, window_bounds = array<i64: 24, 256>}, {pipeline_mode = #tpu.pipeline_mode<synchronous>, transform_indices = @transform_1, window_bounds = array<i64: 1088, 24>}, {pipeline_mode = #tpu.pipeline_mode<synchronous>, transform_indices = @transform_2, window_bounds = array<i64: 128, 32>}, {pipeline_mode = #tpu.pipeline_mode<synchronous>, transform_indices = @transform_3, window_bounds = array<i64: 64, 32>}, {pipeline_mode = #tpu.pipeline_mode<synchronous>, transform_indices = @transform_4, window_bounds = array<i64: 64, 1>}, {pipeline_mode = #tpu.pipeline_mode<synchronous>, transform_indices = @transform_5, window_bounds = array<i64: 1, 1>}, {transform_indices = @transform_6, window_bounds = array<i64: 1, 256>}]} {
    %c0 = arith.constant 0 : index
    %c0_0 = arith.constant 0 : index
    %0 = vector.load %arg2[%c0, %c0_0] : memref<1088x24xbf16, #tpu.memory_space<vmem>>, vector<1088x24xbf16>
    %c0_1 = arith.constant 0 : index
    %c0_2 = arith.constant 0 : index
    %1 = vector.load %arg1[%c0_1, %c0_2] : memref<24x256xbf16, #tpu.memory_space<vmem>>, vector<24x256xbf16>
    %cst = arith.constant dense<0.000000e+00> : vector<1088x256xf32>
    %2 = tpu.matmul %0, %1, %cst {dimension_numbers = #tpu.dot_dimension_numbers<[1], [0], [0], [1], [0, 0, 1, 1], [], []>} : vector<1088x24xbf16>, vector<24x256xbf16>, vector<1088x256xf32> -> vector<1088x256xf32>
    %3 = arith.truncf %2 : vector<1088x256xf32> to vector<1088x256xbf16>
    %c0_3 = arith.constant 0 : index
    %c0_4 = arith.constant 0 : index
    %4 = vector.load %arg8[%c0_3, %c0_4] : memref<1088x256xbf16, #tpu.memory_space<vmem>>, vector<1088x256xbf16>
    tpu.vector_store %arg8[%c0_3, %c0_4], %3 {strides = array<i32>} : memref<1088x256xbf16, #tpu.memory_space<vmem>>, vector<1088x256xbf16>,
    %c0_5 = arith.constant 0 : index
    %c0_6 = arith.constant 0 : index
    %5 = vector.load %arg3[%c0_5, %c0_6] : memref<128x32xbf16, #tpu.memory_space<vmem>>, vector<128x32xbf16>
    %cst_7 = arith.constant 0.000000e+00 : f32
    %6 = vector.broadcast %cst_7 : f32 to vector<32x256xf32>
    %cst_8 = arith.constant 0.000000e+00 : f32
    %7 = vector.broadcast %cst_8 : f32 to vector<32x256xf32>
    %c0_9 = arith.constant 0 : index
    %c0_10 = arith.constant 0 : index
    %8 = vector.load %arg8[%c0_9, %c0_10] : memref<1088x256xbf16, #tpu.memory_space<vmem>>, vector<128x256xbf16>
    %9 = arith.extf %8 : vector<128x256xbf16> to vector<128x256xf32>
    %10 = arith.truncf %6 : vector<32x256xf32> to vector<32x256xbf16>
    %cst_11 = arith.constant dense<0.000000e+00> : vector<128x256xf32>
    %11 = tpu.matmul %5, %10, %cst_11 {dimension_numbers = #tpu.dot_dimension_numbers<[1], [0], [0], [1], [0, 0, 1, 1], [], []>} : vector<128x32xbf16>, vector<32x256xbf16>, vector<128x256xf32> -> vector<128x256xf32>
    %12 = arith.addf %9, %11 : vector<128x256xf32>
    %13 = vector.extract_strided_slice %12 {offsets = [0, 0], sizes = [32, 256], strides = [1, 1]} : vector<128x256xf32> to vector<32x256xf32>
    %cst_12 = arith.constant 5.000000e-01 : f32
    %14 = vector.broadcast %cst_12 : f32 to vector<32x256xf32>
    %15 = arith.mulf %14, %13 : vector<32x256xf32>
    %16 = math.tanh %15 : vector<32x256xf32>
    %cst_13 = arith.constant 5.000000e-01 : f32
    %17 = vector.broadcast %cst_13 : f32 to vector<32x256xf32>
    %18 = arith.mulf %17, %16 : vector<32x256xf32>
    %cst_14 = arith.constant 5.000000e-01 : f32
    %19 = vector.broadcast %cst_14 : f32 to vector<32x256xf32>
    %20 = arith.addf %18, %19 : vector<32x256xf32>
    %21 = vector.extract_strided_slice %12 {offsets = [32, 0], sizes = [32, 256], strides = [1, 1]} : vector<128x256xf32> to vector<32x256xf32>
    %cst_15 = arith.constant 5.000000e-01 : f32
    %22 = vector.broadcast %cst_15 : f32 to vector<32x256xf32>
    %23 = arith.mulf %22, %21 : vector<32x256xf32>
    %24 = math.tanh %23 : vector<32x256xf32>
    %cst_16 = arith.constant 5.000000e-01 : f32
    %25 = vector.broadcast %cst_16 : f32 to vector<32x256xf32>
    %26 = arith.mulf %25, %24 : vector<32x256xf32>
    %cst_17 = arith.constant 5.000000e-01 : f32
    %27 = vector.broadcast %cst_17 : f32 to vector<32x256xf32>
    %28 = arith.addf %26, %27 : vector<32x256xf32>
    %29 = vector.extract_strided_slice %12 {offsets = [64, 0], sizes = [32, 256], strides = [1, 1]} : vector<128x256xf32> to vector<32x256xf32>
    %30 = math.tanh %29 : vector<32x256xf32>
    %31 = vector.extract_strided_slice %12 {offsets = [96, 0], sizes = [32, 256], strides = [1, 1]} : vector<128x256xf32> to vector<32x256xf32>
    %cst_18 = arith.constant 5.000000e-01 : f32
    %32 = vector.broadcast %cst_18 : f32 to vector<32x256xf32>
    %33 = arith.mulf %32, %31 : vector<32x256xf32>
    %34 = math.tanh %33 : vector<32x256xf32>
    %cst_19 = arith.constant 5.000000e-01 : f32
    %35 = vector.broadcast %cst_19 : f32 to vector<32x256xf32>
    %36 = arith.mulf %35, %34 : vector<32x256xf32>
    %cst_20 = arith.constant 5.000000e-01 : f32
    %37 = vector.broadcast %cst_20 : f32 to vector<32x256xf32>
    %38 = arith.addf %36, %37 : vector<32x256xf32>
    %39 = arith.mulf %28, %7 : vector<32x256xf32>
    %40 = arith.mulf %20, %30 : vector<32x256xf32>
    %41 = arith.addf %39, %40 : vector<32x256xf32>
    %42 = math.tanh %41 : vector<32x256xf32>
    %43 = arith.mulf %38, %42 : vector<32x256xf32>
    %c128 = arith.constant 128 : index
    %c0_21 = arith.constant 0 : index
    %44 = vector.load %arg8[%c128, %c0_21] : memref<1088x256xbf16, #tpu.memory_space<vmem>>, vector<128x256xbf16>
    %45 = arith.extf %44 : vector<128x256xbf16> to vector<128x256xf32>
    %46 = arith.truncf %43 : vector<32x256xf32> to vector<32x256xbf16>
    %cst_22 = arith.constant dense<0.000000e+00> : vector<128x256xf32>
    %47 = tpu.matmul %5, %46, %cst_22 {dimension_numbers = #tpu.dot_dimension_numbers<[1], [0], [0], [1], [0, 0, 1, 1], [], []>} : vector<128x32xbf16>, vector<32x256xbf16>, vector<128x256xf32> -> vector<128x256xf32>
    %48 = arith.addf %45, %47 : vector<128x256xf32>
    %49 = vector.extract_strided_slice %48 {offsets = [0, 0], sizes = [32, 256], strides = [1, 1]} : vector<128x256xf32> to vector<32x256xf32>
    %cst_23 = arith.constant 5.000000e-01 : f32
    %50 = vector.broadcast %cst_23 : f32 to vector<32x256xf32>
    %51 = arith.mulf %50, %49 : vector<32x256xf32>
    %52 = math.tanh %51 : vector<32x256xf32>
    %cst_24 = arith.constant 5.000000e-01 : f32
    %53 = vector.broadcast %cst_24 : f32 to vector<32x256xf32>
    %54 = arith.mulf %53, %52 : vector<32x256xf32>
    %cst_25 = arith.constant 5.000000e-01 : f32
    %55 = vector.broadcast %cst_25 : f32 to vector<32x256xf32>
    %56 = arith.addf %54, %55 : vector<32x256xf32>
    %57 = vector.extract_strided_slice %48 {offsets = [32, 0], sizes = [32, 256], strides = [1, 1]} : vector<128x256xf32> to vector<32x256xf32>
    %cst_26 = arith.constant 5.000000e-01 : f32
    %58 = vector.broadcast %cst_26 : f32 to vector<32x256xf32>
    %59 = arith.mulf %58, %57 : vector<32x256xf32>
    %60 = math.tanh %59 : vector<32x256xf32>
    %cst_27 = arith.constant 5.000000e-01 : f32
    %61 = vector.broadcast %cst_27 : f32 to vector<32x256xf32>
    %62 = arith.mulf %61, %60 : vector<32x256xf32>
    %cst_28 = arith.constant 5.000000e-01 : f32
    %63 = vector.broadcast %cst_28 : f32 to vector<32x256xf32>
    %64 = arith.addf %62, %63 : vector<32x256xf32>
    %65 = vector.extract_strided_slice %48 {offsets = [64, 0], sizes = [32, 256], strides = [1, 1]} : vector<128x256xf32> to vector<32x256xf32>
    %66 = math.tanh %65 : vector<32x256xf32>
    %67 = vector.extract_strided_slice %48 {offsets = [96, 0], sizes = [32, 256], strides = [1, 1]} : vector<128x256xf32> to vector<32x256xf32>
    %cst_29 = arith.constant 5.000000e-01 : f32
    %68 = vector.broadcast %cst_29 : f32 to vector<32x256xf32>
    %69 = arith.mulf %68, %67 : vector<32x256xf32>
    %70 = math.tanh %69 : vector<32x256xf32>
    %cst_30 = arith.constant 5.000000e-01 : f32
    %71 = vector.broadcast %cst_30 : f32 to vector<32x256xf32>
    %72 = arith.mulf %71, %70 : vector<32x256xf32>
    %cst_31 = arith.constant 5.000000e-01 : f32
    %73 = vector.broadcast %cst_31 : f32 to vector<32x256xf32>
    %74 = arith.addf %72, %73 : vector<32x256xf32>
    %75 = arith.mulf %64, %41 : vector<32x256xf32>
    %76 = arith.mulf %56, %66 : vector<32x256xf32>
    %77 = arith.addf %75, %76 : vector<32x256xf32>
    %78 = math.tanh %77 : vector<32x256xf32>
    %79 = arith.mulf %74, %78 : vector<32x256xf32>
    %c256 = arith.constant 256 : index
    %c0_32 = arith.constant 0 : index
    %80 = vector.load %arg8[%c256, %c0_32] : memref<1088x256xbf16, #tpu.memory_space<vmem>>, vector<128x256xbf16>
    %81 = arith.extf %80 : vector<128x256xbf16> to vector<128x256xf32>
    %82 = arith.truncf %79 : vector<32x256xf32> to vector<32x256xbf16>
    %cst_33 = arith.constant dense<0.000000e+00> : vector<128x256xf32>
    %83 = tpu.matmul %5, %82, %cst_33 {dimension_numbers = #tpu.dot_dimension_numbers<[1], [0], [0], [1], [0, 0, 1, 1], [], []>} : vector<128x32xbf16>, vector<32x256xbf16>, vector<128x256xf32> -> vector<128x256xf32>
    %84 = arith.addf %81, %83 : vector<128x256xf32>
    %85 = vector.extract_strided_slice %84 {offsets = [0, 0], sizes = [32, 256], strides = [1, 1]} : vector<128x256xf32> to vector<32x256xf32>
    %cst_34 = arith.constant 5.000000e-01 : f32
    %86 = vector.broadcast %cst_34 : f32 to vector<32x256xf32>
    %87 = arith.mulf %86, %85 : vector<32x256xf32>
    %88 = math.tanh %87 : vector<32x256xf32>
    %cst_35 = arith.constant 5.000000e-01 : f32
    %89 = vector.broadcast %cst_35 : f32 to vector<32x256xf32>
    %90 = arith.mulf %89, %88 : vector<32x256xf32>
    %cst_36 = arith.constant 5.000000e-01 : f32
    %91 = vector.broadcast %cst_36 : f32 to vector<32x256xf32>
    %92 = arith.addf %90, %91 : vector<32x256xf32>
    %93 = vector.extract_strided_slice %84 {offsets = [32, 0], sizes = [32, 256], strides = [1, 1]} : vector<128x256xf32> to vector<32x256xf32>
    %cst_37 = arith.constant 5.000000e-01 : f32
    %94 = vector.broadcast %cst_37 : f32 to vector<32x256xf32>
    %95 = arith.mulf %94, %93 : vector<32x256xf32>
    %96 = math.tanh %95 : vector<32x256xf32>
    %cst_38 = arith.constant 5.000000e-01 : f32
    %97 = vector.broadcast %cst_38 : f32 to vector<32x256xf32>
    %98 = arith.mulf %97, %96 : vector<32x256xf32>
    %cst_39 = arith.constant 5.000000e-01 : f32
    %99 = vector.broadcast %cst_39 : f32 to vector<32x256xf32>
    %100 = arith.addf %98, %99 : vector<32x256xf32>
    %101 = vector.extract_strided_slice %84 {offsets = [64, 0], sizes = [32, 256], strides = [1, 1]} : vector<128x256xf32> to vector<32x256xf32>
    %102 = math.tanh %101 : vector<32x256xf32>
    %103 = vector.extract_strided_slice %84 {offsets = [96, 0], sizes = [32, 256], strides = [1, 1]} : vector<128x256xf32> to vector<32x256xf32>
    %cst_40 = arith.constant 5.000000e-01 : f32
    %104 = vector.broadcast %cst_40 : f32 to vector<32x256xf32>
    %105 = arith.mulf %104, %103 : vector<32x256xf32>
    %106 = math.tanh %105 : vector<32x256xf32>
    %cst_41 = arith.constant 5.000000e-01 : f32
    %107 = vector.broadcast %cst_41 : f32 to vector<32x256xf32>
    %108 = arith.mulf %107, %106 : vector<32x256xf32>
    %cst_42 = arith.constant 5.000000e-01 : f32
    %109 = vector.broadcast %cst_42 : f32 to vector<32x256xf32>
    %110 = arith.addf %108, %109 : vector<32x256xf32>
    %111 = arith.mulf %100, %77 : vector<32x256xf32>
    %112 = arith.mulf %92, %102 : vector<32x256xf32>
    %113 = arith.addf %111, %112 : vector<32x256xf32>
    %114 = math.tanh %113 : vector<32x256xf32>
    %115 = arith.mulf %110, %114 : vector<32x256xf32>
    %c384 = arith.constant 384 : index
    %c0_43 = arith.constant 0 : index
    %116 = vector.load %arg8[%c384, %c0_43] : memref<1088x256xbf16, #tpu.memory_space<vmem>>, vector<128x256xbf16>
    %117 = arith.extf %116 : vector<128x256xbf16> to vector<128x256xf32>
    %118 = arith.truncf %115 : vector<32x256xf32> to vector<32x256xbf16>
    %cst_44 = arith.constant dense<0.000000e+00> : vector<128x256xf32>
    %119 = tpu.matmul %5, %118, %cst_44 {dimension_numbers = #tpu.dot_dimension_numbers<[1], [0], [0], [1], [0, 0, 1, 1], [], []>} : vector<128x32xbf16>, vector<32x256xbf16>, vector<128x256xf32> -> vector<128x256xf32>
    %120 = arith.addf %117, %119 : vector<128x256xf32>
    %121 = vector.extract_strided_slice %120 {offsets = [0, 0], sizes = [32, 256], strides = [1, 1]} : vector<128x256xf32> to vector<32x256xf32>
    %cst_45 = arith.constant 5.000000e-01 : f32
    %122 = vector.broadcast %cst_45 : f32 to vector<32x256xf32>
    %123 = arith.mulf %122, %121 : vector<32x256xf32>
    %124 = math.tanh %123 : vector<32x256xf32>
    %cst_46 = arith.constant 5.000000e-01 : f32
    %125 = vector.broadcast %cst_46 : f32 to vector<32x256xf32>
    %126 = arith.mulf %125, %124 : vector<32x256xf32>
    %cst_47 = arith.constant 5.000000e-01 : f32
    %127 = vector.broadcast %cst_47 : f32 to vector<32x256xf32>
    %128 = arith.addf %126, %127 : vector<32x256xf32>
    %129 = vector.extract_strided_slice %120 {offsets = [32, 0], sizes = [32, 256], strides = [1, 1]} : vector<128x256xf32> to vector<32x256xf32>
    %cst_48 = arith.constant 5.000000e-01 : f32
    %130 = vector.broadcast %cst_48 : f32 to vector<32x256xf32>
    %131 = arith.mulf %130, %129 : vector<32x256xf32>
    %132 = math.tanh %131 : vector<32x256xf32>
    %cst_49 = arith.constant 5.000000e-01 : f32
    %133 = vector.broadcast %cst_49 : f32 to vector<32x256xf32>
    %134 = arith.mulf %133, %132 : vector<32x256xf32>
    %cst_50 = arith.constant 5.000000e-01 : f32
    %135 = vector.broadcast %cst_50 : f32 to vector<32x256xf32>
    %136 = arith.addf %134, %135 : vector<32x256xf32>
    %137 = vector.extract_strided_slice %120 {offsets = [64, 0], sizes = [32, 256], strides = [1, 1]} : vector<128x256xf32> to vector<32x256xf32>
    %138 = math.tanh %137 : vector<32x256xf32>
    %139 = vector.extract_strided_slice %120 {offsets = [96, 0], sizes = [32, 256], strides = [1, 1]} : vector<128x256xf32> to vector<32x256xf32>
    %cst_51 = arith.constant 5.000000e-01 : f32
    %140 = vector.broadcast %cst_51 : f32 to vector<32x256xf32>
    %141 = arith.mulf %140, %139 : vector<32x256xf32>
    %142 = math.tanh %141 : vector<32x256xf32>
    %cst_52 = arith.constant 5.000000e-01 : f32
    %143 = vector.broadcast %cst_52 : f32 to vector<32x256xf32>
    %144 = arith.mulf %143, %142 : vector<32x256xf32>
    %cst_53 = arith.constant 5.000000e-01 : f32
    %145 = vector.broadcast %cst_53 : f32 to vector<32x256xf32>
    %146 = arith.addf %144, %145 : vector<32x256xf32>
    %147 = arith.mulf %136, %113 : vector<32x256xf32>
    %148 = arith.mulf %128, %138 : vector<32x256xf32>
    %149 = arith.addf %147, %148 : vector<32x256xf32>
    %150 = math.tanh %149 : vector<32x256xf32>
    %151 = arith.mulf %146, %150 : vector<32x256xf32>
    %c512 = arith.constant 512 : index
    %c0_54 = arith.constant 0 : index
    %152 = vector.load %arg8[%c512, %c0_54] : memref<1088x256xbf16, #tpu.memory_space<vmem>>, vector<128x256xbf16>
    %153 = arith.extf %152 : vector<128x256xbf16> to vector<128x256xf32>
    %154 = arith.truncf %151 : vector<32x256xf32> to vector<32x256xbf16>
    %cst_55 = arith.constant dense<0.000000e+00> : vector<128x256xf32>
    %155 = tpu.matmul %5, %154, %cst_55 {dimension_numbers = #tpu.dot_dimension_numbers<[1], [0], [0], [1], [0, 0, 1, 1], [], []>} : vector<128x32xbf16>, vector<32x256xbf16>, vector<128x256xf32> -> vector<128x256xf32>
    %156 = arith.addf %153, %155 : vector<128x256xf32>
    %157 = vector.extract_strided_slice %156 {offsets = [0, 0], sizes = [32, 256], strides = [1, 1]} : vector<128x256xf32> to vector<32x256xf32>
    %cst_56 = arith.constant 5.000000e-01 : f32
    %158 = vector.broadcast %cst_56 : f32 to vector<32x256xf32>
    %159 = arith.mulf %158, %157 : vector<32x256xf32>
    %160 = math.tanh %159 : vector<32x256xf32>
    %cst_57 = arith.constant 5.000000e-01 : f32
    %161 = vector.broadcast %cst_57 : f32 to vector<32x256xf32>
    %162 = arith.mulf %161, %160 : vector<32x256xf32>
    %cst_58 = arith.constant 5.000000e-01 : f32
    %163 = vector.broadcast %cst_58 : f32 to vector<32x256xf32>
    %164 = arith.addf %162, %163 : vector<32x256xf32>
    %165 = vector.extract_strided_slice %156 {offsets = [32, 0], sizes = [32, 256], strides = [1, 1]} : vector<128x256xf32> to vector<32x256xf32>
    %cst_59 = arith.constant 5.000000e-01 : f32
    %166 = vector.broadcast %cst_59 : f32 to vector<32x256xf32>
    %167 = arith.mulf %166, %165 : vector<32x256xf32>
    %168 = math.tanh %167 : vector<32x256xf32>
    %cst_60 = arith.constant 5.000000e-01 : f32
    %169 = vector.broadcast %cst_60 : f32 to vector<32x256xf32>
    %170 = arith.mulf %169, %168 : vector<32x256xf32>
    %cst_61 = arith.constant 5.000000e-01 : f32
    %171 = vector.broadcast %cst_61 : f32 to vector<32x256xf32>
    %172 = arith.addf %170, %171 : vector<32x256xf32>
    %173 = vector.extract_strided_slice %156 {offsets = [64, 0], sizes = [32, 256], strides = [1, 1]} : vector<128x256xf32> to vector<32x256xf32>
    %174 = math.tanh %173 : vector<32x256xf32>
    %175 = vector.extract_strided_slice %156 {offsets = [96, 0], sizes = [32, 256], strides = [1, 1]} : vector<128x256xf32> to vector<32x256xf32>
    %cst_62 = arith.constant 5.000000e-01 : f32
    %176 = vector.broadcast %cst_62 : f32 to vector<32x256xf32>
    %177 = arith.mulf %176, %175 : vector<32x256xf32>
    %178 = math.tanh %177 : vector<32x256xf32>
    %cst_63 = arith.constant 5.000000e-01 : f32
    %179 = vector.broadcast %cst_63 : f32 to vector<32x256xf32>
    %180 = arith.mulf %179, %178 : vector<32x256xf32>
    %cst_64 = arith.constant 5.000000e-01 : f32
    %181 = vector.broadcast %cst_64 : f32 to vector<32x256xf32>
    %182 = arith.addf %180, %181 : vector<32x256xf32>
    %183 = arith.mulf %172, %149 : vector<32x256xf32>
    %184 = arith.mulf %164, %174 : vector<32x256xf32>
    %185 = arith.addf %183, %184 : vector<32x256xf32>
    %186 = math.tanh %185 : vector<32x256xf32>
    %187 = arith.mulf %182, %186 : vector<32x256xf32>
    %c640 = arith.constant 640 : index
    %c0_65 = arith.constant 0 : index
    %188 = vector.load %arg8[%c640, %c0_65] : memref<1088x256xbf16, #tpu.memory_space<vmem>>, vector<128x256xbf16>
    %189 = arith.extf %188 : vector<128x256xbf16> to vector<128x256xf32>
    %190 = arith.truncf %187 : vector<32x256xf32> to vector<32x256xbf16>
    %cst_66 = arith.constant dense<0.000000e+00> : vector<128x256xf32>
    %191 = tpu.matmul %5, %190, %cst_66 {dimension_numbers = #tpu.dot_dimension_numbers<[1], [0], [0], [1], [0, 0, 1, 1], [], []>} : vector<128x32xbf16>, vector<32x256xbf16>, vector<128x256xf32> -> vector<128x256xf32>
    %192 = arith.addf %189, %191 : vector<128x256xf32>
    %193 = vector.extract_strided_slice %192 {offsets = [0, 0], sizes = [32, 256], strides = [1, 1]} : vector<128x256xf32> to vector<32x256xf32>
    %cst_67 = arith.constant 5.000000e-01 : f32
    %194 = vector.broadcast %cst_67 : f32 to vector<32x256xf32>
    %195 = arith.mulf %194, %193 : vector<32x256xf32>
    %196 = math.tanh %195 : vector<32x256xf32>
    %cst_68 = arith.constant 5.000000e-01 : f32
    %197 = vector.broadcast %cst_68 : f32 to vector<32x256xf32>
    %198 = arith.mulf %197, %196 : vector<32x256xf32>
    %cst_69 = arith.constant 5.000000e-01 : f32
    %199 = vector.broadcast %cst_69 : f32 to vector<32x256xf32>
    %200 = arith.addf %198, %199 : vector<32x256xf32>
    %201 = vector.extract_strided_slice %192 {offsets = [32, 0], sizes = [32, 256], strides = [1, 1]} : vector<128x256xf32> to vector<32x256xf32>
    %cst_70 = arith.constant 5.000000e-01 : f32
    %202 = vector.broadcast %cst_70 : f32 to vector<32x256xf32>
    %203 = arith.mulf %202, %201 : vector<32x256xf32>
    %204 = math.tanh %203 : vector<32x256xf32>
    %cst_71 = arith.constant 5.000000e-01 : f32
    %205 = vector.broadcast %cst_71 : f32 to vector<32x256xf32>
    %206 = arith.mulf %205, %204 : vector<32x256xf32>
    %cst_72 = arith.constant 5.000000e-01 : f32
    %207 = vector.broadcast %cst_72 : f32 to vector<32x256xf32>
    %208 = arith.addf %206, %207 : vector<32x256xf32>
    %209 = vector.extract_strided_slice %192 {offsets = [64, 0], sizes = [32, 256], strides = [1, 1]} : vector<128x256xf32> to vector<32x256xf32>
    %210 = math.tanh %209 : vector<32x256xf32>
    %211 = vector.extract_strided_slice %192 {offsets = [96, 0], sizes = [32, 256], strides = [1, 1]} : vector<128x256xf32> to vector<32x256xf32>
    %cst_73 = arith.constant 5.000000e-01 : f32
    %212 = vector.broadcast %cst_73 : f32 to vector<32x256xf32>
    %213 = arith.mulf %212, %211 : vector<32x256xf32>
    %214 = math.tanh %213 : vector<32x256xf32>
    %cst_74 = arith.constant 5.000000e-01 : f32
    %215 = vector.broadcast %cst_74 : f32 to vector<32x256xf32>
    %216 = arith.mulf %215, %214 : vector<32x256xf32>
    %cst_75 = arith.constant 5.000000e-01 : f32
    %217 = vector.broadcast %cst_75 : f32 to vector<32x256xf32>
    %218 = arith.addf %216, %217 : vector<32x256xf32>
    %219 = arith.mulf %208, %185 : vector<32x256xf32>
    %220 = arith.mulf %200, %210 : vector<32x256xf32>
    %221 = arith.addf %219, %220 : vector<32x256xf32>
    %222 = math.tanh %221 : vector<32x256xf32>
    %223 = arith.mulf %218, %222 : vector<32x256xf32>
    %c768 = arith.constant 768 : index
    %c0_76 = arith.constant 0 : index
    %224 = vector.load %arg8[%c768, %c0_76] : memref<1088x256xbf16, #tpu.memory_space<vmem>>, vector<128x256xbf16>
    %225 = arith.extf %224 : vector<128x256xbf16> to vector<128x256xf32>
    %226 = arith.truncf %223 : vector<32x256xf32> to vector<32x256xbf16>
    %cst_77 = arith.constant dense<0.000000e+00> : vector<128x256xf32>
    %227 = tpu.matmul %5, %226, %cst_77 {dimension_numbers = #tpu.dot_dimension_numbers<[1], [0], [0], [1], [0, 0, 1, 1], [], []>} : vector<128x32xbf16>, vector<32x256xbf16>, vector<128x256xf32> -> vector<128x256xf32>
    %228 = arith.addf %225, %227 : vector<128x256xf32>
    %229 = vector.extract_strided_slice %228 {offsets = [0, 0], sizes = [32, 256], strides = [1, 1]} : vector<128x256xf32> to vector<32x256xf32>
    %cst_78 = arith.constant 5.000000e-01 : f32
    %230 = vector.broadcast %cst_78 : f32 to vector<32x256xf32>
    %231 = arith.mulf %230, %229 : vector<32x256xf32>
    %232 = math.tanh %231 : vector<32x256xf32>
    %cst_79 = arith.constant 5.000000e-01 : f32
    %233 = vector.broadcast %cst_79 : f32 to vector<32x256xf32>
    %234 = arith.mulf %233, %232 : vector<32x256xf32>
    %cst_80 = arith.constant 5.000000e-01 : f32
    %235 = vector.broadcast %cst_80 : f32 to vector<32x256xf32>
    %236 = arith.addf %234, %235 : vector<32x256xf32>
    %237 = vector.extract_strided_slice %228 {offsets = [32, 0], sizes = [32, 256], strides = [1, 1]} : vector<128x256xf32> to vector<32x256xf32>
    %cst_81 = arith.constant 5.000000e-01 : f32
    %238 = vector.broadcast %cst_81 : f32 to vector<32x256xf32>
    %239 = arith.mulf %238, %237 : vector<32x256xf32>
    %240 = math.tanh %239 : vector<32x256xf32>
    %cst_82 = arith.constant 5.000000e-01 : f32
    %241 = vector.broadcast %cst_82 : f32 to vector<32x256xf32>
    %242 = arith.mulf %241, %240 : vector<32x256xf32>
    %cst_83 = arith.constant 5.000000e-01 : f32
    %243 = vector.broadcast %cst_83 : f32 to vector<32x256xf32>
    %244 = arith.addf %242, %243 : vector<32x256xf32>
    %245 = vector.extract_strided_slice %228 {offsets = [64, 0], sizes = [32, 256], strides = [1, 1]} : vector<128x256xf32> to vector<32x256xf32>
    %246 = math.tanh %245 : vector<32x256xf32>
    %247 = vector.extract_strided_slice %228 {offsets = [96, 0], sizes = [32, 256], strides = [1, 1]} : vector<128x256xf32> to vector<32x256xf32>
    %cst_84 = arith.constant 5.000000e-01 : f32
    %248 = vector.broadcast %cst_84 : f32 to vector<32x256xf32>
    %249 = arith.mulf %248, %247 : vector<32x256xf32>
    %250 = math.tanh %249 : vector<32x256xf32>
    %cst_85 = arith.constant 5.000000e-01 : f32
    %251 = vector.broadcast %cst_85 : f32 to vector<32x256xf32>
    %252 = arith.mulf %251, %250 : vector<32x256xf32>
    %cst_86 = arith.constant 5.000000e-01 : f32
    %253 = vector.broadcast %cst_86 : f32 to vector<32x256xf32>
    %254 = arith.addf %252, %253 : vector<32x256xf32>
    %255 = arith.mulf %244, %221 : vector<32x256xf32>
    %256 = arith.mulf %236, %246 : vector<32x256xf32>
    %257 = arith.addf %255, %256 : vector<32x256xf32>
    %258 = math.tanh %257 : vector<32x256xf32>
    %259 = arith.mulf %254, %258 : vector<32x256xf32>
    %c896 = arith.constant 896 : index
    %c0_87 = arith.constant 0 : index
    %260 = vector.load %arg8[%c896, %c0_87] : memref<1088x256xbf16, #tpu.memory_space<vmem>>, vector<128x256xbf16>
    %261 = arith.extf %260 : vector<128x256xbf16> to vector<128x256xf32>
    %262 = arith.truncf %259 : vector<32x256xf32> to vector<32x256xbf16>
    %cst_88 = arith.constant dense<0.000000e+00> : vector<128x256xf32>
    %263 = tpu.matmul %5, %262, %cst_88 {dimension_numbers = #tpu.dot_dimension_numbers<[1], [0], [0], [1], [0, 0, 1, 1], [], []>} : vector<128x32xbf16>, vector<32x256xbf16>, vector<128x256xf32> -> vector<128x256xf32>
    %264 = arith.addf %261, %263 : vector<128x256xf32>
    %265 = vector.extract_strided_slice %264 {offsets = [0, 0], sizes = [32, 256], strides = [1, 1]} : vector<128x256xf32> to vector<32x256xf32>
    %cst_89 = arith.constant 5.000000e-01 : f32
    %266 = vector.broadcast %cst_89 : f32 to vector<32x256xf32>
    %267 = arith.mulf %266, %265 : vector<32x256xf32>
    %268 = math.tanh %267 : vector<32x256xf32>
    %cst_90 = arith.constant 5.000000e-01 : f32
    %269 = vector.broadcast %cst_90 : f32 to vector<32x256xf32>
    %270 = arith.mulf %269, %268 : vector<32x256xf32>
    %cst_91 = arith.constant 5.000000e-01 : f32
    %271 = vector.broadcast %cst_91 : f32 to vector<32x256xf32>
    %272 = arith.addf %270, %271 : vector<32x256xf32>
    %273 = vector.extract_strided_slice %264 {offsets = [32, 0], sizes = [32, 256], strides = [1, 1]} : vector<128x256xf32> to vector<32x256xf32>
    %cst_92 = arith.constant 5.000000e-01 : f32
    %274 = vector.broadcast %cst_92 : f32 to vector<32x256xf32>
    %275 = arith.mulf %274, %273 : vector<32x256xf32>
    %276 = math.tanh %275 : vector<32x256xf32>
    %cst_93 = arith.constant 5.000000e-01 : f32
    %277 = vector.broadcast %cst_93 : f32 to vector<32x256xf32>
    %278 = arith.mulf %277, %276 : vector<32x256xf32>
    %cst_94 = arith.constant 5.000000e-01 : f32
    %279 = vector.broadcast %cst_94 : f32 to vector<32x256xf32>
    %280 = arith.addf %278, %279 : vector<32x256xf32>
    %281 = vector.extract_strided_slice %264 {offsets = [64, 0], sizes = [32, 256], strides = [1, 1]} : vector<128x256xf32> to vector<32x256xf32>
    %282 = math.tanh %281 : vector<32x256xf32>
    %283 = vector.extract_strided_slice %264 {offsets = [96, 0], sizes = [32, 256], strides = [1, 1]} : vector<128x256xf32> to vector<32x256xf32>
    %cst_95 = arith.constant 5.000000e-01 : f32
    %284 = vector.broadcast %cst_95 : f32 to vector<32x256xf32>
    %285 = arith.mulf %284, %283 : vector<32x256xf32>
    %286 = math.tanh %285 : vector<32x256xf32>
    %cst_96 = arith.constant 5.000000e-01 : f32
    %287 = vector.broadcast %cst_96 : f32 to vector<32x256xf32>
    %288 = arith.mulf %287, %286 : vector<32x256xf32>
    %cst_97 = arith.constant 5.000000e-01 : f32
    %289 = vector.broadcast %cst_97 : f32 to vector<32x256xf32>
    %290 = arith.addf %288, %289 : vector<32x256xf32>
    %291 = arith.mulf %280, %257 : vector<32x256xf32>
    %292 = arith.mulf %272, %282 : vector<32x256xf32>
    %293 = arith.addf %291, %292 : vector<32x256xf32>
    %294 = math.tanh %293 : vector<32x256xf32>
    %295 = arith.mulf %290, %294 : vector<32x256xf32>
    %c0_98 = arith.constant 0 : index
    %c0_99 = arith.constant 0 : index
    %296 = vector.load %arg4[%c0_98, %c0_99] : memref<64x32xbf16, #tpu.memory_space<vmem>>, vector<64x32xbf16>
    %297 = arith.truncf %295 : vector<32x256xf32> to vector<32x256xbf16>
    %cst_100 = arith.constant dense<0.000000e+00> : vector<64x256xf32>
    %298 = tpu.matmul %296, %297, %cst_100 {dimension_numbers = #tpu.dot_dimension_numbers<[1], [0], [0], [1], [0, 0, 1, 1], [], []>} : vector<64x32xbf16>, vector<32x256xbf16>, vector<64x256xf32> -> vector<64x256xf32>
    %c1024 = arith.constant 1024 : index
    %c0_101 = arith.constant 0 : index
    %299 = vector.load %arg8[%c1024, %c0_101] : memref<1088x256xbf16, #tpu.memory_space<vmem>>, vector<64x256xbf16>
    %300 = arith.extf %299 : vector<64x256xbf16> to vector<64x256xf32>
    %301 = arith.addf %298, %300 : vector<64x256xf32>
    %cst_102 = arith.constant 0.000000e+00 : f32
    %302 = vector.broadcast %cst_102 : f32 to vector<64x256xf32>
    %303 = arith.maximumf %301, %302 : vector<64x256xf32>
    %c0_103 = arith.constant 0 : index
    %c0_104 = arith.constant 0 : index
    %304 = vector.load %arg5[%c0_103, %c0_104] : memref<64x1xf32, #tpu.memory_space<vmem>>, vector<64x1xf32>
    %305 = vector.broadcast %304 : vector<64x1xf32> to vector<64x256xf32>
    %306 = arith.mulf %305, %303 : vector<64x256xf32>
    %cst_105 = arith.constant dense<0.000000e+00> : vector<256xf32>
    %307 = vector.multi_reduction <add>, %306, %cst_105 [0] : vector<64x256xf32> to vector<256xf32>
    %308 = vector.shape_cast %307 : vector<256xf32> to vector<1x256xf32>
    %c0_106 = arith.constant 0 : index
    %c0_107 = arith.constant 0 : index
    %309 = vector.load %arg6[%c0_106, %c0_107] : memref<1x1xf32, #tpu.memory_space<vmem>>, vector<1x1xf32>
    %310 = vector.broadcast %309 : vector<1x1xf32> to vector<1x256xf32>
    %311 = arith.addf %308, %310 : vector<1x256xf32>
    %c0_108 = arith.constant 0 : index
    %c0_109 = arith.constant 0 : index
    %312 = vector.load %arg7[%c0_108, %c0_109] : memref<1x256xf32, #tpu.memory_space<vmem>>, vector<1x256xf32>
    tpu.vector_store %arg7[%c0_108, %c0_109], %311 {strides = array<i32>} : memref<1x256xf32, #tpu.memory_space<vmem>>, vector<1x256xf32>,
    return
  }
  func.func @transform_0(%arg0: i32) -> (i32, i32) {
    %c0_i32 = arith.constant 0 : i32
    %c0_i32_0 = arith.constant 0 : i32
    return %c0_i32, %arg0 : i32, i32
  }
  func.func @transform_1(%arg0: i32) -> (i32, i32) {
    %c0_i32 = arith.constant 0 : i32
    %c0_i32_0 = arith.constant 0 : i32
    %c0_i32_1 = arith.constant 0 : i32
    return %c0_i32, %c0_i32_0 : i32, i32
  }
  func.func @transform_2(%arg0: i32) -> (i32, i32) {
    %c0_i32 = arith.constant 0 : i32
    %c0_i32_0 = arith.constant 0 : i32
    %c0_i32_1 = arith.constant 0 : i32
    return %c0_i32, %c0_i32_0 : i32, i32
  }
  func.func @transform_3(%arg0: i32) -> (i32, i32) {
    %c0_i32 = arith.constant 0 : i32
    %c0_i32_0 = arith.constant 0 : i32
    %c0_i32_1 = arith.constant 0 : i32
    return %c0_i32, %c0_i32_0 : i32, i32
  }
  func.func @transform_4(%arg0: i32) -> (i32, i32) {
    %c0_i32 = arith.constant 0 : i32
    %c0_i32_0 = arith.constant 0 : i32
    %c0_i32_1 = arith.constant 0 : i32
    return %c0_i32, %c0_i32_0 : i32, i32
  }
  func.func @transform_5(%arg0: i32) -> (i32, i32) {
    %c0_i32 = arith.constant 0 : i32
    %c0_i32_0 = arith.constant 0 : i32
    %c0_i32_1 = arith.constant 0 : i32
    return %c0_i32, %c0_i32_0 : i32, i32
  }
  func.func @transform_6(%arg0: i32) -> (i32, i32) {
    %c0_i32 = arith.constant 0 : i32
    %c0_i32_0 = arith.constant 0 : i32
    return %c0_i32, %arg0 : i32, i32
  }
}

</mosaic_0001>

<bundles_post_ra>
// kernel: player_performance_forward.1
= control target key start
LH: loop header
LB: loop body
LE: loop exit
PB: predicated region body
PF: predicated region fallthrough
CT: control target
= control target key end

     0   :  { %vm725_vm0 = vcmask 1043456   ;;  %v8389_v1 = vmov 0   ;;  %vm520_vm1 = vcmask 195584   ;;  %vm2501_vm2 = vcmask 261120   ;;  %s8382_s0 = inlined_call_operand.vmem [shape: bf16[24,256], index: 0, kind: input, shape index: {}]   ;;  %s8383_s1 = inlined_call_operand.vmem [shape: bf16[1088,24], index: 1, kind: input, shape index: {}]   ;;  %s8384_s2 = inlined_call_operand.vmem [shape: bf16[128,32], index: 2, kind: input, shape index: {}]   ;;  %s8385_s3 = inlined_call_operand.vmem [shape: bf16[64,32], index: 3, kind: input, shape index: {}]   ;;  %s8386_s4 = inlined_call_operand.vmem [shape: f32[64,1], index: 4, kind: input, shape index: {}]   ;;  %s8387_s5 = inlined_call_operand.<no memory space> [shape: f32[1,1], index: 5, kind: input, shape index: {}]   ;;  %s8388_s6 = inlined_call_operand.vmem [shape: f32[1,256], index: 6, kind: output, shape index: {}]  }
   0x1   :  { %v164_v0 = vld [vmem:[%s8382_s0 + $0x10] sm:$0xff]  ;;  %764 = vmatprep.mubr.bf16.mxu0 %v8389_v1  ;;  %1424 = vmatprep.mubr.bf16.mxu1 %v8389_v1  ;;  %v6018_v4 = vld [vmem:[%s8382_s0 + $0x4] ss:$8 sps:$4 sm:$0xff]   ;;  %v6020_v6 = vld [vmem:[%s8382_s0] ss:$8 sps:$4 sm:$0xff]  }
   0x2   :  { %v5559_v2 = vcombine.high %v164_v0, %v164_v0  ;;  %v5558_v3 = vcombine.low %v164_v0, %v164_v0  ;;  %6014 = vset.pattern.permute.xlu0 %v8389_v1  ;;  %6015 = vset.pattern.permute.xlu1 %v8389_v1  ;;  %v6021_v7 = vld [vmem:[%s8383_s1] sm:$0xff]   ;;  %v6022_v8 = vld [vmem:[%s8383_s1 + $0x210] sm:$0xff]   ;;  %v6023_v9 = vld [vmem:[%s8383_s1 + $0x8] sm:$0xff]  }
   0x3   :  { %v6024_v10 = vld [vmem:[%s8383_s1 + $0x218] sm:$0xff]   ;;  %v6836_v11 = vld [vmem:[%s8384_s2] sm:$0xff]   ;;  %v6026_v12 = vld [vmem:[%s8383_s1 + $0x10] sm:$0xff]  }
   0x4   :  { %5560 = vmatprep.subr.msk.bf16.mxu0 %vm725_vm0, %v5559_v2  ;;  %6008 = vmatprep.subr.msk.bf16.mxu1 %vm725_vm0, %v5559_v2  ;;  %v727_v5 = vsel %vm725_vm0, %v5558_v3, 0  ;;  %v6849_v13 = vld [vmem:[%s8384_s2 + $0x8] sm:$0xff]   ;;  %v6854_v14 = vld [vmem:[%s8384_s2 + $0x10] sm:$0xff]   ;;  %v6029_v15 = vld [vmem:[%s8383_s1 + $0x18] sm:$0xff]  }
   0x5   :  { %745 = vmatpush1.bf16.msra.mxu0 %v727_v5  ;;  %6010 = vmatpush1.bf16.msra.mxu1 %v727_v5  ;;  %v6868_v16 = vld [vmem:[%s8384_s2 + $0x18] sm:$0xff]   ;;  %v6873_v17 = vld [vmem:[%s8384_s2 + $0x20] sm:$0xff]   ;;  %v6887_v19 = vld [vmem:[%s8384_s2 + $0x28] sm:$0xff]  }
   0x6   :  { %746 = vmatprep.subr.bf16.mxu0 %v6018_v4  ;;  %6009 = vmatprep.subr.bf16.mxu1 %v6018_v4  ;;  %v6031_v18 = vld [vmem:[%s8383_s1 + $0x20] sm:$0xff]   ;;  %v6892_v20 = vld [vmem:[%s8384_s2 + $0x30] sm:$0xff]   ;;  %v6034_v21 = vld [vmem:[%s8383_s1 + $0x28] sm:$0xff]  }
   0x7   :  { %v6906_v22 = vld [vmem:[%s8384_s2 + $0x38] sm:$0xff]   ;;  %v6035_v23 = vld [vmem:[%s8383_s1 + $0x30] sm:$0xff]   ;;  %v6039_v25 = vld [vmem:[%s8383_s1 + $0x40] sm:$0xff]  }
   0x8   :  { %v6038_v24 = vld [vmem:[%s8383_s1 + $0x38] sm:$0xff]   ;;  %v6040_v26 = vld [vmem:[%s8383_s1 + $0x48] sm:$0xff]   ;;  %v6041_v27 = vld [vmem:[%s8383_s1 + $0x50] sm:$0xff]  }
   0x9   :  { %747 = vmatpush1.bf16.msra.mxu0 %v6020_v6  ;;  %6011 = vmatpush1.bf16.msra.mxu1 %v6020_v6  ;;  %v6042_v28 = vld [vmem:[%s8383_s1 + $0x58] sm:$0xff]   ;;  %v6043_v29 = vld [vmem:[%s8383_s1 + $0x60] sm:$0xff]   ;;  %v6044_v30 = vld [vmem:[%s8383_s1 + $0x68] sm:$0xff]  }
   0xa   :  { %5990 = vmatprep.subr.bf16.mxu1 %v8389_v1  ;;  %v6045_v40 = vld [vmem:[%s8383_s1 + $0x70] sm:$0xff]   ;;  %v6046_v53 = vld [vmem:[%s8383_s1 + $0x78] sm:$0xff]  }
   0xc   :  { %5561 = vmatmul.mubr.msk.bf16.vlgmr.msra.gmra.mxu0 %vm520_vm1, %v6021_v7  ;;  %5627 = vmatmul.mubr.msk.bf16.vlgmr.msra.gmra.mxu1 %vm520_vm1, %v6022_v8 }
   0xd   :  { %774 = vmatprep.mubr.bf16.mxu0 %v8389_v1  ;;  %1434 = vmatprep.mubr.bf16.mxu1 %v8389_v1 }
   0xe   :  { %5991 = vmatpush3.bf16.msra.mxu1 %v8389_v1 }
  0x14   :  { %5562 = vmatmul.mubr.msk.bf16.gmra.mxu0 %vm520_vm1, %v6023_v9  ;;  %5628 = vmatmul.mubr.msk.bf16.gmra.mxu1 %vm520_vm1, %v6024_v10 }
  0x15   :  { %784 = vmatprep.mubr.bf16.mxu0 %v8389_v1  ;;  %5992 = vmatprep.mubr.msk.bf16.mxu1 %vm2501_vm2, %v6836_v11 }
  0x1c   :  { %5563 = vmatmul.mubr.msk.bf16.gmra.mxu0 %vm520_vm1, %v6026_v12  ;;  %5993 = vmatmul.mubr.msk.bf16.vlgmr.msra.gmra.mxu1 %vm2501_vm2, %v6849_v13 }
  0x1d   :  { %794 = vmatprep.mubr.bf16.mxu0 %v8389_v1  ;;  %5996 = vmatprep.mubr.msk.bf16.mxu1 %vm2501_vm2, %v6854_v14 }
  0x24   :  { %5564 = vmatmul.mubr.msk.bf16.gmra.mxu0 %vm520_vm1, %v6029_v15  ;;  %5997 = vmatmul.mubr.msk.bf16.gmra.mxu1 %vm2501_vm2, %v6868_v16 }
  0x25   :  { %804 = vmatprep.mubr.bf16.mxu0 %v8389_v1  ;;  %6000 = vmatprep.mubr.msk.bf16.mxu1 %vm2501_vm2, %v6873_v17 }
  0x2c   :  { %5565 = vmatmul.mubr.msk.bf16.gmra.mxu0 %vm520_vm1, %v6031_v18  ;;  %6001 = vmatmul.mubr.msk.bf16.gmra.mxu1 %vm2501_vm2, %v6887_v19 }
  0x2d   :  { %814 = vmatprep.mubr.bf16.mxu0 %v8389_v1  ;;  %6004 = vmatprep.mubr.msk.bf16.mxu1 %vm2501_vm2, %v6892_v20 }
  0x34   :  { %5566 = vmatmul.mubr.msk.bf16.gmra.mxu0 %vm520_vm1, %v6034_v21  ;;  %6005 = vmatmul.mubr.msk.bf16.gmra.mxu1 %vm2501_vm2, %v6906_v22 }
  0x35   :  { %824 = vmatprep.mubr.bf16.mxu0 %v8389_v1  ;;  %2899 = vmatprep.mubr.bf16.mxu1 %v8389_v1 }
  0x3c   :  { %5567 = vmatmul.mubr.msk.bf16.gmra.mxu0 %vm520_vm1, %v6035_v23 }
  0x3d   :  { %834 = vmatprep.mubr.bf16.mxu0 %v8389_v1 }
  0x44   :  { %5568 = vmatmul.mubr.msk.bf16.gmra.mxu0 %vm520_vm1, %v6038_v24 }
  0x45   :  { %844 = vmatprep.mubr.bf16.mxu0 %v8389_v1 }
  0x4c   :  { %5569 = vmatmul.mubr.msk.bf16.gmra.mxu0 %vm520_vm1, %v6039_v25 }
  0x4d   :  { %854 = vmatprep.mubr.bf16.mxu0 %v8389_v1 }
  0x54   :  { %5570 = vmatmul.mubr.msk.bf16.gmra.mxu0 %vm520_vm1, %v6040_v26 }
  0x55   :  { %864 = vmatprep.mubr.bf16.mxu0 %v8389_v1 }
  0x5c   :  { %5571 = vmatmul.mubr.msk.bf16.gmra.mxu0 %vm520_vm1, %v6041_v27 }
  0x5d   :  { %874 = vmatprep.mubr.bf16.mxu0 %v8389_v1 }
  0x64   :  { %5572 = vmatmul.mubr.msk.bf16.gmra.mxu0 %vm520_vm1, %v6042_v28 }
  0x65   :  { %884 = vmatprep.mubr.bf16.mxu0 %v8389_v1 }
  0x6c   :  { %5573 = vmatmul.mubr.msk.bf16.gmra.mxu0 %vm520_vm1, %v6043_v29 }
  0x6d   :  { %894 = vmatprep.mubr.bf16.mxu0 %v8389_v1 }
  0x74   :  { %5574 = vmatmul.mubr.msk.bf16.gmra.mxu0 %vm520_vm1, %v6044_v30 }
  0x75   :  { %904 = vmatprep.mubr.bf16.mxu0 %v8389_v1 }
  0x7c   :  { %5575 = vmatmul.mubr.msk.bf16.gmra.mxu0 %vm520_vm1, %v6045_v40 }
  0x7d   :  { %914 = vmatprep.mubr.bf16.mxu0 %v8389_v1 }
  0x84   :  { %5576 = vmatmul.mubr.msk.bf16.gmra.mxu0 %vm520_vm1, %v6046_v53 }
  0x85   :  { %924 = vmatprep.mubr.bf16.mxu0 %v8389_v1 }
  0xcc   :  { %v766_v31 = vpop.f32.mrf.mxu0  ;;  %v1426_v32 = vpop.f32.mrf.mxu1 }
  0xce   :  { %v768_v33 = vpop.f32.mrf.mxu0  ;;  %v1428_v34 = vpop.f32.mrf.mxu1 }
  0xcf   :  { %v6951_v35 = vpack.c.bf16 %v1428_v34, %v1426_v32  ;;  %v5845_v48 = vpack.c.bf16 %v768_v33, %v766_v31 }
  0xd0   :  { %v770_v36 = vpop.f32.mrf.mxu0  ;;  %v6954_v37 = vpop.f32.mrf.mxu1 }
  0xd1   :  { %8400 = vst [vmem:[#allocation4_spill] sm:$0xff] %v6951_v35  ;;  %8401 = vst [vmem:[#allocation5_spill] sm:$0xff] %v6954_v37  ;;  %v2430_v57 = vunpack.c.h.bf16 %v5845_v48  ;;  %v2429_v7 = vunpack.c.l.bf16 %v5845_v48 }
  0xd2   :  { %v772_v38 = vpop.f32.mrf.mxu0  ;;  %v6957_v39 = vpop.f32.mrf.mxu1 }
  0xd3   :  { %8402 = vst [vmem:[#allocation6_spill] sm:$0xff] %v6957_v39  ;;  %v5846_v49 = vpack.c.bf16 %v772_v38, %v770_v36  ;;  %v2672_v3 = vmul.f32 0.5, %v2430_v57 }
  0xd4   :  { %v776_v41 = vpop.f32.mrf.mxu0  ;;  %v1436_v42 = vpop.f32.mrf.mxu1 }
  0xd5   :  { %v2432_v58 = vunpack.c.h.bf16 %v5846_v49  ;;  %6101 = vtanh.f32 %v2672_v3  ;;  %v2431_v33 = vunpack.c.l.bf16 %v5846_v49 }
  0xd6   :  { %v778_v43 = vpop.f32.mrf.mxu0  ;;  %v1438_v44 = vpop.f32.mrf.mxu1 }
  0xd7   :  { %v6962_v45 = vpack.c.bf16 %v1438_v44, %v1436_v42  ;;  %v5847_v52 = vpack.c.bf16 %v778_v43, %v776_v41  ;;  %v2674_v5 = vmul.f32 0.5, %v2432_v58 }
  0xd8   :  { %v780_v46 = vpop.f32.mrf.mxu0  ;;  %v6965_v47 = vpop.f32.mrf.mxu1 }
  0xd9   :  { %8403 = vst [vmem:[#allocation7_spill] sm:$0xff] %v6962_v45  ;;  %8404 = vst [vmem:[#allocation8_spill] sm:$0xff] %v6965_v47  ;;  %v2434_v61 = vunpack.c.h.bf16 %v5847_v52  ;;  %v2433_v63 = vunpack.c.l.bf16 %v5847_v52  ;;  %6103 = vtanh.f32 %v2674_v5 }
  0xda   :  { %v782_v50 = vpop.f32.mrf.mxu0  ;;  %v6968_v51 = vpop.f32.mrf.mxu1 }
  0xdb   :  { %8405 = vst [vmem:[#allocation9_spill] sm:$0xff] %v6968_v51  ;;  %v5848_v54 = vpack.c.bf16 %v782_v50, %v780_v46  ;;  %v2676_v10 = vmul.f32 0.5, %v2434_v61 }
  0xdc   :  { %v786_v55 = vpop.f32.mrf.mxu0  ;;  %v5994_v56 = vpop.f32.mrf.mxu1 }
  0xdd   :  { %v2436_v62 = vunpack.c.h.bf16 %v5848_v54  ;;  %v2643_v6 = vadd.f32 %v5994_v56, %v2433_v63  ;;  %v2435_v18 = vunpack.c.l.bf16 %v5848_v54  ;;  %6105 = vtanh.f32 %v2676_v10 }
  0xde   :  { %v788_v59 = vpop.f32.mrf.mxu0  ;;  %v2560_v60 = vpop.f32.mrf.mxu1 }
  0xdf   :  { %v5849_v4 = vpack.c.bf16 %v788_v59, %v786_v55  ;;  %v2678_v12 = vmul.f32 0.5, %v2436_v62  ;;  %v2639_v15 = vadd.f32 %v2560_v60, %v2429_v7  ;;  %v2675_v26 = vmul.f32 0.5, %v2643_v6 }
  0xe0   :  { %v790_v0 = vpop.f32.mrf.mxu0  ;;  %v5995_v2 = vpop.f32.mrf.mxu1 }
  0xe1   :  { %v2438_v25 = vunpack.c.h.bf16 %v5849_v4  ;;  %v2645_v27 = vadd.f32 %v5995_v2, %v2435_v18  ;;  %6107 = vtanh.f32 %v2678_v12  ;;  %v2671_v32 = vmul.f32 0.5, %v2639_v15 }
  0xe2   :  { %v792_v8 = vpop.f32.mrf.mxu0  ;;  %v2564_v9 = vpop.f32.mrf.mxu1  ;;  %v2437_v42 = vunpack.c.l.bf16 %v5849_v4  ;;  %6109 = vtanh.f32 %v2675_v26 }
  0xe3   :  { %v5850_v21 = vpack.c.bf16 %v792_v8, %v790_v0  ;;  %v2704_v38 = vmul.f32 0.5, %v2438_v25  ;;  %v2677_v43 = vmul.f32 0.5, %v2645_v27  ;;  %v2641_v44 = vadd.f32 %v2564_v9, %v2431_v33  ;;  %v6102_v6 = vpop.eup %6101 }
  0xe4   :  { %v796_v23 = vpop.f32.mrf.mxu0  ;;  %v5998_v24 = vpop.f32.mrf.mxu1  ;;  %6111 = vtanh.f32 %v2671_v32  ;;  %v2688_v32 = vmul.f32 0.5, %v6102_v6 }
  0xe5   :  { %v2440_v30 = vunpack.c.h.bf16 %v5850_v21  ;;  %v2439_v54 = vunpack.c.l.bf16 %v5850_v21  ;;  %6113 = vtanh.f32 %v2704_v38  ;;  %v2673_v60 = vmul.f32 0.5, %v2641_v44 }
  0xe6   :  { %v798_v28 = vpop.f32.mrf.mxu0  ;;  %v2580_v29 = vpop.f32.mrf.mxu1  ;;  %6115 = vtanh.f32 %v2677_v43 }
  0xe7   :  { %v5851_v31 = vpack.c.bf16 %v798_v28, %v796_v23  ;;  %v2706_v50 = vmul.f32 0.5, %v2440_v30  ;;  %v2647_v53 = vadd.f32 %v2580_v29, %v2437_v42  ;;  %v6104_v10 = vpop.eup %6103 }
  0xe8   :  { %v800_v34 = vpop.f32.mrf.mxu0  ;;  %v5999_v36 = vpop.f32.mrf.mxu1  ;;  %v2690_v33 = vmul.f32 0.5, %v6104_v10 }
  0xe9   :  { %v2441_v40 = vunpack.c.l.bf16 %v5851_v31  ;;  %v2442_v41 = vunpack.c.h.bf16 %v5851_v31  ;;  %6117 = vtanh.f32 %v2706_v50  ;;  %v2703_v0 = vmul.f32 0.5, %v2647_v53 }
  0xea   :  { %v802_v46 = vpop.f32.mrf.mxu0  ;;  %v2584_v48 = vpop.f32.mrf.mxu1  ;;  %v6977_v53 = vadd.f32 0.5, %v2688_v32 }
  0xeb   :  { %v2651_v52 = vadd.f32 %v5998_v24, %v2441_v40  ;;  %v2708_v55 = vmul.f32 0.5, %v2442_v41  ;;  %v5852_v56 = vpack.c.bf16 %v802_v46, %v800_v34  ;;  %v2649_v59 = vadd.f32 %v2584_v48, %v2439_v54  ;;  %v6106_v21 = vpop.eup %6105 }
  0xec   :  { %v806_v57 = vpop.f32.mrf.mxu0  ;;  %v6002_v49 = vpop.f32.mrf.mxu1 }
  0xed   :  { %v2707_v58 = vmul.f32 0.5, %v2651_v52  ;;  %v2443_v61 = vunpack.c.l.bf16 %v5852_v56  ;;  %v2444_v62 = vunpack.c.h.bf16 %v5852_v56  ;;  %6119 = vtanh.f32 %v2708_v55 }
  0xee   :  { %v808_v63 = vpop.f32.mrf.mxu0  ;;  %v2600_v2 = vpop.f32.mrf.mxu1  ;;  %v2705_v5 = vmul.f32 0.5, %v2649_v59 }
  0xef   :  { %v2653_v3 = vadd.f32 %v5999_v36, %v2443_v61  ;;  %6121 = vtanh.f32 %v2707_v58  ;;  %v2710_v7 = vmul.f32 0.5, %v2444_v62  ;;  %v5853_v8 = vpack.c.bf16 %v808_v63, %v806_v57  ;;  %v6108_v24 = vpop.eup %6107 }
  0xf0   :  { %v810_v4 = vpop.f32.mrf.mxu0  ;;  %6123 = vtanh.f32 %v2673_v60  ;;  %v6003_v18 = vpop.f32.mrf.mxu1  ;;  %v6979_v57 = vadd.f32 0.5, %v2690_v33  ;;  %v2692_v58 = vmul.f32 0.5, %v6106_v21  ;;  %v2694_v59 = vmul.f32 0.5, %v6108_v24 }
  0xf1   :  { %6125 = vtanh.f32 %v2703_v0  ;;  %v2709_v12 = vmul.f32 0.5, %v2653_v3  ;;  %v2446_v26 = vunpack.c.h.bf16 %v5853_v8  ;;  %v6110_v28 = vpop.eup %6109  ;;  %v2445_v29 = vunpack.c.l.bf16 %v5853_v8 }
  0xf2   :  { %v812_v9 = vpop.f32.mrf.mxu0  ;;  %6127 = vtanh.f32 %v2705_v5  ;;  %v2604_v31 = vpop.f32.mrf.mxu1  ;;  %v2691_v63 = vmul.f32 0.5, %v6110_v28 }
  0xf3   :  { %v5854_v15 = vpack.c.bf16 %v812_v9, %v810_v4  ;;  %6129 = vtanh.f32 %v2710_v7  ;;  %v6112_v36 = vpop.eup %6111  ;;  %v2655_v48 = vadd.f32 %v2600_v2, %v2445_v29 }
  0xf4   :  { %v816_v23 = vpop.f32.mrf.mxu0  ;;  %6131 = vtanh.f32 %v2709_v12  ;;  %v6975_v42 = vpop.f32.mrf.mxu1  ;;  %v2687_v4 = vmul.f32 0.5, %v6112_v36  ;;  %v2699_v36 = vadd.f32 0.5, %v2691_v63 }
  0xf5   :  { %v2448_v25 = vunpack.c.h.bf16 %v5854_v15  ;;  %v2447_v41 = vunpack.c.l.bf16 %v5854_v15  ;;  %v6114_v43 = vpop.eup %6113  ;;  %v2700_v15 = vadd.f32 0.5, %v2692_v58 }
  0xf6   :  { %v818_v27 = vpop.f32.mrf.mxu0  ;;  %v6116_v46 = vpop.eup %6115  ;;  %v2720_v8 = vmul.f32 0.5, %v6114_v43 }
  0xf7   :  { %v5855_v30 = vpack.c.bf16 %v818_v27, %v816_v23  ;;  %6133 = vtanh.f32 %v2448_v25  ;;  %v6118_v52 = vpop.eup %6117  ;;  %v2657_v60 = vadd.f32 %v2604_v31, %v2447_v41  ;;  %v2620_v61 = vpop.f32.mrf.mxu1  ;;  %v2693_v27 = vmul.f32 0.5, %v6116_v46 }
  0xf8   :  { %v820_v34 = vpop.f32.mrf.mxu0  ;;  %6135 = vtanh.f32 %v2446_v26  ;;  %v2722_v5 = vmul.f32 0.5, %v6118_v52  ;;  %v6983_v26 = vadd.f32 0.5, %v2694_v59 }
  0xf9   :  { %v2449_v38 = vunpack.c.l.bf16 %v5855_v30  ;;  %v2450_v40 = vunpack.c.h.bf16 %v5855_v30  ;;  %v6981_v24 = vpop.f32.mrf.mxu1 }
  0xfa   :  { %v822_v44 = vpop.f32.mrf.mxu0  ;;  %v6120_v56 = vpop.eup %6119  ;;  %v2730_v31 = vadd.f32 0.5, %v2722_v5 }
  0xfb   :  { %v2659_v50 = vadd.f32 %v6002_v49, %v2449_v38  ;;  %6137 = vtanh.f32 %v2450_v40  ;;  %v5856_v54 = vpack.c.bf16 %v822_v44, %v820_v34  ;;  %v2724_v9 = vmul.f32 0.5, %v6120_v56  ;;  %v2624_v52 = vpop.f32.mrf.mxu1 }
  0xfc   :  { %v826_v55 = vpop.f32.mrf.mxu0  ;;  %v6122_v62 = vpop.eup %6121  ;;  %v6985_v38 = vadd.f32 0.5, %v2720_v8  ;;  %v6987_v40 = vadd.f32 0.5, %v2687_v4 }
  0xfd   :  { %6139 = vtanh.f32 %v2659_v50  ;;  %v2451_v0 = vunpack.c.l.bf16 %v5856_v54  ;;  %v2452_v3 = vunpack.c.h.bf16 %v5856_v54  ;;  %v6124_v49 = vpop.eup %6123  ;;  %v2723_v21 = vmul.f32 0.5, %v6122_v62 }
  0xfe   :  { %v828_v2 = vpop.f32.mrf.mxu0  ;;  %6141 = vtanh.f32 %v2655_v48  ;;  %v6126_v7 = vpop.eup %6125  ;;  %v2689_v28 = vmul.f32 0.5, %v6124_v49  ;;  %v2732_v41 = vadd.f32 0.5, %v2724_v9 }
  0xff   :  { %v5857_v6 = vpack.c.bf16 %v828_v2, %v826_v55  ;;  %v2661_v10 = vadd.f32 %v6003_v18, %v2451_v0  ;;  %6143 = vtanh.f32 %v2452_v3  ;;  %v6128_v25 = vpop.eup %6127  ;;  %v2719_v32 = vmul.f32 0.5, %v6126_v7 }
 0x100   :  { %v830_v12 = vpop.f32.mrf.mxu0  ;;  %6145 = vtanh.f32 %v2657_v60  ;;  %v6130_v30 = vpop.eup %6129  ;;  %v2731_v44 = vadd.f32 0.5, %v2723_v21  ;;  %v2721_v48 = vmul.f32 0.5, %v6128_v25  ;;  %v2701_v55 = vadd.f32 0.5, %v2693_v27 }
 0x101   :  { %v2453_v23 = vunpack.c.l.bf16 %v5857_v6  ;;  %6147 = vtanh.f32 %v2661_v10  ;;  %v2454_v33 = vunpack.c.h.bf16 %v5857_v6  ;;  %v6132_v34 = vpop.eup %6131  ;;  %v2697_v56 = vadd.f32 0.5, %v2689_v28 }
 0x102   :  { %v832_v29 = vpop.f32.mrf.mxu0  ;;  %v2726_v58 = vmul.f32 0.5, %v6130_v30  ;;  %v2778_v0 = vmul.f32 0.0, %v2730_v31  ;;  %v2727_v63 = vadd.f32 0.5, %v2719_v32  ;;  %v2725_v3 = vmul.f32 0.5, %v6132_v34 }
 0x103   :  { %v5858_v18 = vpack.c.bf16 %v832_v29, %v830_v12  ;;  %v2663_v46 = vadd.f32 %v2620_v61, %v2453_v23  ;;  %v2744_v2 = vmul.f32 0.5, %v2454_v33  ;;  %v2780_v49 = vmul.f32 0.0, %v2732_v41 }
 0x104   :  { %v836_v43 = vpop.f32.mrf.mxu0  ;;  %v6134_v54 = vpop.eup %6133  ;;  %v2779_v9 = vmul.f32 0.0, %v2731_v44  ;;  %v2729_v61 = vadd.f32 0.5, %v2721_v48  ;;  %v2734_v21 = vadd.f32 0.5, %v2726_v58  ;;  %v2733_v30 = vadd.f32 0.5, %v2725_v3 }
 0x105   :  { %v2456_v50 = vunpack.c.h.bf16 %v5858_v18  ;;  %v2455_v60 = vunpack.c.l.bf16 %v5858_v18  ;;  %v6136_v62 = vpop.eup %6135  ;;  %v2786_v10 = vmul.f32 %v6134_v54, %v6979_v57  ;;  %v2743_v12 = vmul.f32 0.5, %v2663_v46 }
 0x106   :  { %v838_v59 = vpop.f32.mrf.mxu0  ;;  %v2784_v23 = vmul.f32 %v6136_v62, %v6977_v53  ;;  %6149 = vtanh.f32 %v2744_v2  ;;  %v2782_v58 = vmul.f32 0.0, %v2734_v21 }
 0x107   :  { %v2746_v4 = vmul.f32 0.5, %v2456_v50  ;;  %v5859_v5 = vpack.c.bf16 %v838_v59, %v836_v43  ;;  %v2665_v6 = vadd.f32 %v2624_v52, %v2455_v60  ;;  %v6992_v57 = vadd.f32 %v2786_v10, %v2778_v0 }
 0x108   :  { %v840_v7 = vpop.f32.mrf.mxu0  ;;  %v6138_v8 = vpop.eup %6137 }
 0x109   :  { %v2457_v25 = vunpack.c.l.bf16 %v5859_v5  ;;  %v2458_v27 = vunpack.c.h.bf16 %v5859_v5  ;;  %v2745_v31 = vmul.f32 0.5, %v2665_v6  ;;  %v2788_v18 = vmul.f32 %v6138_v8, %v2700_v15 }
 0x10a   :  { %v842_v28 = vpop.f32.mrf.mxu0  ;;  %v6140_v29 = vpop.eup %6139  ;;  %6151 = vtanh.f32 %v2746_v4  ;;  %v2777_v4 = vmul.f32 0.0, %v2729_v61 }
 0x10b   :  { %v5860_v32 = vpack.c.bf16 %v842_v28, %v840_v7  ;;  %v6142_v33 = vpop.eup %6141  ;;  %v2667_v34 = vadd.f32 %v6975_v42, %v2457_v25  ;;  %v2748_v41 = vmul.f32 0.5, %v2458_v27  ;;  %6153 = vtanh.f32 %v2743_v12 }
 0x10c   :  { %v6144_v43 = vpop.eup %6143  ;;  %v2787_v50 = vmul.f32 %v6140_v29, %v2699_v36  ;;  %v2781_v42 = vmul.f32 0.0, %v2733_v30  ;;  %v6996_v60 = vadd.f32 %v2788_v18, %v2780_v49 }
 0x10d   :  { %v2459_v44 = vunpack.c.l.bf16 %v5860_v32  ;;  %v2460_v53 = vunpack.c.h.bf16 %v5860_v32  ;;  %v6146_v48 = vpop.eup %6145  ;;  %v2790_v46 = vmul.f32 %v6144_v43, %v6983_v26  ;;  %v2747_v52 = vmul.f32 0.5, %v2667_v34 }
 0x10e   :  { %6155 = vtanh.f32 %v2748_v41  ;;  %v6148_v54 = vpop.eup %6147  ;;  %v2785_v0 = vmul.f32 %v6146_v48, %v2697_v56  ;;  %v2776_v26 = vmul.f32 0.0, %v6985_v38  ;;  %v7001_v36 = vadd.f32 %v2787_v50, %v2779_v9 }
 0x10f   :  { %6157 = vtanh.f32 %v2745_v31  ;;  %v2669_v15 = vadd.f32 %v6981_v24, %v2459_v44  ;;  %v2750_v59 = vmul.f32 0.5, %v2460_v53  ;;  %v2789_v62 = vmul.f32 %v6148_v54, %v2701_v55 }
 0x110   :  { %6159 = vtanh.f32 %v2747_v52  ;;  %v6998_v3 = vadd.f32 %v2790_v46, %v2782_v58  ;;  %v2783_v24 = vmul.f32 %v6142_v33, %v6987_v40  ;;  %v7007_v49 = vadd.f32 %v2784_v23, %v2776_v26 }
 0x111   :  { %v2749_v2 = vmul.f32 0.5, %v2669_v15  ;;  %6161 = vtanh.f32 %v2750_v59  ;;  %v7005_v5 = vadd.f32 %v2789_v62, %v2781_v42  ;;  %v2775_v55 = vmul.f32 0.0, %v2727_v63 }
 0x112   :  { %6163 = vtanh.f32 %v6992_v57  ;;  %v7010_v56 = vadd.f32 %v2785_v0, %v2777_v4 }
 0x113   :  { %6165 = vtanh.f32 %v2749_v2  ;;  %v7014_v38 = vadd.f32 %v2783_v24, %v2775_v55  ;;  %v6150_v6 = vpop.eup %6149 }
 0x114   :  { %6167 = vtanh.f32 %v6996_v60  ;;  %v2760_v21 = vmul.f32 0.5, %v6150_v6 }
 0x115   :  { %6169 = vtanh.f32 %v6998_v3 }
 0x116   :  { %6171 = vtanh.f32 %v7001_v36  ;;  %v2768_v44 = vadd.f32 0.5, %v2760_v21  ;;  %v6048_v21 = vld [vmem:[%s8383_s1 + $0x88] sm:$0xff]  }
 0x117   :  { %6173 = vtanh.f32 %v7005_v5  ;;  %v6152_v40 = vpop.eup %6151 }
 0x118   :  { %6175 = vtanh.f32 %v7007_v49  ;;  %v6154_v7 = vpop.eup %6153  ;;  %v2762_v9 = vmul.f32 0.5, %v6152_v40 }
 0x119   :  { %6177 = vtanh.f32 %v7010_v56  ;;  %v2759_v33 = vmul.f32 0.5, %v6154_v7 }
 0x11a   :  { %6179 = vtanh.f32 %v7014_v38  ;;  %v2770_v31 = vadd.f32 0.5, %v2762_v9 }
 0x11b   :  { %v6156_v8 = vpop.eup %6155  ;;  %v2767_v59 = vadd.f32 0.5, %v2759_v33 }
 0x11c   :  { %v6158_v63 = vpop.eup %6157  ;;  %v2764_v61 = vmul.f32 0.5, %v6156_v8 }
 0x11d   :  { %v6160_v10 = vpop.eup %6159  ;;  %v2761_v28 = vmul.f32 0.5, %v6158_v63 }
 0x11e   :  { %v6162_v12 = vpop.eup %6161  ;;  %v2763_v23 = vmul.f32 0.5, %v6160_v10  ;;  %v2772_v27 = vadd.f32 0.5, %v2764_v61 }
 0x11f   :  { %v6164_v25 = vpop.eup %6163  ;;  %v2766_v29 = vmul.f32 0.5, %v6162_v12  ;;  %v2769_v48 = vadd.f32 0.5, %v2761_v28 }
 0x120   :  { %v6166_v30 = vpop.eup %6165  ;;  %v2771_v18 = vadd.f32 0.5, %v2763_v23  ;;  %v2810_v58 = vmul.f32 %v6164_v25, %v2770_v31  ;;  %v6049_v25 = vld [vmem:[%s8383_s1 + $0x90] sm:$0xff]  }
 0x121   :  { %v6168_v32 = vpop.eup %6167  ;;  %v2765_v34 = vmul.f32 0.5, %v6166_v30  ;;  %v2774_v41 = vadd.f32 0.5, %v2766_v29  ;;  %v6050_v29 = vld [vmem:[%s8383_s1 + $0x98] sm:$0xff]  }
 0x122   :  { %v6170_v43 = vpop.eup %6169  ;;  %v2812_v46 = vmul.f32 %v6168_v32, %v2772_v27  ;;  %v6051_v32 = vld [vmem:[%s8383_s1 + $0xa0] sm:$0xff]  }
 0x123   :  { %v6172_v53 = vpop.eup %6171  ;;  %v2773_v50 = vadd.f32 0.5, %v2765_v34  ;;  %v2814_v52 = vmul.f32 %v6170_v43, %v2774_v41  ;;  %v6052_v34 = vld [vmem:[%s8383_s1 + $0xa8] sm:$0xff]  }
 0x124   :  { %v6174_v54 = vpop.eup %6173  ;;  %v2811_v62 = vmul.f32 %v6172_v53, %v2771_v18 }
 0x125   :  { %v6176_v15 = vpop.eup %6175  ;;  %v2866_v42 = vpack.c.bf16 %v2814_v52, %v2812_v46  ;;  %v2813_v0 = vmul.f32 %v6174_v54, %v2773_v50  ;;  %v6053_v50 = vld [vmem:[%s8383_s1 + $0xb0] sm:$0xff]  }
 0x126   :  { %v6178_v2 = vpop.eup %6177  ;;  %v2808_v26 = vmul.f32 %v6176_v15, %v2768_v44 }
 0x127   :  { %v2809_v4 = vmul.f32 %v6178_v2, %v2769_v48  ;;  %2879 = vmatprep.subr.bf16.mxu1 %v2866_v42  ;;  %v2865_v24 = vpack.c.bf16 %v2813_v0, %v2811_v62  ;;  %v6180_v55 = vpop.eup %6179  ;;  %v6054_v0 = vld [vmem:[%s8383_s1 + $0xb8] sm:$0xff]  }
 0x128   :  { %v2864_v6 = vpack.c.bf16 %v2810_v58, %v2808_v26  ;;  %v2807_v40 = vmul.f32 %v6180_v55, %v2767_v59 }
 0x129   :  { %2880 = vmatpush1.bf16.msra.mxu1 %v2865_v24 }
 0x12a   :  { %2881 = vmatprep.subr.bf16.mxu1 %v2864_v6  ;;  %v2863_v7 = vpack.c.bf16 %v2809_v4, %v2807_v40 }
 0x12d   :  { %2882 = vmatpush1.bf16.msra.mxu1 %v2863_v7 }
 0x130   :  { %5781 = vmatmul.mubr.msk.bf16.vlgmr.msra.gmra.mxu1 %vm2501_vm2, %v6836_v11  ;;  %v846_v11 = vpop.f32.mrf.mxu0 }
 0x131   :  { %2909 = vmatprep.mubr.bf16.mxu1 %v8389_v1 }
 0x138   :  { %5782 = vmatmul.mubr.msk.bf16.gmra.mxu1 %vm2501_vm2, %v6849_v13  ;;  %v848_v13 = vpop.f32.mrf.mxu0 }
 0x139   :  { %2919 = vmatprep.mubr.bf16.mxu1 %v8389_v1  ;;  %v5861_v58 = vpack.c.bf16 %v848_v13, %v846_v11 }
 0x13b   :  { %v2831_v26 = vunpack.c.l.bf16 %v5861_v58  ;;  %v2832_v55 = vunpack.c.h.bf16 %v5861_v58 }
 0x140   :  { %5783 = vmatmul.mubr.msk.bf16.gmra.mxu1 %vm2501_vm2, %v6854_v14  ;;  %v850_v14 = vpop.f32.mrf.mxu0 }
 0x141   :  { %2929 = vmatprep.mubr.bf16.mxu1 %v8389_v1 }
 0x148   :  { %5784 = vmatmul.mubr.msk.bf16.gmra.mxu1 %vm2501_vm2, %v6868_v16  ;;  %v852_v16 = vpop.f32.mrf.mxu0 }
 0x149   :  { %2939 = vmatprep.mubr.bf16.mxu1 %v8389_v1  ;;  %v5862_v42 = vpack.c.bf16 %v852_v16, %v850_v14 }
 0x14b   :  { %v2833_v6 = vunpack.c.l.bf16 %v5862_v42  ;;  %v2834_v16 = vunpack.c.h.bf16 %v5862_v42 }
 0x150   :  { %5785 = vmatmul.mubr.msk.bf16.gmra.mxu1 %vm2501_vm2, %v6873_v17  ;;  %v856_v17 = vpop.f32.mrf.mxu0 }
 0x151   :  { %2949 = vmatprep.mubr.bf16.mxu1 %v8389_v1 }
 0x152   :  { %v858_v8 = vpop.f32.mrf.mxu0 }
 0x153   :  { %v5863_v2 = vpack.c.bf16 %v858_v8, %v856_v17 }
 0x154   :  { %v860_v63 = vpop.f32.mrf.mxu0 }
 0x158   :  { %5786 = vmatmul.mubr.msk.bf16.gmra.mxu1 %vm2501_vm2, %v6887_v19  ;;  %v862_v19 = vpop.f32.mrf.mxu0 }
 0x159   :  { %2959 = vmatprep.mubr.bf16.mxu1 %v8389_v1  ;;  %v5864_v11 = vpack.c.bf16 %v862_v19, %v860_v63 }
 0x15a   :  { %v866_v9 = vpop.f32.mrf.mxu0 }
 0x15c   :  { %v868_v61 = vpop.f32.mrf.mxu0 }
 0x15d   :  { %v5865_v13 = vpack.c.bf16 %v868_v61, %v866_v9  ;;  %v2838_v9 = vunpack.c.h.bf16 %v5864_v11 }
 0x15e   :  { %v7047_v10 = vpop.f32.mrf.mxu0 }
 0x160   :  { %5787 = vmatmul.mubr.msk.bf16.gmra.mxu1 %vm2501_vm2, %v6892_v20  ;;  %v6047_v20 = vld [vmem:[%s8383_s1 + $0x80] sm:$0xff]  }
 0x161   :  { %2969 = vmatprep.mubr.bf16.mxu1 %v8389_v1  ;;  %5577 = vmatmul.mubr.msk.bf16.gmra.mxu0 %vm520_vm1, %v6047_v20  ;;  %v2835_v20 = vunpack.c.l.bf16 %v5863_v2 }
 0x162   :  { %934 = vmatprep.mubr.bf16.mxu0 %v8389_v1 }
 0x168   :  { %5788 = vmatmul.mubr.msk.bf16.gmra.mxu1 %vm2501_vm2, %v6906_v22  ;;  %v872_v22 = vpop.f32.mrf.mxu0 }
 0x169   :  { %3240 = vmatprep.mubr.bf16.mxu1 %v8389_v1  ;;  %5578 = vmatmul.mubr.msk.bf16.gmra.mxu0 %vm520_vm1, %v6048_v21 }
 0x16a   :  { %v7051_v12 = vpop.f32.mrf.mxu0  ;;  %944 = vmatprep.mubr.bf16.mxu0 %v8389_v1 }
 0x16c   :  { %v7058_v23 = vpop.f32.mrf.mxu0 }
 0x16d   :  { %v5867_v61 = vpack.c.bf16 %v7058_v23, %v7051_v12 }
 0x16e   :  { %v7063_v27 = vpop.f32.mrf.mxu0 }
 0x16f   :  { %v2844_v23 = vunpack.c.h.bf16 %v5867_v61 }
 0x170   :  { %v7067_v28 = vpop.f32.mrf.mxu0 }
 0x171   :  { %5579 = vmatmul.mubr.msk.bf16.gmra.mxu0 %vm520_vm1, %v6049_v25 }
 0x172   :  { %954 = vmatprep.mubr.bf16.mxu0 %v8389_v1  ;;  %v7072_v30 = vpop.f32.mrf.mxu0 }
 0x174   :  { %v7076_v31 = vpop.f32.mrf.mxu0 }
 0x176   :  { %v7081_v33 = vpop.f32.mrf.mxu0 }
 0x178   :  { %v7085_v18 = vpop.f32.mrf.mxu0 }
 0x179   :  { %5580 = vmatmul.mubr.msk.bf16.gmra.mxu0 %vm520_vm1, %v6050_v29  ;;  %v2836_v29 = vunpack.c.h.bf16 %v5863_v2  ;;  %v2840_v2 = vunpack.c.h.bf16 %v5865_v13 }
 0x17a   :  { %964 = vmatprep.mubr.bf16.mxu0 %v8389_v1  ;;  %v7090_v41 = vpop.f32.mrf.mxu0 }
 0x17c   :  { %v7094_v53 = vpop.f32.mrf.mxu0 }
 0x17e   :  { %v7099_v52 = vpop.f32.mrf.mxu0 }
 0x180   :  { %v7103_v59 = vpop.f32.mrf.mxu0 }
 0x181   :  { %5581 = vmatmul.mubr.msk.bf16.gmra.mxu0 %vm520_vm1, %v6051_v32  ;;  %v5866_v32 = vpack.c.bf16 %v872_v22, %v7047_v10 }
 0x182   :  { %974 = vmatprep.mubr.bf16.mxu0 %v8389_v1  ;;  %v7108_v24 = vpop.f32.mrf.mxu0 }
 0x184   :  { %v7112_v25 = vpop.f32.mrf.mxu0 }
 0x186   :  { %v7117_v42 = vpop.f32.mrf.mxu0 }
 0x189   :  { %5582 = vmatmul.mubr.msk.bf16.gmra.mxu0 %vm520_vm1, %v6052_v34 }
 0x18a   :  { %984 = vmatprep.mubr.bf16.mxu0 %v8389_v1 }
 0x191   :  { %5583 = vmatmul.mubr.msk.bf16.gmra.mxu0 %vm520_vm1, %v6053_v50 }
 0x192   :  { %994 = vmatprep.mubr.bf16.mxu0 %v8389_v1 }
 0x199   :  { %5584 = vmatmul.mubr.msk.bf16.gmra.mxu0 %vm520_vm1, %v6054_v0  ;;  %v2837_v0 = vunpack.c.l.bf16 %v5864_v11 }
 0x19a   :  { %1004 = vmatprep.mubr.bf16.mxu0 %v8389_v1 }
 0x1f0   :  { %v2901_v43 = vpop.f32.mrf.mxu1 }
 0x1f1   :  { %v2980_v7 = vadd.f32 %v2901_v43, %v2831_v26  ;;  %v2839_v43 = vunpack.c.l.bf16 %v5865_v13 }
 0x1f2   :  { %v2903_v44 = vpop.f32.mrf.mxu1 }
 0x1f3   :  { %v2981_v14 = vadd.f32 %v2903_v44, %v2832_v55  ;;  %v3012_v50 = vmul.f32 0.5, %v2980_v7  ;;  %v2841_v7 = vunpack.c.l.bf16 %v5866_v32 }
 0x1f4   :  { %v2905_v48 = vpop.f32.mrf.mxu1 }
 0x1f5   :  { %v2982_v17 = vadd.f32 %v2905_v48, %v2833_v6  ;;  %v3013_v63 = vmul.f32 0.5, %v2981_v14  ;;  %6181 = vtanh.f32 %v3012_v50  ;;  %v912_v14 = vpop.f32.mrf.mxu0 }
 0x1f6   :  { %v2907_v46 = vpop.f32.mrf.mxu1 }
 0x1f7   :  { %v2983_v8 = vadd.f32 %v2907_v46, %v2834_v16  ;;  %v3014_v26 = vmul.f32 0.5, %v2982_v17  ;;  %v5868_v46 = vpack.c.bf16 %v7067_v28, %v7063_v27  ;;  %6183 = vtanh.f32 %v3013_v63 }
 0x1f8   :  { %v2911_v54 = vpop.f32.mrf.mxu1  ;;  %v2843_v16 = vunpack.c.l.bf16 %v5867_v61 }
 0x1f9   :  { %v2984_v58 = vadd.f32 %v2911_v54, %v2835_v20  ;;  %v3015_v10 = vmul.f32 0.5, %v2983_v8  ;;  %v2842_v54 = vunpack.c.h.bf16 %v5866_v32  ;;  %6185 = vtanh.f32 %v3014_v26 }
 0x1fa   :  { %v2913_v15 = vpop.f32.mrf.mxu1  ;;  %v2845_v17 = vunpack.c.l.bf16 %v5868_v46  ;;  %v2846_v50 = vunpack.c.h.bf16 %v5868_v46 }
 0x1fb   :  { %v2985_v19 = vadd.f32 %v2913_v15, %v2836_v29  ;;  %v3016_v6 = vmul.f32 0.5, %v2984_v58  ;;  %6187 = vtanh.f32 %v3015_v10  ;;  %v5869_v10 = vpack.c.bf16 %v7076_v31, %v7072_v30 }
 0x1fc   :  { %v2915_v62 = vpop.f32.mrf.mxu1 }
 0x1fd   :  { %v2986_v48 = vadd.f32 %v2915_v62, %v2837_v0  ;;  %v3017_v11 = vmul.f32 0.5, %v2985_v19  ;;  %6189 = vtanh.f32 %v3016_v6  ;;  %v916_v0 = vpop.f32.mrf.mxu0  ;;  %v2848_v31 = vunpack.c.h.bf16 %v5869_v10 }
 0x1fe   :  { %v2917_v4 = vpop.f32.mrf.mxu1 }
 0x1ff   :  { %v2987_v22 = vadd.f32 %v2917_v4, %v2838_v9  ;;  %v3018_v62 = vmul.f32 0.5, %v2986_v48  ;;  %6191 = vtanh.f32 %v3017_v11  ;;  %v918_v48 = vpop.f32.mrf.mxu0  ;;  %v7133_v11 = vpack.c.bf16 %v7112_v25, %v7108_v24 }
 0x200   :  { %v2921_v40 = vpop.f32.mrf.mxu1 }
 0x201   :  { %v2988_v15 = vadd.f32 %v2921_v40, %v2839_v43  ;;  %v3019_v27 = vmul.f32 0.5, %v2987_v22  ;;  %6193 = vtanh.f32 %v3018_v62  ;;  %v7136_v62 = vpack.c.bf16 %v912_v14, %v7117_v42 }
 0x202   :  { %v2923_v21 = vpop.f32.mrf.mxu1  ;;  %v2856_v42 = vunpack.c.h.bf16 %v7133_v11 }
 0x203   :  { %v2989_v28 = vadd.f32 %v2923_v21, %v2840_v2  ;;  %v3044_v8 = vmul.f32 0.5, %v2988_v15  ;;  %6195 = vtanh.f32 %v3019_v27  ;;  %v5871_v2 = vpack.c.bf16 %v7094_v53, %v7090_v41 }
 0x204   :  { %v2925_v34 = vpop.f32.mrf.mxu1 }
 0x205   :  { %v2990_v29 = vadd.f32 %v2925_v34, %v2841_v7  ;;  %v3045_v19 = vmul.f32 0.5, %v2989_v28  ;;  %6197 = vtanh.f32 %v3044_v8  ;;  %v5870_v34 = vpack.c.bf16 %v7085_v18, %v7081_v33  ;;  %v920_v33 = vpop.f32.mrf.mxu0 }
 0x206   :  { %v2927_v44 = vpop.f32.mrf.mxu1  ;;  %v5872_v7 = vpack.c.bf16 %v7103_v59, %v7099_v52  ;;  %v2851_v53 = vunpack.c.l.bf16 %v5871_v2  ;;  %v2855_v8 = vunpack.c.l.bf16 %v7133_v11 }
 0x207   :  { %v2991_v12 = vadd.f32 %v2927_v44, %v2842_v54  ;;  %v3046_v21 = vmul.f32 0.5, %v2990_v29  ;;  %v2850_v6 = vunpack.c.h.bf16 %v5870_v34  ;;  %v2849_v28 = vunpack.c.l.bf16 %v5870_v34  ;;  %v922_v59 = vpop.f32.mrf.mxu0 }
 0x208   :  { %v2931_v55 = vpop.f32.mrf.mxu1  ;;  %v2853_v25 = vunpack.c.l.bf16 %v5872_v7 }
 0x209   :  { %v3047_v40 = vmul.f32 0.5, %v2991_v12  ;;  %v2992_v43 = vadd.f32 %v2931_v55, %v2843_v16  ;;  %v6182_v55 = vpop.eup %6181 }
 0x20a   :  { %v2933_v20 = vpop.f32.mrf.mxu1  ;;  %v6184_v18 = vpop.eup %6183 }
 0x20b   :  { %v2993_v4 = vadd.f32 %v2933_v20, %v2844_v23  ;;  %6199 = vtanh.f32 %v3047_v40  ;;  %v3048_v46 = vmul.f32 0.5, %v2992_v43  ;;  %v6186_v30 = vpop.eup %6185  ;;  %v2852_v20 = vunpack.c.h.bf16 %v5871_v2 }
 0x20c   :  { %v2935_v13 = vpop.f32.mrf.mxu1  ;;  %v6188_v23 = vpop.eup %6187  ;;  %v7142_v43 = vpack.c.bf16 %v922_v59, %v920_v33 }
 0x20d   :  { %v2994_v32 = vadd.f32 %v2935_v13, %v2845_v17  ;;  %v3049_v63 = vmul.f32 0.5, %v2993_v4  ;;  %v6190_v16 = vpop.eup %6189  ;;  %v2847_v17 = vunpack.c.l.bf16 %v5869_v10  ;;  %v2854_v13 = vunpack.c.h.bf16 %v5872_v7 }
 0x20e   :  { %v2937_v58 = vpop.f32.mrf.mxu1  ;;  %v6192_v4 = vpop.eup %6191  ;;  %v3031_v33 = vmul.f32 0.5, %v6188_v23  ;;  %v2861_v7 = vunpack.c.l.bf16 %v7142_v43 }
 0x20f   :  { %v2995_v9 = vadd.f32 %v2937_v58, %v2846_v50  ;;  %v3050_v44 = vmul.f32 0.5, %v2994_v32  ;;  %6201 = vtanh.f32 %v3049_v63  ;;  %v6194_v29 = vpop.eup %6193  ;;  %v7139_v50 = vpack.c.bf16 %v918_v48, %v916_v0 }
 0x210   :  { %v7121_v61 = vpop.f32.mrf.mxu1  ;;  %6203 = vtanh.f32 %v3045_v19  ;;  %v6196_v14 = vpop.eup %6195  ;;  %v2857_v63 = vunpack.c.l.bf16 %v7136_v62  ;;  %v3030_v0 = vmul.f32 0.5, %v6186_v30  ;;  %v3034_v23 = vmul.f32 0.5, %v6194_v29 }
 0x211   :  { %v3051_v22 = vmul.f32 0.5, %v2995_v9  ;;  %6205 = vtanh.f32 %v3046_v21  ;;  %v3028_v9 = vmul.f32 0.5, %v6182_v55 }
 0x212   :  { %v2943_v26 = vpop.f32.mrf.mxu1  ;;  %6207 = vtanh.f32 %v3050_v44  ;;  %v6198_v19 = vpop.eup %6197  ;;  %v2858_v44 = vunpack.c.h.bf16 %v7136_v62  ;;  %v7153_v62 = vadd.f32 0.5, %v3030_v0  ;;  %v3042_v0 = vadd.f32 0.5, %v3034_v23 }
 0x213   :  { %6209 = vtanh.f32 %v3048_v46  ;;  %v2997_v27 = vadd.f32 %v2943_v26, %v2848_v31  ;;  %v3029_v46 = vmul.f32 0.5, %v6184_v18  ;;  %v3033_v18 = vmul.f32 0.5, %v6192_v4 }
 0x214   :  { %v2945_v54 = vpop.f32.mrf.mxu1  ;;  %6211 = vtanh.f32 %v3051_v22  ;;  %v2996_v22 = vadd.f32 %v7121_v61, %v2847_v17  ;;  %v3039_v4 = vadd.f32 0.5, %v3031_v33 }
 0x215   :  { %v2998_v21 = vadd.f32 %v2945_v54, %v2849_v28  ;;  %v3032_v54 = vmul.f32 0.5, %v6190_v16  ;;  %v3035_v16 = vmul.f32 0.5, %v6196_v14 }
 0x216   :  { %v2947_v15 = vpop.f32.mrf.mxu1 }
 0x217   :  { %v2999_v41 = vadd.f32 %v2947_v15, %v2850_v6  ;;  %v2859_v6 = vunpack.c.l.bf16 %v7139_v50  ;;  %v2860_v15 = vunpack.c.h.bf16 %v7139_v50  ;;  %v3043_v29 = vadd.f32 0.5, %v3035_v16 }
 0x218   :  { %v2951_v12 = vpop.f32.mrf.mxu1  ;;  %v6200_v26 = vpop.eup %6199 }
 0x219   :  { %6213 = vtanh.f32 %v2999_v41  ;;  %v3000_v40 = vadd.f32 %v2951_v12, %v2851_v53  ;;  %v3063_v30 = vmul.f32 0.5, %v6200_v26  ;;  %v2862_v53 = vunpack.c.h.bf16 %v7142_v43 }
 0x21a   :  { %v2953_v52 = vpop.f32.mrf.mxu1  ;;  %v7151_v12 = vadd.f32 0.5, %v3028_v9 }
 0x21b   :  { %v3001_v24 = vadd.f32 %v2953_v52, %v2852_v20  ;;  %v3037_v20 = vadd.f32 0.5, %v3029_v46  ;;  %v3071_v50 = vadd.f32 0.5, %v3063_v30 }
 0x21c   :  { %v2955_v32 = vpop.f32.mrf.mxu1  ;;  %v6202_v10 = vpop.eup %6201 }
 0x21d   :  { %6215 = vtanh.f32 %v3001_v24  ;;  %v3002_v58 = vadd.f32 %v2955_v32, %v2853_v25  ;;  %v6204_v55 = vpop.eup %6203  ;;  %v3065_v17 = vmul.f32 0.5, %v6202_v10  ;;  %v3040_v24 = vadd.f32 0.5, %v3032_v54 }
 0x21e   :  { %6217 = vtanh.f32 %v2997_v27  ;;  %v2957_v34 = vpop.f32.mrf.mxu1  ;;  %v6206_v31 = vpop.eup %6205  ;;  %v3060_v25 = vmul.f32 0.5, %v6198_v19 }
 0x21f   :  { %6219 = vtanh.f32 %v3002_v58  ;;  %v3003_v48 = vadd.f32 %v2957_v34, %v2854_v13  ;;  %v6208_v61 = vpop.eup %6207  ;;  %v3061_v13 = vmul.f32 0.5, %v6204_v55  ;;  %v3062_v32 = vmul.f32 0.5, %v6206_v31 }
 0x220   :  { %6221 = vtanh.f32 %v3000_v40  ;;  %v2961_v2 = vpop.f32.mrf.mxu1  ;;  %v6210_v27 = vpop.eup %6209  ;;  %v3041_v40 = vadd.f32 0.5, %v3033_v18  ;;  %v3066_v58 = vmul.f32 0.5, %v6208_v61  ;;  %v3073_v34 = vadd.f32 0.5, %v3065_v17 }
 0x221   :  { %6223 = vtanh.f32 %v3003_v48  ;;  %v6212_v59 = vpop.eup %6211  ;;  %v3069_v33 = vadd.f32 0.5, %v3061_v13  ;;  %v3004_v19 = vadd.f32 %v2961_v2, %v2855_v8  ;;  %v3070_v31 = vadd.f32 0.5, %v3062_v32 }
 0x222   :  { %6225 = vtanh.f32 %v2998_v21  ;;  %v2963_v41 = vpop.f32.mrf.mxu1  ;;  %v3064_v21 = vmul.f32 0.5, %v6210_v27  ;;  %v3067_v14 = vmul.f32 0.5, %v6212_v59  ;;  %v3119_v18 = vmul.f32 %v3071_v50, %v6992_v57 }
 0x223   :  { %6227 = vtanh.f32 %v2996_v22  ;;  %v3005_v28 = vadd.f32 %v2963_v41, %v2856_v42  ;;  %v3068_v22 = vadd.f32 0.5, %v3060_v25  ;;  %v3074_v30 = vadd.f32 0.5, %v3066_v58 }
 0x224   :  { %v2965_v52 = vpop.f32.mrf.mxu1  ;;  %v3072_v61 = vadd.f32 0.5, %v3064_v21  ;;  %v3121_v17 = vmul.f32 %v3073_v34, %v6996_v60  ;;  %v3084_v25 = vmul.f32 0.5, %v3004_v19  ;;  %v3117_v43 = vmul.f32 %v3069_v33, %v7007_v49 }
 0x225   :  { %v3006_v26 = vadd.f32 %v2965_v52, %v2857_v63  ;;  %v3085_v48 = vmul.f32 0.5, %v3005_v28  ;;  %v3075_v28 = vadd.f32 0.5, %v3067_v14 }
 0x226   :  { %v2967_v9 = vpop.f32.mrf.mxu1  ;;  %v6214_v10 = vpop.eup %6213 }
 0x227   :  { %v3007_v46 = vadd.f32 %v2967_v9, %v2858_v44  ;;  %v3086_v27 = vmul.f32 0.5, %v3006_v26  ;;  %v3127_v52 = vmul.f32 %v6214_v10, %v3039_v4  ;;  %6229 = vtanh.f32 %v3085_v48 }
 0x228   :  { %v2971_v42 = vpop.f32.mrf.mxu1 }
 0x229   :  { %v3087_v55 = vmul.f32 0.5, %v3007_v46  ;;  %v3008_v41 = vadd.f32 %v2971_v42, %v2859_v6  ;;  %v3122_v6 = vmul.f32 %v3074_v30, %v7005_v5  ;;  %v3123_v5 = vmul.f32 %v3075_v28, %v6998_v3 }
 0x22a   :  { %v6216_v54 = vpop.eup %6215  ;;  %v2973_v63 = vpop.f32.mrf.mxu1 }
 0x22b   :  { %v6218_v44 = vpop.eup %6217  ;;  %v3009_v23 = vadd.f32 %v2973_v63, %v2860_v15  ;;  %v3088_v11 = vmul.f32 0.5, %v3008_v41  ;;  %v3129_v59 = vmul.f32 %v6216_v54, %v3041_v40  ;;  %6231 = vtanh.f32 %v3087_v55 }
 0x22c   :  { %v6220_v16 = vpop.eup %6219  ;;  %v2975_v8 = vpop.f32.mrf.mxu1  ;;  %v3125_v58 = vmul.f32 %v6218_v44, %v3037_v20  ;;  %v7164_v40 = vadd.f32 %v3127_v52, %v3119_v18 }
 0x22d   :  { %v6222_v2 = vpop.eup %6221  ;;  %v3089_v57 = vmul.f32 0.5, %v3009_v23  ;;  %v3130_v32 = vmul.f32 %v6220_v16, %v3042_v0  ;;  %6233 = vtanh.f32 %v3088_v11  ;;  %v3010_v60 = vadd.f32 %v2975_v8, %v2861_v7 }
 0x22e   :  { %v6224_v13 = vpop.eup %6223  ;;  %v2977_v15 = vpop.f32.mrf.mxu1  ;;  %6235 = vtanh.f32 %v3086_v27  ;;  %v3128_v21 = vmul.f32 %v6222_v2, %v3040_v24  ;;  %v7167_v46 = vadd.f32 %v3129_v59, %v3121_v17  ;;  %v3120_v0 = vmul.f32 %v3072_v61, %v7001_v36 }
 0x22f   :  { %v6226_v50 = vpop.eup %6225  ;;  %v3131_v4 = vmul.f32 %v6224_v13, %v3043_v29  ;;  %v3011_v9 = vadd.f32 %v2977_v15, %v2862_v53  ;;  %6237 = vtanh.f32 %v3089_v57  ;;  %v3090_v34 = vmul.f32 0.5, %v3010_v60 }
 0x230   :  { %v6228_v26 = vpop.eup %6227  ;;  %6239 = vtanh.f32 %v3084_v25  ;;  %v3126_v20 = vmul.f32 %v6226_v50, %v7153_v62  ;;  %v7171_v29 = vadd.f32 %v3130_v32, %v3122_v6  ;;  %v3118_v24 = vmul.f32 %v3070_v31, %v7010_v56 }
 0x231   :  { %v3091_v7 = vmul.f32 0.5, %v3011_v9  ;;  %6241 = vtanh.f32 %v3090_v34  ;;  %v7174_v53 = vadd.f32 %v3131_v4, %v3123_v5  ;;  %v3124_v3 = vmul.f32 %v6228_v26, %v7151_v12 }
 0x232   :  { %v7178_v14 = vadd.f32 %v3128_v21, %v3120_v0  ;;  %v7181_v48 = vadd.f32 %v3125_v58, %v3117_v43  ;;  %v3116_v36 = vmul.f32 %v3068_v22, %v7014_v38  ;;  %v7185_v62 = vadd.f32 %v3126_v20, %v3118_v24  ;;  %v7198_v20 = vld [vmem:[%s8384_s2] sm:$0xff]   ;;  %v7206_v43 = vld [vmem:[%s8384_s2 + $0x8] sm:$0xff]   ;;  %v7214_v24 = vld [vmem:[%s8384_s2 + $0x10] sm:$0xff]  }
 0x233   :  { %6243 = vtanh.f32 %v3091_v7 }
 0x234   :  { %6245 = vtanh.f32 %v7164_v40  ;;  %v7189_v49 = vadd.f32 %v3124_v3, %v3116_v36  ;;  %v6230_v56 = vpop.eup %6229  ;;  %v7222_v3 = vld [vmem:[%s8384_s2 + $0x18] sm:$0xff]   ;;  %v7230_v36 = vld [vmem:[%s8384_s2 + $0x20] sm:$0xff]  }
 0x235   :  { %6247 = vtanh.f32 %v7167_v46  ;;  %v3101_v31 = vmul.f32 0.5, %v6230_v56  ;;  %v7238_v56 = vld [vmem:[%s8384_s2 + $0x28] sm:$0xff]  }
 0x236   :  { %6249 = vtanh.f32 %v7171_v29 }
 0x237   :  { %6251 = vtanh.f32 %v7174_v53  ;;  %v3109_v11 = vadd.f32 0.5, %v3101_v31 }
 0x238   :  { %6253 = vtanh.f32 %v7178_v14  ;;  %v6232_v12 = vpop.eup %6231 }
 0x239   :  { %6255 = vtanh.f32 %v7181_v48  ;;  %v3103_v22 = vmul.f32 0.5, %v6232_v12  ;;  %v7246_v12 = vld [vmem:[%s8384_s2 + $0x30] sm:$0xff]  }
 0x23a   :  { %6257 = vtanh.f32 %v7185_v62  ;;  %v6234_v42 = vpop.eup %6233  ;;  %8406 = vst [vmem:[#allocation10_spill] sm:$0xff] %v7246_v12 }
 0x23b   :  { %v6236_v10 = vpop.eup %6235  ;;  %6259 = vtanh.f32 %v7189_v49  ;;  %v3104_v19 = vmul.f32 0.5, %v6234_v42  ;;  %v3111_v44 = vadd.f32 0.5, %v3103_v22  ;;  %v7254_v42 = vld [vmem:[%s8384_s2 + $0x38] sm:$0xff]  }
 0x23c   :  { %v6238_v38 = vpop.eup %6237  ;;  %v3102_v30 = vmul.f32 0.5, %v6236_v10  ;;  %8407 = vst [vmem:[#allocation11_spill] sm:$0xff] %v7254_v42  ;;  %v926_v10 = vpop.f32.mrf.mxu0 }
 0x23d   :  { %v6240_v33 = vpop.eup %6239  ;;  %v3105_v55 = vmul.f32 0.5, %v6238_v38  ;;  %v3112_v16 = vadd.f32 0.5, %v3104_v19 }
 0x23e   :  { %v6242_v54 = vpop.eup %6241  ;;  %v3100_v23 = vmul.f32 0.5, %v6240_v33  ;;  %v3110_v59 = vadd.f32 0.5, %v3102_v30  ;;  %v928_v38 = vpop.f32.mrf.mxu0 }
 0x23f   :  { %v3106_v41 = vmul.f32 0.5, %v6242_v54  ;;  %v3113_v61 = vadd.f32 0.5, %v3105_v55 }
 0x240   :  { %v6244_v18 = vpop.eup %6243  ;;  %v3108_v15 = vadd.f32 0.5, %v3100_v23  ;;  %v930_v22 = vpop.f32.mrf.mxu0  ;;  %v6057_v23 = vld [vmem:[%s8383_s1 + $0xd0] sm:$0xff]  }
 0x241   :  { %v6246_v63 = vpop.eup %6245  ;;  %v3107_v17 = vmul.f32 0.5, %v6244_v18  ;;  %v3114_v28 = vadd.f32 0.5, %v3106_v41  ;;  %v6055_v41 = vld [vmem:[%s8383_s1 + $0xc0] sm:$0xff]  }
 0x242   :  { %v6248_v27 = vpop.eup %6247  ;;  %v3151_v32 = vmul.f32 %v6246_v63, %v3111_v44  ;;  %v932_v33 = vpop.f32.mrf.mxu0  ;;  %5585 = vmatmul.mubr.msk.bf16.gmra.mxu0 %vm520_vm1, %v6055_v41 }
 0x243   :  { %v6250_v52 = vpop.eup %6249  ;;  %v3115_v8 = vadd.f32 0.5, %v3107_v17  ;;  %v3153_v13 = vmul.f32 %v6248_v27, %v3113_v61  ;;  %1014 = vmatprep.mubr.bf16.mxu0 %v8389_v1  ;;  %v6056_v17 = vld [vmem:[%s8383_s1 + $0xc8] sm:$0xff]  }
 0x244   :  { %v6252_v2 = vpop.eup %6251  ;;  %v3154_v25 = vmul.f32 %v6250_v52, %v3114_v28  ;;  %v936_v19 = vpop.f32.mrf.mxu0  ;;  %v6058_v52 = vld [vmem:[%s8383_s1 + $0xd8] sm:$0xff]  }
 0x245   :  { %v6254_v57 = vpop.eup %6253  ;;  %v3155_v6 = vmul.f32 %v6252_v2, %v3115_v8  ;;  %v6059_v2 = vld [vmem:[%s8383_s1 + $0xe0] sm:$0xff]  }
 0x246   :  { %v6256_v60 = vpop.eup %6255  ;;  %v3152_v50 = vmul.f32 %v6254_v57, %v3112_v16  ;;  %v938_v55 = vpop.f32.mrf.mxu0  ;;  %v6060_v57 = vld [vmem:[%s8383_s1 + $0xe8] sm:$0xff]  }
 0x247   :  { %v6258_v58 = vpop.eup %6257  ;;  %v3207_v4 = vpack.c.bf16 %v3155_v6, %v3153_v13  ;;  %v3149_v9 = vmul.f32 %v6256_v60, %v3109_v11  ;;  %v5879_v41 = vpack.c.bf16 %v938_v55, %v936_v19 }
 0x248   :  { %v3150_v21 = vmul.f32 %v6258_v58, %v3110_v59  ;;  %v3206_v34 = vpack.c.bf16 %v3154_v25, %v3152_v50  ;;  %v6260_v26 = vpop.eup %6259  ;;  %v940_v54 = vpop.f32.mrf.mxu0  ;;  %v6061_v50 = vld [vmem:[%s8383_s1 + $0xf0] sm:$0xff]  }
 0x249   :  { %3220 = vmatprep.subr.bf16.mxu1 %v3207_v4  ;;  %v3205_v5 = vpack.c.bf16 %v3151_v32, %v3149_v9  ;;  %v3148_v7 = vmul.f32 %v6260_v26, %v3108_v15  ;;  %v3176_v45 = vunpack.c.l.bf16 %v5879_v41  ;;  %v3177_v39 = vunpack.c.h.bf16 %v5879_v41 }
 0x24a   :  { %3221 = vmatpush1.bf16.msra.mxu1 %v3206_v34  ;;  %v942_v31 = vpop.f32.mrf.mxu0  ;;  %5586 = vmatmul.mubr.msk.bf16.gmra.mxu0 %vm520_vm1, %v6056_v17 }
 0x24b   :  { %3222 = vmatprep.subr.bf16.mxu1 %v3205_v5  ;;  %v3204_v0 = vpack.c.bf16 %v3150_v21, %v3148_v7  ;;  %1024 = vmatprep.mubr.bf16.mxu0 %v8389_v1  ;;  %v5877_v21 = vpack.c.bf16 %v928_v38, %v926_v10  ;;  %v5878_v5 = vpack.c.bf16 %v932_v33, %v930_v22  ;;  %v8408_v22 = vmov 0  }
 0x24c   :  { %v946_v18 = vpop.f32.mrf.mxu0  ;;  %v5880_v38 = vpack.c.bf16 %v942_v31, %v940_v54 }
 0x24d   :  { %v3172_v17 = vunpack.c.l.bf16 %v5877_v21  ;;  %v3175_v51 = vunpack.c.h.bf16 %v5878_v5 }
 0x24e   :  { %3223 = vmatpush1.bf16.msra.mxu1 %v3204_v0  ;;  %v948_v30 = vpop.f32.mrf.mxu0  ;;  %v6062_v0 = vld [vmem:[%s8383_s1 + $0xf8] sm:$0xff]  }
 0x250   :  { %v7262_v63 = vpop.f32.mrf.mxu0 }
 0x251   :  { %5789 = vmatmul.mubr.msk.bf16.vlgmr.msra.gmra.mxu1 %vm2501_vm2, %v7198_v20 }
 0x252   :  { %3250 = vmatprep.mubr.bf16.mxu1 %v8389_v1  ;;  %v952_v44 = vpop.f32.mrf.mxu0  ;;  %5587 = vmatmul.mubr.msk.bf16.gmra.mxu0 %vm520_vm1, %v6057_v23 }
 0x253   :  { %1034 = vmatprep.mubr.bf16.mxu0 %v8389_v1 }
 0x254   :  { %v7266_v61 = vpop.f32.mrf.mxu0 }
 0x256   :  { %v7273_v27 = vpop.f32.mrf.mxu0 }
 0x258   :  { %v7278_v16 = vpop.f32.mrf.mxu0 }
 0x259   :  { %5790 = vmatmul.mubr.msk.bf16.gmra.mxu1 %vm2501_vm2, %v7206_v43 }
 0x25a   :  { %3260 = vmatprep.mubr.bf16.mxu1 %v8389_v1  ;;  %v7282_v28 = vpop.f32.mrf.mxu0  ;;  %5588 = vmatmul.mubr.msk.bf16.gmra.mxu0 %vm520_vm1, %v6058_v52 }
 0x25b   :  { %1044 = vmatprep.mubr.bf16.mxu0 %v8389_v1 }
 0x25c   :  { %v7287_v11 = vpop.f32.mrf.mxu0 }
 0x25e   :  { %v7291_v8 = vpop.f32.mrf.mxu0 }
 0x260   :  { %v7296_v59 = vpop.f32.mrf.mxu0 }
 0x261   :  { %5791 = vmatmul.mubr.msk.bf16.gmra.mxu1 %vm2501_vm2, %v7214_v24 }
 0x262   :  { %3270 = vmatprep.mubr.bf16.mxu1 %v8389_v1  ;;  %5589 = vmatmul.mubr.msk.bf16.gmra.mxu0 %vm520_vm1, %v6059_v2  ;;  %v7300_v25 = vpop.f32.mrf.mxu0  ;;  %v3173_v2 = vunpack.c.h.bf16 %v5877_v21  ;;  %v5882_v21 = vpack.c.bf16 %v952_v44, %v7262_v63 }
 0x263   :  { %1054 = vmatprep.mubr.bf16.mxu0 %v8389_v1 }
 0x264   :  { %v7305_v13 = vpop.f32.mrf.mxu0 }
 0x266   :  { %v7309_v60 = vpop.f32.mrf.mxu0 }
 0x268   :  { %v7314_v4 = vpop.f32.mrf.mxu0 }
 0x269   :  { %5792 = vmatmul.mubr.msk.bf16.gmra.mxu1 %vm2501_vm2, %v7222_v3 }
 0x26a   :  { %3280 = vmatprep.mubr.bf16.mxu1 %v8389_v1  ;;  %5590 = vmatmul.mubr.msk.bf16.gmra.mxu0 %vm520_vm1, %v6060_v57  ;;  %v7318_v26 = vpop.f32.mrf.mxu0  ;;  %v3174_v57 = vunpack.c.l.bf16 %v5878_v5 }
 0x26b   :  { %1064 = vmatprep.mubr.bf16.mxu0 %v8389_v1 }
 0x26c   :  { %v7323_v52 = vpop.f32.mrf.mxu0 }
 0x26e   :  { %v7327_v35 = vpop.f32.mrf.mxu0 }
 0x270   :  { %v7332_v5 = vpop.f32.mrf.mxu0 }
 0x271   :  { %5793 = vmatmul.mubr.msk.bf16.gmra.mxu1 %vm2501_vm2, %v7230_v36 }
 0x272   :  { %3290 = vmatprep.mubr.bf16.mxu1 %v8389_v1  ;;  %5591 = vmatmul.mubr.msk.bf16.gmra.mxu0 %vm520_vm1, %v6061_v50 }
 0x273   :  { %1074 = vmatprep.mubr.bf16.mxu0 %v8389_v1 }
 0x279   :  { %5794 = vmatmul.mubr.msk.bf16.gmra.mxu1 %vm2501_vm2, %v7238_v56 }
 0x27a   :  { %3300 = vmatprep.mubr.bf16.mxu1 %v8389_v1  ;;  %5592 = vmatmul.mubr.msk.bf16.gmra.mxu0 %vm520_vm1, %v6062_v0  ;;  %v3178_v0 = vunpack.c.l.bf16 %v5880_v38 }
 0x27b   :  { %1084 = vmatprep.mubr.bf16.mxu0 %v8408_v22 }
 0x281   :  { %5795 = vmatmul.mubr.msk.bf16.gmra.mxu1 %vm2501_vm2, %v7246_v12 }
 0x282   :  { %3310 = vmatprep.mubr.bf16.mxu1 %v8389_v1 }
 0x289   :  { %5796 = vmatmul.mubr.msk.bf16.gmra.mxu1 %vm2501_vm2, %v7254_v42 }
 0x28a   :  { %3581 = vmatprep.mubr.bf16.mxu1 %v8389_v1  ;;  %v5881_v1 = vpack.c.bf16 %v948_v30, %v946_v18  ;;  %v3179_v18 = vunpack.c.h.bf16 %v5880_v38  ;;  %v5883_v30 = vpack.c.bf16 %v7273_v27, %v7266_v61 }
 0x28c   :  { %v3185_v27 = vunpack.c.h.bf16 %v5883_v30  ;;  %v3184_v38 = vunpack.c.l.bf16 %v5883_v30 }
 0x311   :  { %v3242_v6 = vpop.f32.mrf.mxu1 }
 0x312   :  { %v3321_v10 = vadd.f32 %v3242_v6, %v3172_v17  ;;  %v3180_v6 = vunpack.c.l.bf16 %v5881_v1 }
 0x313   :  { %v3244_v32 = vpop.f32.mrf.mxu1 }
 0x314   :  { %v3322_v33 = vadd.f32 %v3244_v32, %v3173_v2  ;;  %v3353_v42 = vmul.f32 0.5, %v3321_v10  ;;  %v992_v10 = vpop.f32.mrf.mxu0 }
 0x315   :  { %v3246_v15 = vpop.f32.mrf.mxu1 }
 0x316   :  { %v3323_v19 = vadd.f32 %v3246_v15, %v3174_v57  ;;  %v3354_v54 = vmul.f32 0.5, %v3322_v33  ;;  %6261 = vtanh.f32 %v3353_v42 }
 0x317   :  { %v3248_v58 = vpop.f32.mrf.mxu1 }
 0x318   :  { %v3324_v55 = vadd.f32 %v3248_v58, %v3175_v51  ;;  %v3355_v17 = vmul.f32 0.5, %v3323_v19  ;;  %v5884_v51 = vpack.c.bf16 %v7282_v28, %v7278_v16  ;;  %v3181_v58 = vunpack.c.h.bf16 %v5881_v1 }
 0x319   :  { %v3252_v9 = vpop.f32.mrf.mxu1  ;;  %6263 = vtanh.f32 %v3354_v54 }
 0x31a   :  { %v3325_v12 = vadd.f32 %v3252_v9, %v3176_v45  ;;  %v3356_v63 = vmul.f32 0.5, %v3324_v55  ;;  %v3183_v45 = vunpack.c.h.bf16 %v5882_v21  ;;  %6265 = vtanh.f32 %v3355_v17 }
 0x31b   :  { %v3254_v34 = vpop.f32.mrf.mxu1  ;;  %v3186_v33 = vunpack.c.l.bf16 %v5884_v51  ;;  %v3187_v55 = vunpack.c.h.bf16 %v5884_v51 }
 0x31c   :  { %v3326_v31 = vadd.f32 %v3254_v34, %v3177_v39  ;;  %v3357_v41 = vmul.f32 0.5, %v3325_v12  ;;  %v3182_v34 = vunpack.c.l.bf16 %v5882_v21  ;;  %6267 = vtanh.f32 %v3356_v63 }
 0x31d   :  { %v3256_v7 = vpop.f32.mrf.mxu1  ;;  %v5885_v63 = vpack.c.bf16 %v7291_v8, %v7287_v11 }
 0x31e   :  { %v3327_v15 = vadd.f32 %v3256_v7, %v3178_v0  ;;  %v3358_v2 = vmul.f32 0.5, %v3326_v31  ;;  %6269 = vtanh.f32 %v3357_v41  ;;  %v996_v0 = vpop.f32.mrf.mxu0 }
 0x31f   :  { %v3258_v23 = vpop.f32.mrf.mxu1  ;;  %v3189_v8 = vunpack.c.h.bf16 %v5885_v63 }
 0x320   :  { %v3328_v44 = vadd.f32 %v3258_v23, %v3179_v18  ;;  %v3359_v7 = vmul.f32 0.5, %v3327_v15  ;;  %6271 = vtanh.f32 %v3358_v2  ;;  %v998_v15 = vpop.f32.mrf.mxu0  ;;  %v7348_v2 = vpack.c.bf16 %v7327_v35, %v7323_v52 }
 0x321   :  { %v3262_v50 = vpop.f32.mrf.mxu1 }
 0x322   :  { %v3329_v39 = vadd.f32 %v3262_v50, %v3180_v6  ;;  %v3360_v16 = vmul.f32 0.5, %v3328_v44  ;;  %6273 = vtanh.f32 %v3359_v7  ;;  %v7351_v7 = vpack.c.bf16 %v992_v10, %v7332_v5 }
 0x323   :  { %v3264_v47 = vpop.f32.mrf.mxu1  ;;  %v3197_v5 = vunpack.c.h.bf16 %v7348_v2 }
 0x324   :  { %v3330_v28 = vadd.f32 %v3264_v47, %v3181_v58  ;;  %v3385_v42 = vmul.f32 0.5, %v3329_v39  ;;  %6275 = vtanh.f32 %v3360_v16  ;;  %v5887_v58 = vpack.c.bf16 %v7309_v60, %v7305_v13 }
 0x325   :  { %v3266_v37 = vpop.f32.mrf.mxu1 }
 0x326   :  { %v3331_v12 = vadd.f32 %v3266_v37, %v3182_v34  ;;  %v3386_v31 = vmul.f32 0.5, %v3330_v28  ;;  %6277 = vtanh.f32 %v3385_v42  ;;  %v5886_v37 = vpack.c.bf16 %v7300_v25, %v7296_v59  ;;  %v1000_v59 = vpop.f32.mrf.mxu0 }
 0x327   :  { %v3268_v32 = vpop.f32.mrf.mxu1  ;;  %v5888_v34 = vpack.c.bf16 %v7318_v26, %v7314_v4  ;;  %v3192_v60 = vunpack.c.l.bf16 %v5887_v58  ;;  %v3196_v42 = vunpack.c.l.bf16 %v7348_v2 }
 0x328   :  { %v3332_v61 = vadd.f32 %v3268_v32, %v3183_v45  ;;  %v3387_v47 = vmul.f32 0.5, %v3331_v12  ;;  %v3191_v41 = vunpack.c.h.bf16 %v5886_v37  ;;  %v3190_v28 = vunpack.c.l.bf16 %v5886_v37  ;;  %v1002_v26 = vpop.f32.mrf.mxu0 }
 0x329   :  { %v3272_v9 = vpop.f32.mrf.mxu1  ;;  %v3194_v52 = vunpack.c.l.bf16 %v5888_v34 }
 0x32a   :  { %v3388_v50 = vmul.f32 0.5, %v3332_v61  ;;  %v3333_v6 = vadd.f32 %v3272_v9, %v3184_v38  ;;  %v6262_v9 = vpop.eup %6261 }
 0x32b   :  { %v3274_v57 = vpop.f32.mrf.mxu1  ;;  %v6264_v25 = vpop.eup %6263 }
 0x32c   :  { %v3334_v1 = vadd.f32 %v3274_v57, %v3185_v27  ;;  %6279 = vtanh.f32 %v3388_v50  ;;  %v3389_v51 = vmul.f32 0.5, %v3333_v6  ;;  %v6266_v11 = vpop.eup %6265  ;;  %v3193_v57 = vunpack.c.h.bf16 %v5887_v58 }
 0x32d   :  { %v3276_v23 = vpop.f32.mrf.mxu1  ;;  %v6268_v27 = vpop.eup %6267  ;;  %v7357_v6 = vpack.c.bf16 %v1002_v26, %v1000_v59 }
 0x32e   :  { %v3335_v19 = vadd.f32 %v3276_v23, %v3186_v33  ;;  %v3390_v54 = vmul.f32 0.5, %v3334_v1  ;;  %v6270_v38 = vpop.eup %6269  ;;  %v3188_v33 = vunpack.c.l.bf16 %v5885_v63  ;;  %v3195_v23 = vunpack.c.h.bf16 %v5888_v34 }
 0x32f   :  { %v3278_v21 = vpop.f32.mrf.mxu1  ;;  %v6272_v1 = vpop.eup %6271  ;;  %v3372_v59 = vmul.f32 0.5, %v6268_v27  ;;  %v3202_v34 = vunpack.c.l.bf16 %v7357_v6 }
 0x330   :  { %v3336_v18 = vadd.f32 %v3278_v21, %v3187_v55  ;;  %v3391_v32 = vmul.f32 0.5, %v3335_v19  ;;  %6281 = vtanh.f32 %v3390_v54  ;;  %v6274_v12 = vpop.eup %6273  ;;  %v7354_v55 = vpack.c.bf16 %v998_v15, %v996_v0 }
 0x331   :  { %v7336_v30 = vpop.f32.mrf.mxu1  ;;  %6283 = vtanh.f32 %v3386_v31  ;;  %v6276_v10 = vpop.eup %6275  ;;  %v3198_v54 = vunpack.c.l.bf16 %v7351_v7  ;;  %v3371_v0 = vmul.f32 0.5, %v6266_v11  ;;  %v3375_v27 = vmul.f32 0.5, %v6274_v12 }
 0x332   :  { %v3392_v44 = vmul.f32 0.5, %v3336_v18  ;;  %6285 = vtanh.f32 %v3387_v47  ;;  %v3369_v18 = vmul.f32 0.5, %v6262_v9 }
 0x333   :  { %v3284_v17 = vpop.f32.mrf.mxu1  ;;  %6287 = vtanh.f32 %v3391_v32  ;;  %v6278_v31 = vpop.eup %6277  ;;  %v3199_v32 = vunpack.c.h.bf16 %v7351_v7  ;;  %v7368_v7 = vadd.f32 0.5, %v3371_v0  ;;  %v3383_v0 = vadd.f32 0.5, %v3375_v27 }
 0x334   :  { %6289 = vtanh.f32 %v3389_v51  ;;  %v3338_v16 = vadd.f32 %v3284_v17, %v3189_v8  ;;  %v3370_v51 = vmul.f32 0.5, %v6264_v25  ;;  %v3374_v25 = vmul.f32 0.5, %v6272_v1 }
 0x335   :  { %v3286_v45 = vpop.f32.mrf.mxu1  ;;  %6291 = vtanh.f32 %v3392_v44  ;;  %v3337_v44 = vadd.f32 %v7336_v30, %v3188_v33  ;;  %v3380_v1 = vadd.f32 0.5, %v3372_v59 }
 0x336   :  { %v3339_v47 = vadd.f32 %v3286_v45, %v3190_v28  ;;  %v3373_v45 = vmul.f32 0.5, %v6270_v38  ;;  %v3376_v38 = vmul.f32 0.5, %v6276_v10 }
 0x337   :  { %v3288_v39 = vpop.f32.mrf.mxu1 }
 0x338   :  { %v3340_v13 = vadd.f32 %v3288_v39, %v3191_v41  ;;  %v3200_v41 = vunpack.c.l.bf16 %v7354_v55  ;;  %v3201_v39 = vunpack.c.h.bf16 %v7354_v55  ;;  %v3384_v12 = vadd.f32 0.5, %v3376_v38 }
 0x339   :  { %v3292_v61 = vpop.f32.mrf.mxu1  ;;  %v6280_v17 = vpop.eup %6279 }
 0x33a   :  { %6293 = vtanh.f32 %v3340_v13  ;;  %v3341_v50 = vadd.f32 %v3292_v61, %v3192_v60  ;;  %v3404_v11 = vmul.f32 0.5, %v6280_v17  ;;  %v3203_v60 = vunpack.c.h.bf16 %v7357_v6 }
 0x33b   :  { %v3294_v4 = vpop.f32.mrf.mxu1  ;;  %v7366_v61 = vadd.f32 0.5, %v3369_v18 }
 0x33c   :  { %v3342_v35 = vadd.f32 %v3294_v4, %v3193_v57  ;;  %v3378_v57 = vadd.f32 0.5, %v3370_v51  ;;  %v3412_v55 = vadd.f32 0.5, %v3404_v11 }
 0x33d   :  { %v3296_v19 = vpop.f32.mrf.mxu1  ;;  %v6282_v63 = vpop.eup %6281 }
 0x33e   :  { %6295 = vtanh.f32 %v3342_v35  ;;  %v3343_v21 = vadd.f32 %v3296_v19, %v3194_v52  ;;  %v6284_v9 = vpop.eup %6283  ;;  %v3406_v33 = vmul.f32 0.5, %v6282_v63  ;;  %v3381_v35 = vadd.f32 0.5, %v3373_v45 }
 0x33f   :  { %6297 = vtanh.f32 %v3338_v16  ;;  %v3298_v37 = vpop.f32.mrf.mxu1  ;;  %v6286_v8 = vpop.eup %6285  ;;  %v3401_v52 = vmul.f32 0.5, %v6278_v31 }
 0x340   :  { %6299 = vtanh.f32 %v3343_v21  ;;  %v3344_v15 = vadd.f32 %v3298_v37, %v3195_v23  ;;  %v6288_v30 = vpop.eup %6287  ;;  %v3402_v23 = vmul.f32 0.5, %v6284_v9  ;;  %v3403_v19 = vmul.f32 0.5, %v6286_v8 }
 0x341   :  { %6301 = vtanh.f32 %v3341_v50  ;;  %v3302_v58 = vpop.f32.mrf.mxu1  ;;  %v6290_v16 = vpop.eup %6289  ;;  %v3382_v50 = vadd.f32 0.5, %v3374_v25  ;;  %v3407_v21 = vmul.f32 0.5, %v6288_v30  ;;  %v3414_v37 = vadd.f32 0.5, %v3406_v33 }
 0x342   :  { %6303 = vtanh.f32 %v3344_v15  ;;  %v6292_v26 = vpop.eup %6291  ;;  %v3410_v59 = vadd.f32 0.5, %v3402_v23  ;;  %v3345_v31 = vadd.f32 %v3302_v58, %v3196_v42  ;;  %v3411_v8 = vadd.f32 0.5, %v3403_v19 }
 0x343   :  { %6305 = vtanh.f32 %v3339_v47  ;;  %v3304_v13 = vpop.f32.mrf.mxu1  ;;  %v3405_v47 = vmul.f32 0.5, %v6290_v16  ;;  %v3408_v10 = vmul.f32 0.5, %v6292_v26  ;;  %v3460_v25 = vmul.f32 %v3412_v55, %v7164_v40 }
 0x344   :  { %6307 = vtanh.f32 %v3337_v44  ;;  %v3346_v28 = vadd.f32 %v3304_v13, %v3197_v5  ;;  %v3409_v44 = vadd.f32 0.5, %v3401_v52  ;;  %v3415_v11 = vadd.f32 0.5, %v3407_v21 }
 0x345   :  { %v3306_v4 = vpop.f32.mrf.mxu1  ;;  %v3413_v30 = vadd.f32 0.5, %v3405_v47  ;;  %v3462_v33 = vmul.f32 %v3414_v37, %v7167_v46  ;;  %v3425_v52 = vmul.f32 0.5, %v3345_v31  ;;  %v3458_v6 = vmul.f32 %v3410_v59, %v7181_v48 }
 0x346   :  { %v3347_v17 = vadd.f32 %v3306_v4, %v3198_v54  ;;  %v3426_v15 = vmul.f32 0.5, %v3346_v28  ;;  %v3416_v28 = vadd.f32 0.5, %v3408_v10 }
 0x347   :  { %v3308_v18 = vpop.f32.mrf.mxu1  ;;  %v6294_v63 = vpop.eup %6293 }
 0x348   :  { %v3348_v51 = vadd.f32 %v3308_v18, %v3199_v32  ;;  %v3427_v16 = vmul.f32 0.5, %v3347_v17  ;;  %v3468_v4 = vmul.f32 %v6294_v63, %v3380_v1  ;;  %6309 = vtanh.f32 %v3426_v15 }
 0x349   :  { %v3312_v5 = vpop.f32.mrf.mxu1 }
 0x34a   :  { %v3428_v9 = vmul.f32 0.5, %v3348_v51  ;;  %v3349_v13 = vadd.f32 %v3312_v5, %v3200_v41  ;;  %v3463_v41 = vmul.f32 %v3415_v11, %v7171_v29  ;;  %v3464_v29 = vmul.f32 %v3416_v28, %v7174_v53 }
 0x34b   :  { %v6296_v45 = vpop.eup %6295  ;;  %v3314_v54 = vpop.f32.mrf.mxu1 }
 0x34c   :  { %v6298_v32 = vpop.eup %6297  ;;  %v3350_v27 = vadd.f32 %v3314_v54, %v3201_v39  ;;  %v3429_v2 = vmul.f32 0.5, %v3349_v13  ;;  %v3470_v26 = vmul.f32 %v6296_v45, %v3382_v50  ;;  %6311 = vtanh.f32 %v3428_v9 }
 0x34d   :  { %v6300_v38 = vpop.eup %6299  ;;  %v3316_v42 = vpop.f32.mrf.mxu1  ;;  %v3466_v21 = vmul.f32 %v6298_v32, %v3378_v57  ;;  %v7379_v50 = vadd.f32 %v3468_v4, %v3460_v25 }
 0x34e   :  { %v6302_v58 = vpop.eup %6301  ;;  %v3430_v40 = vmul.f32 0.5, %v3350_v27  ;;  %v3471_v19 = vmul.f32 %v6300_v38, %v3383_v0  ;;  %6313 = vtanh.f32 %v3429_v2  ;;  %v3351_v46 = vadd.f32 %v3316_v42, %v3202_v34 }
 0x34f   :  { %v6304_v23 = vpop.eup %6303  ;;  %v3318_v39 = vpop.f32.mrf.mxu1  ;;  %6315 = vtanh.f32 %v3427_v16  ;;  %v3469_v47 = vmul.f32 %v6302_v58, %v3381_v35  ;;  %v7382_v51 = vadd.f32 %v3470_v26, %v3462_v33  ;;  %v3461_v0 = vmul.f32 %v3413_v30, %v7178_v14 }
 0x350   :  { %v6306_v55 = vpop.eup %6305  ;;  %v3472_v1 = vmul.f32 %v6304_v23, %v3384_v12  ;;  %v3352_v18 = vadd.f32 %v3318_v39, %v3203_v60  ;;  %6317 = vtanh.f32 %v3430_v40  ;;  %v3431_v37 = vmul.f32 0.5, %v3351_v46 }
 0x351   :  { %v6308_v17 = vpop.eup %6307  ;;  %6319 = vtanh.f32 %v3425_v52  ;;  %v3467_v57 = vmul.f32 %v6306_v55, %v7368_v7  ;;  %v7386_v12 = vadd.f32 %v3471_v19, %v3463_v41  ;;  %v3459_v35 = vmul.f32 %v3411_v8, %v7185_v62 }
 0x352   :  { %v3432_v34 = vmul.f32 0.5, %v3352_v18  ;;  %6321 = vtanh.f32 %v3431_v37  ;;  %v7389_v60 = vadd.f32 %v3472_v1, %v3464_v29  ;;  %v3465_v53 = vmul.f32 %v6308_v17, %v7366_v61 }
 0x353   :  { %v7393_v10 = vadd.f32 %v3469_v47, %v3461_v0  ;;  %v7396_v15 = vadd.f32 %v3466_v21, %v3458_v6  ;;  %v3457_v14 = vmul.f32 %v3409_v44, %v7189_v49  ;;  %v7400_v7 = vadd.f32 %v3467_v57, %v3459_v35 }
 0x354   :  { %6323 = vtanh.f32 %v3432_v34 }
 0x355   :  { %6325 = vtanh.f32 %v7379_v50  ;;  %v7404_v48 = vadd.f32 %v3465_v53, %v3457_v14  ;;  %v6310_v62 = vpop.eup %6309 }
 0x356   :  { %6327 = vtanh.f32 %v7382_v51  ;;  %v3442_v8 = vmul.f32 0.5, %v6310_v62 }
 0x357   :  { %6329 = vtanh.f32 %v7386_v12 }
 0x358   :  { %6331 = vtanh.f32 %v7389_v60  ;;  %v3450_v2 = vadd.f32 0.5, %v3442_v8  ;;  %v6066_v8 = vld [vmem:[%s8383_s1 + $0x118] sm:$0xff]  }
 0x359   :  { %6333 = vtanh.f32 %v7393_v10  ;;  %v6312_v61 = vpop.eup %6311 }
 0x35a   :  { %6335 = vtanh.f32 %v7396_v15  ;;  %v3444_v44 = vmul.f32 0.5, %v6312_v61  ;;  %v6063_v61 = vld [vmem:[%s8383_s1 + $0x100] sm:$0xff]  }
 0x35b   :  { %6337 = vtanh.f32 %v7400_v7  ;;  %v6314_v5 = vpop.eup %6313  ;;  %5593 = vmatmul.mubr.msk.bf16.gmra.mxu0 %vm520_vm1, %v6063_v61 }
 0x35c   :  { %v6316_v63 = vpop.eup %6315  ;;  %6339 = vtanh.f32 %v7404_v48  ;;  %v3445_v31 = vmul.f32 0.5, %v6314_v5  ;;  %v3452_v32 = vadd.f32 0.5, %v3444_v44  ;;  %1094 = vmatprep.mubr.bf16.mxu0 %v8408_v22  ;;  %v6064_v44 = vld [vmem:[%s8383_s1 + $0x108] sm:$0xff]  }
 0x35d   :  { %v6318_v49 = vpop.eup %6317  ;;  %v3443_v11 = vmul.f32 0.5, %v6316_v63 }
 0x35e   :  { %v6320_v59 = vpop.eup %6319  ;;  %v3446_v9 = vmul.f32 0.5, %v6318_v49  ;;  %v3453_v38 = vadd.f32 0.5, %v3445_v31  ;;  %v6065_v31 = vld [vmem:[%s8383_s1 + $0x110] sm:$0xff]  }
 0x35f   :  { %v6322_v45 = vpop.eup %6321  ;;  %v3441_v27 = vmul.f32 0.5, %v6320_v59  ;;  %v3451_v26 = vadd.f32 0.5, %v3443_v11 }
 0x360   :  { %v3447_v13 = vmul.f32 0.5, %v6322_v45  ;;  %v3454_v30 = vadd.f32 0.5, %v3446_v9 }
 0x361   :  { %v6324_v25 = vpop.eup %6323  ;;  %v3449_v39 = vadd.f32 0.5, %v3441_v27 }
 0x362   :  { %v6326_v54 = vpop.eup %6325  ;;  %v3448_v33 = vmul.f32 0.5, %v6324_v25  ;;  %v3455_v28 = vadd.f32 0.5, %v3447_v13  ;;  %v6067_v13 = vld [vmem:[%s8383_s1 + $0x120] sm:$0xff]  }
 0x363   :  { %v6328_v16 = vpop.eup %6327  ;;  %v3492_v19 = vmul.f32 %v6326_v54, %v3452_v32  ;;  %5594 = vmatmul.mubr.msk.bf16.gmra.mxu0 %vm520_vm1, %v6064_v44 }
 0x364   :  { %v6330_v4 = vpop.eup %6329  ;;  %v3456_v42 = vadd.f32 0.5, %v3448_v33  ;;  %v3494_v23 = vmul.f32 %v6328_v16, %v3454_v30  ;;  %1104 = vmatprep.mubr.bf16.mxu0 %v8408_v22  ;;  %v6068_v30 = vld [vmem:[%s8383_s1 + $0x128] sm:$0xff]  }
 0x365   :  { %v6332_v58 = vpop.eup %6331  ;;  %v3495_v52 = vmul.f32 %v6330_v4, %v3455_v28  ;;  %v6069_v4 = vld [vmem:[%s8383_s1 + $0x130] sm:$0xff]  }
 0x366   :  { %v6334_v40 = vpop.eup %6333  ;;  %v3496_v41 = vmul.f32 %v6332_v58, %v3456_v42 }
 0x367   :  { %v6336_v46 = vpop.eup %6335  ;;  %v3493_v55 = vmul.f32 %v6334_v40, %v3453_v38 }
 0x368   :  { %v6338_v21 = vpop.eup %6337  ;;  %v3548_v1 = vpack.c.bf16 %v3496_v41, %v3494_v23  ;;  %v3490_v18 = vmul.f32 %v6336_v46, %v3450_v2 }
 0x369   :  { %v3491_v47 = vmul.f32 %v6338_v21, %v3451_v26  ;;  %v3547_v37 = vpack.c.bf16 %v3495_v52, %v3493_v55  ;;  %v6340_v17 = vpop.eup %6339 }
 0x36a   :  { %3561 = vmatprep.subr.bf16.mxu1 %v3548_v1  ;;  %v3546_v29 = vpack.c.bf16 %v3492_v19, %v3490_v18  ;;  %v3489_v34 = vmul.f32 %v6340_v17, %v3449_v39  ;;  %v6070_v19 = vld [vmem:[%s8383_s1 + $0x138] sm:$0xff]  }
 0x36b   :  { %3562 = vmatpush1.bf16.msra.mxu1 %v3547_v37  ;;  %5595 = vmatmul.mubr.msk.bf16.gmra.mxu0 %vm520_vm1, %v6065_v31 }
 0x36c   :  { %3563 = vmatprep.subr.bf16.mxu1 %v3546_v29  ;;  %v3545_v0 = vpack.c.bf16 %v3491_v47, %v3489_v34  ;;  %1114 = vmatprep.mubr.bf16.mxu0 %v8408_v22 }
 0x36f   :  { %3564 = vmatpush1.bf16.msra.mxu1 %v3545_v0 }
 0x372   :  { %5797 = vmatmul.mubr.msk.bf16.vlgmr.msra.gmra.mxu1 %vm2501_vm2, %v7198_v20  ;;  %v8409_v20 = vld [vmem:[#allocation10_spill] sm:$0xff] }
 0x373   :  { %3591 = vmatprep.mubr.bf16.mxu1 %v8408_v22  ;;  %5596 = vmatmul.mubr.msk.bf16.gmra.mxu0 %vm520_vm1, %v6066_v8 }
 0x374   :  { %1124 = vmatprep.mubr.bf16.mxu0 %v8408_v22 }
 0x37a   :  { %5798 = vmatmul.mubr.msk.bf16.gmra.mxu1 %vm2501_vm2, %v7206_v43  ;;  %v8410_v43 = vld [vmem:[#allocation11_spill] sm:$0xff] }
 0x37b   :  { %3601 = vmatprep.mubr.bf16.mxu1 %v8408_v22  ;;  %5597 = vmatmul.mubr.msk.bf16.gmra.mxu0 %vm520_vm1, %v6067_v13 }
 0x37c   :  { %1134 = vmatprep.mubr.bf16.mxu0 %v8408_v22 }
 0x382   :  { %5799 = vmatmul.mubr.msk.bf16.gmra.mxu1 %vm2501_vm2, %v7214_v24  ;;  %v1006_v24 = vpop.f32.mrf.mxu0 }
 0x383   :  { %3611 = vmatprep.mubr.bf16.mxu1 %v8408_v22  ;;  %5598 = vmatmul.mubr.msk.bf16.gmra.mxu0 %vm520_vm1, %v6068_v30 }
 0x384   :  { %1144 = vmatprep.mubr.bf16.mxu0 %v8408_v22 }
 0x38a   :  { %5800 = vmatmul.mubr.msk.bf16.gmra.mxu1 %vm2501_vm2, %v7222_v3  ;;  %v1008_v3 = vpop.f32.mrf.mxu0 }
 0x38b   :  { %3621 = vmatprep.mubr.bf16.mxu1 %v8408_v22  ;;  %5599 = vmatmul.mubr.msk.bf16.gmra.mxu0 %vm520_vm1, %v6069_v4  ;;  %v5893_v26 = vpack.c.bf16 %v1008_v3, %v1006_v24 }
 0x38c   :  { %1154 = vmatprep.mubr.bf16.mxu0 %v8408_v22 }
 0x38d   :  { %v3513_v39 = vunpack.c.l.bf16 %v5893_v26  ;;  %v3514_v1 = vunpack.c.h.bf16 %v5893_v26 }
 0x392   :  { %5801 = vmatmul.mubr.msk.bf16.gmra.mxu1 %vm2501_vm2, %v7230_v36  ;;  %v1010_v36 = vpop.f32.mrf.mxu0 }
 0x393   :  { %3631 = vmatprep.mubr.bf16.mxu1 %v8408_v22  ;;  %5600 = vmatmul.mubr.msk.bf16.gmra.mxu0 %vm520_vm1, %v6070_v19 }
 0x394   :  { %v1012_v57 = vpop.f32.mrf.mxu0  ;;  %1164 = vmatprep.mubr.bf16.mxu0 %v8408_v22 }
 0x395   :  { %v5894_v23 = vpack.c.bf16 %v1012_v57, %v1010_v36 }
 0x396   :  { %v1016_v6 = vpop.f32.mrf.mxu0 }
 0x397   :  { %v3515_v18 = vunpack.c.l.bf16 %v5894_v23 }
 0x398   :  { %v1018_v35 = vpop.f32.mrf.mxu0 }
 0x399   :  { %v5895_v46 = vpack.c.bf16 %v1018_v35, %v1016_v6 }
 0x39a   :  { %5802 = vmatmul.mubr.msk.bf16.gmra.mxu1 %vm2501_vm2, %v7238_v56  ;;  %v1020_v53 = vpop.f32.mrf.mxu0 }
 0x39b   :  { %3641 = vmatprep.mubr.bf16.mxu1 %v8408_v22  ;;  %v3517_v34 = vunpack.c.l.bf16 %v5895_v46  ;;  %v3518_v57 = vunpack.c.h.bf16 %v5895_v46 }
 0x39c   :  { %v1022_v56 = vpop.f32.mrf.mxu0 }
 0x39d   :  { %v5896_v17 = vpack.c.bf16 %v1022_v56, %v1020_v53 }
 0x39e   :  { %v1026_v14 = vpop.f32.mrf.mxu0 }
 0x39f   :  { %v3519_v31 = vunpack.c.l.bf16 %v5896_v17 }
 0x3a0   :  { %v1028_v62 = vpop.f32.mrf.mxu0 }
 0x3a1   :  { %v5897_v29 = vpack.c.bf16 %v1028_v62, %v1026_v14  ;;  %v3520_v14 = vunpack.c.h.bf16 %v5896_v17 }
 0x3a2   :  { %5803 = vmatmul.mubr.msk.bf16.gmra.mxu1 %vm2501_vm2, %v8409_v20  ;;  %v7437_v5 = vpop.f32.mrf.mxu0  ;;  %v3516_v20 = vunpack.c.h.bf16 %v5894_v23 }
 0x3a3   :  { %3651 = vmatprep.mubr.bf16.mxu1 %v8408_v22  ;;  %v3521_v8 = vunpack.c.l.bf16 %v5897_v29  ;;  %v3522_v4 = vunpack.c.h.bf16 %v5897_v29 }
 0x3a4   :  { %v1032_v63 = vpop.f32.mrf.mxu0 }
 0x3a5   :  { %v5898_v6 = vpack.c.bf16 %v1032_v63, %v7437_v5 }
 0x3a6   :  { %v7441_v49 = vpop.f32.mrf.mxu0 }
 0x3a7   :  { %v3523_v23 = vunpack.c.l.bf16 %v5898_v6 }
 0x3a8   :  { %v7448_v59 = vpop.f32.mrf.mxu0 }
 0x3a9   :  { %v5899_v62 = vpack.c.bf16 %v7448_v59, %v7441_v49 }
 0x3aa   :  { %5804 = vmatmul.mubr.msk.bf16.gmra.mxu1 %vm2501_vm2, %v8410_v43  ;;  %v7453_v9 = vpop.f32.mrf.mxu0 }
 0x3ab   :  { %3922 = vmatprep.mubr.bf16.mxu1 %v8408_v22  ;;  %v3526_v59 = vunpack.c.h.bf16 %v5899_v62 }
 0x3ac   :  { %v7457_v45 = vpop.f32.mrf.mxu0 }
 0x3ae   :  { %v7462_v25 = vpop.f32.mrf.mxu0 }
 0x3b0   :  { %v7466_v11 = vpop.f32.mrf.mxu0 }
 0x3b2   :  { %v7471_v54 = vpop.f32.mrf.mxu0 }
 0x3b4   :  { %v7475_v32 = vpop.f32.mrf.mxu0 }
 0x3b6   :  { %v7480_v33 = vpop.f32.mrf.mxu0 }
 0x3b8   :  { %v7484_v38 = vpop.f32.mrf.mxu0 }
 0x3ba   :  { %v7489_v42 = vpop.f32.mrf.mxu0 }
 0x3bc   :  { %v7493_v40 = vpop.f32.mrf.mxu0 }
 0x3be   :  { %v7498_v21 = vpop.f32.mrf.mxu0 }
 0x3c0   :  { %v7502_v24 = vpop.f32.mrf.mxu0 }
 0x3c2   :  { %v7507_v30 = vpop.f32.mrf.mxu0 }
 0x432   :  { %v3583_v16 = vpop.f32.mrf.mxu1 }
 0x433   :  { %v3662_v37 = vadd.f32 %v3583_v16, %v3513_v39  ;;  %v1072_v39 = vpop.f32.mrf.mxu0 }
 0x434   :  { %v3585_v27 = vpop.f32.mrf.mxu1 }
 0x435   :  { %v3663_v0 = vadd.f32 %v3585_v27, %v3514_v1  ;;  %v3694_v61 = vmul.f32 0.5, %v3662_v37  ;;  %v3525_v1 = vunpack.c.l.bf16 %v5899_v62 }
 0x436   :  { %v3587_v28 = vpop.f32.mrf.mxu1 }
 0x437   :  { %v3664_v3 = vadd.f32 %v3587_v28, %v3515_v18  ;;  %v3695_v53 = vmul.f32 0.5, %v3663_v0  ;;  %v5900_v28 = vpack.c.bf16 %v7457_v45, %v7453_v9  ;;  %6341 = vtanh.f32 %v3694_v61 }
 0x438   :  { %v3589_v2 = vpop.f32.mrf.mxu1 }
 0x439   :  { %v3665_v36 = vadd.f32 %v3589_v2, %v3516_v20  ;;  %v3696_v16 = vmul.f32 0.5, %v3664_v3  ;;  %v3524_v2 = vunpack.c.h.bf16 %v5898_v6  ;;  %6343 = vtanh.f32 %v3695_v53  ;;  %v1076_v3 = vpop.f32.mrf.mxu0 }
 0x43a   :  { %v3593_v58 = vpop.f32.mrf.mxu1  ;;  %v3527_v18 = vunpack.c.l.bf16 %v5900_v28  ;;  %v3528_v0 = vunpack.c.h.bf16 %v5900_v28 }
 0x43b   :  { %v3666_v44 = vadd.f32 %v3593_v58, %v3517_v34  ;;  %v3697_v5 = vmul.f32 0.5, %v3665_v36  ;;  %6345 = vtanh.f32 %v3696_v16  ;;  %v1078_v53 = vpop.f32.mrf.mxu0 }
 0x43c   :  { %v3595_v52 = vpop.f32.mrf.mxu1 }
 0x43d   :  { %v3667_v56 = vadd.f32 %v3595_v52, %v3518_v57  ;;  %v3698_v26 = vmul.f32 0.5, %v3666_v44  ;;  %6347 = vtanh.f32 %v3697_v5 }
 0x43e   :  { %v3597_v41 = vpop.f32.mrf.mxu1 }
 0x43f   :  { %v3668_v27 = vadd.f32 %v3597_v41, %v3519_v31  ;;  %v3699_v19 = vmul.f32 0.5, %v3667_v56  ;;  %6349 = vtanh.f32 %v3698_v26 }
 0x440   :  { %v3599_v55 = vpop.f32.mrf.mxu1 }
 0x441   :  { %v3669_v63 = vadd.f32 %v3599_v55, %v3520_v14  ;;  %v3700_v41 = vmul.f32 0.5, %v3668_v27  ;;  %6351 = vtanh.f32 %v3699_v19  ;;  %v5901_v14 = vpack.c.bf16 %v7466_v11, %v7462_v25 }
 0x442   :  { %v3603_v47 = vpop.f32.mrf.mxu1 }
 0x443   :  { %v3670_v52 = vadd.f32 %v3603_v47, %v3521_v8  ;;  %v3701_v9 = vmul.f32 0.5, %v3669_v63  ;;  %6353 = vtanh.f32 %v3700_v41  ;;  %v5904_v63 = vpack.c.bf16 %v7493_v40, %v7489_v42 }
 0x444   :  { %v3605_v43 = vpop.f32.mrf.mxu1  ;;  %v6342_v27 = vpop.eup %6341  ;;  %v3530_v11 = vunpack.c.h.bf16 %v5901_v14  ;;  %v3529_v19 = vunpack.c.l.bf16 %v5901_v14 }
 0x445   :  { %v3671_v45 = vadd.f32 %v3605_v43, %v3522_v4  ;;  %v3726_v17 = vmul.f32 0.5, %v3670_v52  ;;  %6355 = vtanh.f32 %v3701_v9  ;;  %v7523_v4 = vpack.c.bf16 %v7502_v24, %v7498_v21 }
 0x446   :  { %v3607_v35 = vpop.f32.mrf.mxu1  ;;  %v7526_v52 = vpack.c.bf16 %v1072_v39, %v7507_v30  ;;  %v3535_v24 = vunpack.c.l.bf16 %v5904_v63  ;;  %v3536_v41 = vunpack.c.h.bf16 %v5904_v63 }
 0x447   :  { %v3672_v29 = vadd.f32 %v3607_v35, %v3523_v23  ;;  %v3727_v6 = vmul.f32 0.5, %v3671_v45  ;;  %6357 = vtanh.f32 %v3726_v17  ;;  %v5902_v35 = vpack.c.bf16 %v7475_v32, %v7471_v54  ;;  %v1080_v54 = vpop.f32.mrf.mxu0  ;;  %v6344_v32 = vpop.eup %6343 }
 0x448   :  { %v3609_v13 = vpop.f32.mrf.mxu1  ;;  %v6346_v25 = vpop.eup %6345  ;;  %v3538_v30 = vunpack.c.h.bf16 %v7523_v4 }
 0x449   :  { %v3673_v49 = vadd.f32 %v3609_v13, %v3524_v2  ;;  %v3728_v43 = vmul.f32 0.5, %v3672_v29  ;;  %v5903_v13 = vpack.c.bf16 %v7484_v38, %v7480_v33  ;;  %v3532_v28 = vunpack.c.h.bf16 %v5902_v35  ;;  %v1082_v40 = vpop.f32.mrf.mxu0 }
 0x44a   :  { %v3613_v58 = vpop.f32.mrf.mxu1  ;;  %v7532_v17 = vpack.c.bf16 %v1082_v40, %v1080_v54  ;;  %v3539_v29 = vunpack.c.l.bf16 %v7526_v52 }
 0x44b   :  { %v3729_v47 = vmul.f32 0.5, %v3673_v49  ;;  %v3674_v36 = vadd.f32 %v3613_v58, %v3525_v1  ;;  %v3533_v38 = vunpack.c.l.bf16 %v5903_v13  ;;  %v6348_v58 = vpop.eup %6347  ;;  %v3534_v26 = vunpack.c.h.bf16 %v5903_v13 }
 0x44c   :  { %v3615_v46 = vpop.f32.mrf.mxu1  ;;  %v6350_v23 = vpop.eup %6349  ;;  %v3537_v1 = vunpack.c.l.bf16 %v7523_v4  ;;  %v3713_v14 = vmul.f32 0.5, %v6348_v58  ;;  %v3543_v13 = vunpack.c.l.bf16 %v7532_v17  ;;  %v3544_v54 = vunpack.c.h.bf16 %v7532_v17 }
 0x44d   :  { %v3675_v55 = vadd.f32 %v3615_v46, %v3526_v59  ;;  %6359 = vtanh.f32 %v3729_v47  ;;  %v3730_v56 = vmul.f32 0.5, %v3674_v36  ;;  %v3531_v59 = vunpack.c.l.bf16 %v5902_v35 }
 0x44e   :  { %v3617_v37 = vpop.f32.mrf.mxu1  ;;  %v6352_v46 = vpop.eup %6351  ;;  %v3540_v36 = vunpack.c.h.bf16 %v7526_v52 }
 0x44f   :  { %v3676_v34 = vadd.f32 %v3617_v37, %v3527_v18  ;;  %v3731_v57 = vmul.f32 0.5, %v3675_v55  ;;  %v7529_v55 = vpack.c.bf16 %v1078_v53, %v1076_v3  ;;  %v3712_v3 = vmul.f32 0.5, %v6346_v25 }
 0x450   :  { %v3619_v20 = vpop.f32.mrf.mxu1  ;;  %v6354_v18 = vpop.eup %6353 }
 0x451   :  { %v3677_v61 = vadd.f32 %v3619_v20, %v3528_v0  ;;  %v3732_v31 = vmul.f32 0.5, %v3676_v34  ;;  %6361 = vtanh.f32 %v3731_v57  ;;  %v3710_v34 = vmul.f32 0.5, %v6342_v27 }
 0x452   :  { %v7511_v44 = vpop.f32.mrf.mxu1  ;;  %6363 = vtanh.f32 %v3727_v6  ;;  %v6356_v39 = vpop.eup %6355  ;;  %v3711_v6 = vmul.f32 0.5, %v6344_v32  ;;  %v3542_v53 = vunpack.c.h.bf16 %v7529_v55  ;;  %v3715_v27 = vmul.f32 0.5, %v6352_v46 }
 0x453   :  { %v3733_v62 = vmul.f32 0.5, %v3677_v61  ;;  %6365 = vtanh.f32 %v3728_v43  ;;  %v3678_v35 = vadd.f32 %v7511_v44, %v3529_v19  ;;  %v7541_v32 = vadd.f32 0.5, %v3710_v34 }
 0x454   :  { %v3625_v8 = vpop.f32.mrf.mxu1  ;;  %6367 = vtanh.f32 %v3732_v31  ;;  %v6358_v47 = vpop.eup %6357  ;;  %v3719_v63 = vadd.f32 0.5, %v3711_v6  ;;  %v7543_v25 = vadd.f32 0.5, %v3712_v3 }
 0x455   :  { %6369 = vtanh.f32 %v3730_v56  ;;  %v3679_v49 = vadd.f32 %v3625_v8, %v3530_v11  ;;  %v3541_v8 = vunpack.c.l.bf16 %v7529_v55 }
 0x456   :  { %v3627_v16 = vpop.f32.mrf.mxu1  ;;  %6371 = vtanh.f32 %v3733_v62  ;;  %v3714_v62 = vmul.f32 0.5, %v6350_v23  ;;  %v3721_v23 = vadd.f32 0.5, %v3713_v14 }
 0x457   :  { %v3680_v0 = vadd.f32 %v3627_v16, %v3531_v59 }
 0x458   :  { %v3629_v5 = vpop.f32.mrf.mxu1  ;;  %v3722_v19 = vadd.f32 0.5, %v3714_v62 }
 0x459   :  { %v3681_v33 = vadd.f32 %v3629_v5, %v3532_v28 }
 0x45a   :  { %v3633_v2 = vpop.f32.mrf.mxu1  ;;  %v6360_v57 = vpop.eup %6359 }
 0x45b   :  { %6373 = vtanh.f32 %v3681_v33  ;;  %v3682_v9 = vadd.f32 %v3633_v2, %v3533_v38  ;;  %v3745_v28 = vmul.f32 0.5, %v6360_v57  ;;  %v3716_v38 = vmul.f32 0.5, %v6354_v18 }
 0x45c   :  { %v3635_v42 = vpop.f32.mrf.mxu1  ;;  %v3717_v2 = vmul.f32 0.5, %v6356_v39 }
 0x45d   :  { %v3683_v21 = vadd.f32 %v3635_v42, %v3534_v26  ;;  %v3723_v42 = vadd.f32 0.5, %v3715_v27  ;;  %v3753_v46 = vadd.f32 0.5, %v3745_v28 }
 0x45e   :  { %v3637_v45 = vpop.f32.mrf.mxu1  ;;  %v6362_v43 = vpop.eup %6361  ;;  %v3725_v18 = vadd.f32 0.5, %v3717_v2 }
 0x45f   :  { %6375 = vtanh.f32 %v3683_v21  ;;  %v3684_v37 = vadd.f32 %v3637_v45, %v3535_v24  ;;  %v6364_v56 = vpop.eup %6363  ;;  %v3747_v11 = vmul.f32 0.5, %v6362_v43  ;;  %v3801_v43 = vmul.f32 %v3753_v46, %v7379_v50 }
 0x460   :  { %6377 = vtanh.f32 %v3679_v49  ;;  %v3639_v20 = vpop.f32.mrf.mxu1  ;;  %v6366_v16 = vpop.eup %6365  ;;  %v3742_v49 = vmul.f32 0.5, %v6358_v47  ;;  %v3743_v59 = vmul.f32 0.5, %v6364_v56 }
 0x461   :  { %6379 = vtanh.f32 %v3684_v37  ;;  %v3685_v61 = vadd.f32 %v3639_v20, %v3536_v41  ;;  %v6368_v44 = vpop.eup %6367  ;;  %v3744_v40 = vmul.f32 0.5, %v6366_v16  ;;  %v3724_v37 = vadd.f32 0.5, %v3716_v38 }
 0x462   :  { %6381 = vtanh.f32 %v3682_v9  ;;  %v3643_v31 = vpop.f32.mrf.mxu1  ;;  %v6370_v33 = vpop.eup %6369  ;;  %v3748_v21 = vmul.f32 0.5, %v6368_v44  ;;  %v3755_v9 = vadd.f32 0.5, %v3747_v11  ;;  %v3750_v20 = vadd.f32 0.5, %v3742_v49 }
 0x463   :  { %6383 = vtanh.f32 %v3685_v61  ;;  %v6372_v52 = vpop.eup %6371  ;;  %v3746_v41 = vmul.f32 0.5, %v6370_v33  ;;  %v3751_v57 = vadd.f32 0.5, %v3743_v59  ;;  %v3686_v47 = vadd.f32 %v3643_v31, %v3537_v1 }
 0x464   :  { %6385 = vtanh.f32 %v3680_v0  ;;  %v3645_v5 = vpop.f32.mrf.mxu1  ;;  %v3749_v39 = vmul.f32 0.5, %v6372_v52  ;;  %v3752_v61 = vadd.f32 0.5, %v3744_v40  ;;  %v3803_v62 = vmul.f32 %v3755_v9, %v7382_v51 }
 0x465   :  { %6387 = vtanh.f32 %v3678_v35  ;;  %v3687_v58 = vadd.f32 %v3645_v5, %v3538_v30  ;;  %v3756_v35 = vadd.f32 0.5, %v3748_v21  ;;  %v3754_v14 = vadd.f32 0.5, %v3746_v41 }
 0x466   :  { %v3647_v26 = vpop.f32.mrf.mxu1  ;;  %v3757_v5 = vadd.f32 0.5, %v3749_v39  ;;  %v3766_v33 = vmul.f32 0.5, %v3686_v47  ;;  %v3799_v17 = vmul.f32 %v3751_v57, %v7396_v15 }
 0x467   :  { %v3688_v45 = vadd.f32 %v3647_v26, %v3539_v29  ;;  %v3767_v34 = vmul.f32 0.5, %v3687_v58  ;;  %v3802_v21 = vmul.f32 %v3754_v14, %v7393_v10  ;;  %v3798_v10 = vmul.f32 %v3750_v20, %v7404_v48 }
 0x468   :  { %v3649_v24 = vpop.f32.mrf.mxu1  ;;  %v6374_v0 = vpop.eup %6373 }
 0x469   :  { %v3689_v55 = vadd.f32 %v3649_v24, %v3540_v36  ;;  %v3768_v16 = vmul.f32 0.5, %v3688_v45  ;;  %v3809_v44 = vmul.f32 %v6374_v0, %v3721_v23  ;;  %6389 = vtanh.f32 %v3767_v34 }
 0x46a   :  { %v3653_v30 = vpop.f32.mrf.mxu1 }
 0x46b   :  { %v3769_v6 = vmul.f32 0.5, %v3689_v55  ;;  %v3690_v56 = vadd.f32 %v3653_v30, %v3541_v8  ;;  %v3804_v8 = vmul.f32 %v3756_v35, %v7386_v12  ;;  %v7554_v49 = vadd.f32 %v3809_v44, %v3801_v43 }
 0x46c   :  { %v6376_v3 = vpop.eup %6375  ;;  %v3655_v29 = vpop.f32.mrf.mxu1  ;;  %v3805_v12 = vmul.f32 %v3757_v5, %v7389_v60 }
 0x46d   :  { %v6378_v36 = vpop.eup %6377  ;;  %v3691_v27 = vadd.f32 %v3655_v29, %v3542_v53  ;;  %v3770_v4 = vmul.f32 0.5, %v3690_v56  ;;  %v3811_v11 = vmul.f32 %v6376_v3, %v3723_v42  ;;  %6391 = vtanh.f32 %v3769_v6 }
 0x46e   :  { %v6380_v28 = vpop.eup %6379  ;;  %v3657_v1 = vpop.f32.mrf.mxu1  ;;  %v3807_v26 = vmul.f32 %v6378_v36, %v3719_v63 }
 0x46f   :  { %v6382_v31 = vpop.eup %6381  ;;  %v3771_v50 = vmul.f32 0.5, %v3691_v27  ;;  %v3812_v2 = vmul.f32 %v6380_v28, %v3724_v37  ;;  %6393 = vtanh.f32 %v3770_v4  ;;  %v3692_v51 = vadd.f32 %v3657_v1, %v3543_v13 }
 0x470   :  { %v6384_v38 = vpop.eup %6383  ;;  %v3659_v53 = vpop.f32.mrf.mxu1  ;;  %6395 = vtanh.f32 %v3768_v16  ;;  %v3810_v59 = vmul.f32 %v6382_v31, %v3722_v19  ;;  %v7557_v46 = vadd.f32 %v3811_v11, %v3803_v62  ;;  %v3800_v19 = vmul.f32 %v3752_v61, %v7400_v7 }
 0x471   :  { %v6386_v58 = vpop.eup %6385  ;;  %v3813_v52 = vmul.f32 %v6384_v38, %v3725_v18  ;;  %v3693_v23 = vadd.f32 %v3659_v53, %v3544_v54  ;;  %6397 = vtanh.f32 %v3771_v50  ;;  %v3772_v42 = vmul.f32 0.5, %v3692_v51 }
 0x472   :  { %v6388_v40 = vpop.eup %6387  ;;  %6399 = vtanh.f32 %v3766_v33  ;;  %v3808_v63 = vmul.f32 %v6386_v58, %v7543_v25  ;;  %v7561_v24 = vadd.f32 %v3812_v2, %v3804_v8  ;;  %v7568_v41 = vadd.f32 %v3810_v59, %v3802_v21  ;;  %v7588_v59 = vld [vmem:[%s8384_s2] sm:$0xff]   ;;  %v7628_v21 = vld [vmem:[%s8384_s2 + $0x28] sm:$0xff]  }
 0x473   :  { %v3773_v13 = vmul.f32 0.5, %v3693_v23  ;;  %6401 = vtanh.f32 %v3772_v42  ;;  %v7564_v54 = vadd.f32 %v3813_v52, %v3805_v12  ;;  %v3806_v60 = vmul.f32 %v6388_v40, %v7541_v32  ;;  %v7596_v42 = vld [vmem:[%s8384_s2 + $0x8] sm:$0xff]   ;;  %v7604_v40 = vld [vmem:[%s8384_s2 + $0x10] sm:$0xff]   ;;  %v7612_v12 = vld [vmem:[%s8384_s2 + $0x18] sm:$0xff]  }
 0x474   :  { %v7571_v9 = vadd.f32 %v3807_v26, %v3799_v17  ;;  %v7575_v25 = vadd.f32 %v3808_v63, %v3800_v19  ;;  %v7636_v63 = vld [vmem:[%s8384_s2 + $0x30] sm:$0xff]   ;;  %v7644_v17 = vld [vmem:[%s8384_s2 + $0x38] sm:$0xff]   ;;  %v1086_v19 = vpop.f32.mrf.mxu0 }
 0x475   :  { %6403 = vtanh.f32 %v3773_v13  ;;  %v7579_v15 = vadd.f32 %v3806_v60, %v3798_v10  ;;  %v7620_v13 = vld [vmem:[%s8384_s2 + $0x20] sm:$0xff]   ;;  %8411 = vst [vmem:[#allocation10_spill] sm:$0xff] %v7636_v63  ;;  %8412 = vst [vmem:[#allocation11_spill] sm:$0xff] %v7644_v17 }
 0x476   :  { %6405 = vtanh.f32 %v7554_v49  ;;  %v6390_v7 = vpop.eup %6389  ;;  %v1088_v60 = vpop.f32.mrf.mxu0 }
 0x477   :  { %6407 = vtanh.f32 %v7557_v46  ;;  %v3783_v0 = vmul.f32 0.5, %v6390_v7 }
 0x478   :  { %6409 = vtanh.f32 %v7561_v24  ;;  %v1090_v10 = vpop.f32.mrf.mxu0 }
 0x479   :  { %6411 = vtanh.f32 %v7564_v54  ;;  %v3791_v62 = vadd.f32 0.5, %v3783_v0 }
 0x47a   :  { %6413 = vtanh.f32 %v7568_v41  ;;  %v6392_v32 = vpop.eup %6391  ;;  %v1092_v7 = vpop.f32.mrf.mxu0 }
 0x47b   :  { %6415 = vtanh.f32 %v7571_v9  ;;  %v3785_v37 = vmul.f32 0.5, %v6392_v32 }
 0x47c   :  { %6417 = vtanh.f32 %v7575_v25  ;;  %v6394_v45 = vpop.eup %6393  ;;  %v1096_v32 = vpop.f32.mrf.mxu0 }
 0x47d   :  { %v6396_v55 = vpop.eup %6395  ;;  %6419 = vtanh.f32 %v7579_v15  ;;  %v3786_v39 = vmul.f32 0.5, %v6394_v45  ;;  %v3793_v3 = vadd.f32 0.5, %v3785_v37 }
 0x47e   :  { %v6398_v48 = vpop.eup %6397  ;;  %v3784_v57 = vmul.f32 0.5, %v6396_v55  ;;  %v1098_v45 = vpop.f32.mrf.mxu0 }
 0x47f   :  { %v6400_v18 = vpop.eup %6399  ;;  %v3787_v34 = vmul.f32 0.5, %v6398_v48  ;;  %v3794_v29 = vadd.f32 0.5, %v3786_v39  ;;  %v6071_v39 = vld [vmem:[%s8383_s1 + $0x140] sm:$0xff]  }
 0x480   :  { %v6402_v30 = vpop.eup %6401  ;;  %v3782_v56 = vmul.f32 0.5, %v6400_v18  ;;  %v3792_v28 = vadd.f32 0.5, %v3784_v57  ;;  %v1100_v55 = vpop.f32.mrf.mxu0  ;;  %5601 = vmatmul.mubr.msk.bf16.gmra.mxu0 %vm520_vm1, %v6071_v39 }
 0x481   :  { %v3788_v47 = vmul.f32 0.5, %v6402_v30  ;;  %v3795_v61 = vadd.f32 0.5, %v3787_v34  ;;  %1174 = vmatprep.mubr.bf16.mxu0 %v8408_v22 }
 0x482   :  { %v6404_v20 = vpop.eup %6403  ;;  %v3790_v33 = vadd.f32 0.5, %v3782_v56  ;;  %v1102_v48 = vpop.f32.mrf.mxu0  ;;  %v6075_v56 = vld [vmem:[%s8383_s1 + $0x160] sm:$0xff]  }
 0x483   :  { %v6406_v6 = vpop.eup %6405  ;;  %v3789_v43 = vmul.f32 0.5, %v6404_v20  ;;  %v3796_v36 = vadd.f32 0.5, %v3788_v47  ;;  %v6072_v20 = vld [vmem:[%s8383_s1 + $0x148] sm:$0xff]   ;;  %v6073_v47 = vld [vmem:[%s8383_s1 + $0x150] sm:$0xff]  }
 0x484   :  { %v6408_v35 = vpop.eup %6407  ;;  %v3833_v31 = vmul.f32 %v6406_v6, %v3793_v3  ;;  %v1106_v37 = vpop.f32.mrf.mxu0 }
 0x485   :  { %v6410_v14 = vpop.eup %6409  ;;  %v3797_v16 = vadd.f32 0.5, %v3789_v43  ;;  %v3835_v4 = vmul.f32 %v6408_v35, %v3795_v61  ;;  %v6074_v61 = vld [vmem:[%s8383_s1 + $0x158] sm:$0xff]  }
 0x486   :  { %v6412_v27 = vpop.eup %6411  ;;  %v3836_v5 = vmul.f32 %v6410_v14, %v3796_v36  ;;  %v1108_v18 = vpop.f32.mrf.mxu0  ;;  %v6076_v14 = vld [vmem:[%s8383_s1 + $0x168] sm:$0xff]  }
 0x487   :  { %v6414_v44 = vpop.eup %6413  ;;  %v3837_v1 = vmul.f32 %v6412_v27, %v3797_v16 }
 0x488   :  { %v6416_v11 = vpop.eup %6415  ;;  %v3834_v50 = vmul.f32 %v6414_v44, %v3794_v29  ;;  %v7652_v34 = vpop.f32.mrf.mxu0  ;;  %5602 = vmatmul.mubr.msk.bf16.gmra.mxu0 %vm520_vm1, %v6072_v20  ;;  %v6077_v44 = vld [vmem:[%s8383_s1 + $0x170] sm:$0xff]   ;;  %v5913_v20 = vpack.c.bf16 %v1108_v18, %v1106_v37 }
 0x489   :  { %v6418_v38 = vpop.eup %6417  ;;  %v3889_v8 = vpack.c.bf16 %v3837_v1, %v3835_v4  ;;  %v3831_v2 = vmul.f32 %v6416_v11, %v3791_v62  ;;  %1184 = vmatprep.mubr.bf16.mxu0 %v8408_v22  ;;  %v5909_v11 = vpack.c.bf16 %v1088_v60, %v1086_v19  ;;  %v5912_v60 = vpack.c.bf16 %v1102_v48, %v1100_v55 }
 0x48a   :  { %v3832_v51 = vmul.f32 %v6418_v38, %v3792_v28  ;;  %v3888_v53 = vpack.c.bf16 %v3836_v5, %v3834_v50  ;;  %v6420_v58 = vpop.eup %6419  ;;  %v1112_v30 = vpop.f32.mrf.mxu0  ;;  %v5910_v38 = vpack.c.bf16 %v1092_v7, %v1090_v10 }
 0x48b   :  { %3902 = vmatprep.subr.bf16.mxu1 %v3889_v8  ;;  %v3887_v26 = vpack.c.bf16 %v3833_v31, %v3831_v2  ;;  %v3830_v52 = vmul.f32 %v6420_v58, %v3790_v33  ;;  %v6078_v2 = vld [vmem:[%s8383_s1 + $0x178] sm:$0xff]   ;;  %v3861_v18 = vunpack.c.h.bf16 %v5912_v60 }
 0x48c   :  { %3903 = vmatpush1.bf16.msra.mxu1 %v3888_v53  ;;  %v7656_v0 = vpop.f32.mrf.mxu0  ;;  %v3854_v53 = vunpack.c.l.bf16 %v5909_v11 }
 0x48d   :  { %3904 = vmatprep.subr.bf16.mxu1 %v3887_v26  ;;  %v3886_v23 = vpack.c.bf16 %v3832_v51, %v3830_v52  ;;  %v5911_v51 = vpack.c.bf16 %v1098_v45, %v1096_v32  ;;  %v3855_v52 = vunpack.c.h.bf16 %v5909_v11 }
 0x48e   :  { %v7662_v57 = vpop.f32.mrf.mxu0 }
 0x490   :  { %3905 = vmatpush1.bf16.msra.mxu1 %v3886_v23  ;;  %v7668_v6 = vpop.f32.mrf.mxu0  ;;  %5603 = vmatmul.mubr.msk.bf16.gmra.mxu0 %vm520_vm1, %v6073_v47  ;;  %v3856_v23 = vunpack.c.l.bf16 %v5910_v38  ;;  %v3858_v47 = vunpack.c.l.bf16 %v5911_v51 }
 0x491   :  { %1194 = vmatprep.mubr.bf16.mxu0 %v8408_v22 }
 0x492   :  { %v7671_v3 = vpop.f32.mrf.mxu0 }
 0x493   :  { %5805 = vmatmul.mubr.msk.bf16.vlgmr.msra.gmra.mxu1 %vm2501_vm2, %v7588_v59 }
 0x494   :  { %3932 = vmatprep.mubr.bf16.mxu1 %v8408_v22  ;;  %v7677_v43 = vpop.f32.mrf.mxu0 }
 0x496   :  { %v7680_v35 = vpop.f32.mrf.mxu0 }
 0x498   :  { %5604 = vmatmul.mubr.msk.bf16.gmra.mxu0 %vm520_vm1, %v6074_v61  ;;  %v7686_v29 = vpop.f32.mrf.mxu0  ;;  %v3857_v61 = vunpack.c.h.bf16 %v5910_v38 }
 0x499   :  { %1204 = vmatprep.mubr.bf16.mxu0 %v8408_v22 }
 0x49a   :  { %v7689_v36 = vpop.f32.mrf.mxu0 }
 0x49b   :  { %5806 = vmatmul.mubr.msk.bf16.gmra.mxu1 %vm2501_vm2, %v7596_v42 }
 0x49c   :  { %3942 = vmatprep.mubr.bf16.mxu1 %v8408_v22  ;;  %v7695_v62 = vpop.f32.mrf.mxu0 }
 0x49e   :  { %v7698_v27 = vpop.f32.mrf.mxu0 }
 0x4a0   :  { %5605 = vmatmul.mubr.msk.bf16.gmra.mxu0 %vm520_vm1, %v6075_v56  ;;  %v7704_v4 = vpop.f32.mrf.mxu0 }
 0x4a1   :  { %1214 = vmatprep.mubr.bf16.mxu0 %v8408_v22 }
 0x4a2   :  { %v7707_v33 = vpop.f32.mrf.mxu0 }
 0x4a3   :  { %5807 = vmatmul.mubr.msk.bf16.gmra.mxu1 %vm2501_vm2, %v7604_v40 }
 0x4a4   :  { %3952 = vmatprep.mubr.bf16.mxu1 %v8408_v22  ;;  %v7713_v58 = vpop.f32.mrf.mxu0 }
 0x4a6   :  { %v7716_v10 = vpop.f32.mrf.mxu0 }
 0x4a8   :  { %5606 = vmatmul.mubr.msk.bf16.gmra.mxu0 %vm520_vm1, %v6076_v14  ;;  %v3859_v14 = vunpack.c.h.bf16 %v5911_v51  ;;  %v7720_v55 = vpop.f32.mrf.mxu0  ;;  %v3863_v51 = vunpack.c.h.bf16 %v5913_v20 }
 0x4a9   :  { %1224 = vmatprep.mubr.bf16.mxu0 %v8408_v22 }
 0x4ab   :  { %5808 = vmatmul.mubr.msk.bf16.gmra.mxu1 %vm2501_vm2, %v7612_v12 }
 0x4ac   :  { %3962 = vmatprep.mubr.bf16.mxu1 %v8408_v22 }
 0x4b0   :  { %5607 = vmatmul.mubr.msk.bf16.gmra.mxu0 %vm520_vm1, %v6077_v44  ;;  %v5914_v44 = vpack.c.bf16 %v1112_v30, %v7652_v34 }
 0x4b1   :  { %1234 = vmatprep.mubr.bf16.mxu0 %v8408_v22 }
 0x4b3   :  { %5809 = vmatmul.mubr.msk.bf16.gmra.mxu1 %vm2501_vm2, %v7620_v13 }
 0x4b4   :  { %3972 = vmatprep.mubr.bf16.mxu1 %v8408_v22 }
 0x4b8   :  { %5608 = vmatmul.mubr.msk.bf16.gmra.mxu0 %vm520_vm1, %v6078_v2  ;;  %v3860_v2 = vunpack.c.l.bf16 %v5912_v60 }
 0x4b9   :  { %1244 = vmatprep.mubr.bf16.mxu0 %v8408_v22 }
 0x4bb   :  { %5810 = vmatmul.mubr.msk.bf16.gmra.mxu1 %vm2501_vm2, %v7628_v21 }
 0x4bc   :  { %3982 = vmatprep.mubr.bf16.mxu1 %v8408_v22 }
 0x4c3   :  { %5811 = vmatmul.mubr.msk.bf16.gmra.mxu1 %vm2501_vm2, %v7636_v63 }
 0x4c4   :  { %3992 = vmatprep.mubr.bf16.mxu1 %v8408_v22 }
 0x4cb   :  { %5812 = vmatmul.mubr.msk.bf16.gmra.mxu1 %vm2501_vm2, %v7644_v17 }
 0x4cc   :  { %4263 = vmatprep.mubr.bf16.mxu1 %v8408_v22 }
 0x553   :  { %v3924_v16 = vpop.f32.mrf.mxu1 }
 0x554   :  { %v4003_v19 = vadd.f32 %v3924_v16, %v3854_v53  ;;  %v3862_v16 = vunpack.c.l.bf16 %v5913_v20 }
 0x555   :  { %v3926_v28 = vpop.f32.mrf.mxu1 }
 0x556   :  { %v4004_v7 = vadd.f32 %v3926_v28, %v3855_v52  ;;  %v4035_v17 = vmul.f32 0.5, %v4003_v19  ;;  %v5915_v28 = vpack.c.bf16 %v7662_v57, %v7656_v0 }
 0x557   :  { %v3928_v5 = vpop.f32.mrf.mxu1 }
 0x558   :  { %v4005_v45 = vadd.f32 %v3928_v5, %v3856_v23  ;;  %v4036_v48 = vmul.f32 0.5, %v4004_v7  ;;  %6421 = vtanh.f32 %v4035_v17  ;;  %v3867_v0 = vunpack.c.h.bf16 %v5915_v28 }
 0x559   :  { %v3930_v1 = vpop.f32.mrf.mxu1 }
 0x55a   :  { %v4006_v56 = vadd.f32 %v3930_v1, %v3857_v61  ;;  %v4037_v53 = vmul.f32 0.5, %v4005_v45  ;;  %v5916_v1 = vpack.c.bf16 %v7671_v3, %v7668_v6  ;;  %6423 = vtanh.f32 %v4036_v48 }
 0x55b   :  { %v3934_v31 = vpop.f32.mrf.mxu1  ;;  %v3866_v61 = vunpack.c.l.bf16 %v5915_v28 }
 0x55c   :  { %v4007_v63 = vadd.f32 %v3934_v31, %v3858_v47  ;;  %v4038_v34 = vmul.f32 0.5, %v4006_v56  ;;  %v3865_v31 = vunpack.c.h.bf16 %v5914_v44  ;;  %v3864_v47 = vunpack.c.l.bf16 %v5914_v44 }
 0x55d   :  { %v3936_v50 = vpop.f32.mrf.mxu1  ;;  %6425 = vtanh.f32 %v4037_v53  ;;  %v3868_v45 = vunpack.c.l.bf16 %v5916_v1  ;;  %v3869_v44 = vunpack.c.h.bf16 %v5916_v1  ;;  %v5917_v1 = vpack.c.bf16 %v7680_v35, %v7677_v43 }
 0x55e   :  { %v4008_v37 = vadd.f32 %v3936_v50, %v3859_v14  ;;  %v4039_v23 = vmul.f32 0.5, %v4007_v63  ;;  %v1152_v50 = vpop.f32.mrf.mxu0  ;;  %6427 = vtanh.f32 %v4038_v34 }
 0x55f   :  { %v3938_v8 = vpop.f32.mrf.mxu1  ;;  %v3871_v35 = vunpack.c.h.bf16 %v5917_v1 }
 0x560   :  { %v4009_v5 = vadd.f32 %v3938_v8, %v3860_v2  ;;  %v4040_v60 = vmul.f32 0.5, %v4008_v37  ;;  %6429 = vtanh.f32 %v4039_v23 }
 0x561   :  { %v3940_v26 = vpop.f32.mrf.mxu1 }
 0x562   :  { %v4010_v30 = vadd.f32 %v3940_v26, %v3861_v18  ;;  %v4041_v8 = vmul.f32 0.5, %v4009_v5  ;;  %6431 = vtanh.f32 %v4040_v60  ;;  %v7737_v60 = vpack.c.bf16 %v1152_v50, %v7720_v55 }
 0x563   :  { %v3944_v39 = vpop.f32.mrf.mxu1 }
 0x564   :  { %v4011_v19 = vadd.f32 %v3944_v39, %v3862_v16  ;;  %v4042_v6 = vmul.f32 0.5, %v4010_v30  ;;  %v1156_v39 = vpop.f32.mrf.mxu0  ;;  %6433 = vtanh.f32 %v4041_v8 }
 0x565   :  { %v3946_v32 = vpop.f32.mrf.mxu1  ;;  %v6422_v23 = vpop.eup %6421 }
 0x566   :  { %v4012_v3 = vadd.f32 %v3946_v32, %v3863_v51  ;;  %v4067_v17 = vmul.f32 0.5, %v4011_v19  ;;  %6435 = vtanh.f32 %v4042_v6  ;;  %v5919_v51 = vpack.c.bf16 %v7698_v27, %v7695_v62 }
 0x567   :  { %v3948_v11 = vpop.f32.mrf.mxu1  ;;  %v3870_v6 = vunpack.c.l.bf16 %v5917_v1 }
 0x568   :  { %v4013_v63 = vadd.f32 %v3948_v11, %v3864_v47  ;;  %v4068_v37 = vmul.f32 0.5, %v4012_v3  ;;  %6437 = vtanh.f32 %v4067_v17  ;;  %v5918_v11 = vpack.c.bf16 %v7689_v36, %v7686_v29  ;;  %v6424_v29 = vpop.eup %6423 }
 0x569   :  { %v3950_v38 = vpop.f32.mrf.mxu1  ;;  %v5920_v36 = vpack.c.bf16 %v7707_v33, %v7704_v4  ;;  %v3874_v62 = vunpack.c.l.bf16 %v5919_v51  ;;  %v3875_v8 = vunpack.c.h.bf16 %v5919_v51 }
 0x56a   :  { %v4014_v7 = vadd.f32 %v3950_v38, %v3865_v31  ;;  %v4069_v32 = vmul.f32 0.5, %v4013_v63  ;;  %v1158_v38 = vpop.f32.mrf.mxu0  ;;  %v3873_v19 = vunpack.c.h.bf16 %v5918_v11  ;;  %v6426_v43 = vpop.eup %6425  ;;  %v3872_v4 = vunpack.c.l.bf16 %v5918_v11 }
 0x56b   :  { %v3954_v52 = vpop.f32.mrf.mxu1  ;;  %v3877_v17 = vunpack.c.h.bf16 %v5920_v36 }
 0x56c   :  { %v4070_v56 = vmul.f32 0.5, %v4014_v7  ;;  %v4015_v16 = vadd.f32 %v3954_v52, %v3866_v61  ;;  %v1160_v52 = vpop.f32.mrf.mxu0 }
 0x56d   :  { %v3956_v57 = vpop.f32.mrf.mxu1 }
 0x56e   :  { %v4016_v26 = vadd.f32 %v3956_v57, %v3867_v0  ;;  %6439 = vtanh.f32 %v4070_v56  ;;  %v4071_v34 = vmul.f32 0.5, %v4015_v16  ;;  %v6428_v0 = vpop.eup %6427  ;;  %v7741_v57 = vpack.c.bf16 %v7716_v10, %v7713_v58  ;;  %v1162_v61 = vpop.f32.mrf.mxu0 }
 0x56f   :  { %v3958_v20 = vpop.f32.mrf.mxu1  ;;  %v7746_v58 = vpack.c.bf16 %v1162_v61, %v1160_v52 }
 0x570   :  { %v4017_v14 = vadd.f32 %v3958_v20, %v3868_v45  ;;  %v4072_v48 = vmul.f32 0.5, %v4016_v26  ;;  %v6430_v45 = vpop.eup %6429  ;;  %v3881_v26 = vunpack.c.h.bf16 %v7737_v60  ;;  %v3876_v20 = vunpack.c.l.bf16 %v5920_v36 }
 0x571   :  { %v3960_v2 = vpop.f32.mrf.mxu1  ;;  %v6432_v55 = vpop.eup %6431  ;;  %v3878_v16 = vunpack.c.l.bf16 %v7741_v57  ;;  %v3885_v52 = vunpack.c.h.bf16 %v7746_v58 }
 0x572   :  { %v4018_v18 = vadd.f32 %v3960_v2, %v3869_v44  ;;  %v4073_v53 = vmul.f32 0.5, %v4017_v14  ;;  %6441 = vtanh.f32 %v4072_v48  ;;  %v6434_v63 = vpop.eup %6433  ;;  %v7744_v44 = vpack.c.bf16 %v1158_v38, %v1156_v39 }
 0x573   :  { %v7726_v28 = vpop.f32.mrf.mxu1  ;;  %6443 = vtanh.f32 %v4068_v37  ;;  %v6436_v10 = vpop.eup %6435  ;;  %v3879_v48 = vunpack.c.h.bf16 %v7741_v57  ;;  %v4053_v39 = vmul.f32 0.5, %v6426_v43 }
 0x574   :  { %v4074_v30 = vmul.f32 0.5, %v4018_v18  ;;  %6445 = vtanh.f32 %v4069_v32  ;;  %v4051_v18 = vmul.f32 0.5, %v6422_v23  ;;  %v3883_v36 = vunpack.c.h.bf16 %v7744_v44 }
 0x575   :  { %v3966_v5 = vpop.f32.mrf.mxu1  ;;  %6447 = vtanh.f32 %v4073_v53  ;;  %v6438_v37 = vpop.eup %6437  ;;  %v3880_v53 = vunpack.c.l.bf16 %v7737_v60  ;;  %v7758_v61 = vadd.f32 0.5, %v4053_v39 }
 0x576   :  { %6449 = vtanh.f32 %v4071_v34  ;;  %v4020_v3 = vadd.f32 %v3966_v5, %v3871_v35  ;;  %v4052_v34 = vmul.f32 0.5, %v6424_v29  ;;  %v4056_v29 = vmul.f32 0.5, %v6432_v55 }
 0x577   :  { %v3968_v31 = vpop.f32.mrf.mxu1  ;;  %6451 = vtanh.f32 %v4074_v30  ;;  %v4019_v30 = vadd.f32 %v7726_v28, %v3870_v6 }
 0x578   :  { %v4021_v32 = vadd.f32 %v3968_v31, %v3872_v4  ;;  %v4055_v31 = vmul.f32 0.5, %v6430_v45  ;;  %v4058_v45 = vmul.f32 0.5, %v6436_v10 }
 0x579   :  { %v3970_v47 = vpop.f32.mrf.mxu1 }
 0x57a   :  { %v4022_v7 = vadd.f32 %v3970_v47, %v3873_v19  ;;  %v3882_v19 = vunpack.c.l.bf16 %v7744_v44  ;;  %v4054_v47 = vmul.f32 0.5, %v6428_v0  ;;  %v4057_v0 = vmul.f32 0.5, %v6434_v63 }
 0x57b   :  { %v3974_v27 = vpop.f32.mrf.mxu1  ;;  %v6440_v5 = vpop.eup %6439  ;;  %v4066_v39 = vadd.f32 0.5, %v4058_v45 }
 0x57c   :  { %6453 = vtanh.f32 %v4022_v7  ;;  %v4023_v56 = vadd.f32 %v3974_v27, %v3874_v62  ;;  %v4086_v43 = vmul.f32 0.5, %v6440_v5  ;;  %v3884_v62 = vunpack.c.l.bf16 %v7746_v58 }
 0x57d   :  { %v3976_v33 = vpop.f32.mrf.mxu1  ;;  %v7756_v27 = vadd.f32 0.5, %v4051_v18  ;;  %v4062_v55 = vadd.f32 0.5, %v4054_v47  ;;  %v4065_v10 = vadd.f32 0.5, %v4057_v0 }
 0x57e   :  { %v4024_v50 = vadd.f32 %v3976_v33, %v3875_v8  ;;  %v4060_v8 = vadd.f32 0.5, %v4052_v34 }
 0x57f   :  { %v3978_v14 = vpop.f32.mrf.mxu1  ;;  %v6442_v1 = vpop.eup %6441 }
 0x580   :  { %6455 = vtanh.f32 %v4024_v50  ;;  %v4025_v2 = vadd.f32 %v3978_v14, %v3876_v20  ;;  %v6444_v23 = vpop.eup %6443  ;;  %v4088_v6 = vmul.f32 0.5, %v6442_v1  ;;  %v4063_v20 = vadd.f32 0.5, %v4055_v31 }
 0x581   :  { %6457 = vtanh.f32 %v4020_v3  ;;  %v3980_v11 = vpop.f32.mrf.mxu1  ;;  %v6446_v35 = vpop.eup %6445  ;;  %v4064_v14 = vadd.f32 0.5, %v4056_v29 }
 0x582   :  { %6459 = vtanh.f32 %v4025_v2  ;;  %v4026_v38 = vadd.f32 %v3980_v11, %v3877_v17  ;;  %v6448_v28 = vpop.eup %6447  ;;  %v4083_v17 = vmul.f32 0.5, %v6438_v37  ;;  %v4085_v44 = vmul.f32 0.5, %v6446_v35 }
 0x583   :  { %6461 = vtanh.f32 %v4023_v56  ;;  %v3984_v51 = vpop.f32.mrf.mxu1  ;;  %v6450_v3 = vpop.eup %6449  ;;  %v4084_v56 = vmul.f32 0.5, %v6444_v23  ;;  %v4094_v2 = vadd.f32 0.5, %v4086_v43  ;;  %v4089_v18 = vmul.f32 0.5, %v6448_v28 }
 0x584   :  { %6463 = vtanh.f32 %v4026_v38  ;;  %v6452_v50 = vpop.eup %6451  ;;  %v4087_v11 = vmul.f32 0.5, %v6450_v3  ;;  %v4096_v5 = vadd.f32 0.5, %v4088_v6  ;;  %v4091_v47 = vadd.f32 0.5, %v4083_v17 }
 0x585   :  { %6465 = vtanh.f32 %v4021_v32  ;;  %v3986_v7 = vpop.f32.mrf.mxu1  ;;  %v4092_v37 = vadd.f32 0.5, %v4084_v56  ;;  %v4027_v23 = vadd.f32 %v3984_v51, %v3878_v16  ;;  %v4093_v29 = vadd.f32 0.5, %v4085_v44 }
 0x586   :  { %6467 = vtanh.f32 %v4019_v30  ;;  %v4028_v4 = vadd.f32 %v3986_v7, %v3879_v48  ;;  %v4090_v48 = vmul.f32 0.5, %v6452_v50  ;;  %v4142_v43 = vmul.f32 %v4094_v2, %v7554_v49 }
 0x587   :  { %v3988_v33 = vpop.f32.mrf.mxu1  ;;  %v4095_v28 = vadd.f32 0.5, %v4087_v11  ;;  %v4144_v6 = vmul.f32 %v4096_v5, %v7557_v46  ;;  %v4107_v17 = vmul.f32 0.5, %v4027_v23  ;;  %v4140_v58 = vmul.f32 %v4092_v37, %v7571_v9 }
 0x588   :  { %v4029_v34 = vadd.f32 %v3988_v33, %v3880_v53  ;;  %v4108_v38 = vmul.f32 0.5, %v4028_v4  ;;  %v4097_v53 = vadd.f32 0.5, %v4089_v18  ;;  %v4098_v4 = vadd.f32 0.5, %v4090_v48 }
 0x589   :  { %v3990_v32 = vpop.f32.mrf.mxu1  ;;  %v6454_v30 = vpop.eup %6453 }
 0x58a   :  { %v4030_v63 = vadd.f32 %v3990_v32, %v3881_v26  ;;  %v4109_v3 = vmul.f32 0.5, %v4029_v34  ;;  %v4150_v33 = vmul.f32 %v6454_v30, %v4062_v55  ;;  %6469 = vtanh.f32 %v4108_v38 }
 0x58b   :  { %v3994_v1 = vpop.f32.mrf.mxu1 }
 0x58c   :  { %v4110_v31 = vmul.f32 0.5, %v4030_v63  ;;  %v4031_v7 = vadd.f32 %v3994_v1, %v3882_v19  ;;  %v4145_v19 = vmul.f32 %v4097_v53, %v7561_v24  ;;  %v7769_v11 = vadd.f32 %v4150_v33, %v4142_v43 }
 0x58d   :  { %v6456_v35 = vpop.eup %6455  ;;  %v3996_v60 = vpop.f32.mrf.mxu1  ;;  %v4146_v63 = vmul.f32 %v4098_v4, %v7564_v54 }
 0x58e   :  { %v6458_v26 = vpop.eup %6457  ;;  %v4032_v0 = vadd.f32 %v3996_v60, %v3883_v36  ;;  %v4111_v57 = vmul.f32 0.5, %v4031_v7  ;;  %v4152_v50 = vmul.f32 %v6456_v35, %v4064_v14  ;;  %6471 = vtanh.f32 %v4110_v31 }
 0x58f   :  { %v6460_v45 = vpop.eup %6459  ;;  %v3998_v16 = vpop.f32.mrf.mxu1  ;;  %v4148_v36 = vmul.f32 %v6458_v26, %v4060_v8 }
 0x590   :  { %v6462_v51 = vpop.eup %6461  ;;  %v4112_v49 = vmul.f32 0.5, %v4032_v0  ;;  %v4153_v44 = vmul.f32 %v6460_v45, %v4065_v10  ;;  %6473 = vtanh.f32 %v4111_v57  ;;  %v4033_v2 = vadd.f32 %v3998_v16, %v3884_v62 }
 0x591   :  { %v6464_v56 = vpop.eup %6463  ;;  %v4000_v46 = vpop.f32.mrf.mxu1  ;;  %6475 = vtanh.f32 %v4109_v3  ;;  %v4151_v14 = vmul.f32 %v6462_v51, %v4063_v20  ;;  %v7772_v24 = vadd.f32 %v4152_v50, %v4144_v6  ;;  %v4143_v10 = vmul.f32 %v4095_v28, %v7568_v41 }
 0x592   :  { %v6466_v18 = vpop.eup %6465  ;;  %v4154_v32 = vmul.f32 %v6464_v56, %v4066_v39  ;;  %v4034_v55 = vadd.f32 %v4000_v46, %v3885_v52  ;;  %6477 = vtanh.f32 %v4112_v49  ;;  %v4113_v5 = vmul.f32 0.5, %v4033_v2 }
 0x593   :  { %v6468_v34 = vpop.eup %6467  ;;  %6479 = vtanh.f32 %v4107_v17  ;;  %v4149_v8 = vmul.f32 %v6466_v18, %v7758_v61  ;;  %v7776_v39 = vadd.f32 %v4153_v44, %v4145_v19  ;;  %v4141_v20 = vmul.f32 %v4093_v29, %v7575_v25 }
 0x594   :  { %v4114_v62 = vmul.f32 0.5, %v4034_v55  ;;  %6481 = vtanh.f32 %v4113_v5  ;;  %v7779_v52 = vadd.f32 %v4154_v32, %v4146_v63  ;;  %v4147_v54 = vmul.f32 %v6468_v34, %v7756_v27 }
 0x595   :  { %v7783_v48 = vadd.f32 %v4151_v14, %v4143_v10  ;;  %v7786_v38 = vadd.f32 %v4148_v36, %v4140_v58  ;;  %v4139_v41 = vmul.f32 %v4091_v47, %v7579_v15  ;;  %v7790_v61 = vadd.f32 %v4149_v8, %v4141_v20 }
 0x596   :  { %6483 = vtanh.f32 %v4114_v62 }
 0x597   :  { %6485 = vtanh.f32 %v7769_v11  ;;  %v7794_v9 = vadd.f32 %v4147_v54, %v4139_v41  ;;  %v6470_v25 = vpop.eup %6469 }
 0x598   :  { %6487 = vtanh.f32 %v7772_v24  ;;  %v4124_v29 = vmul.f32 0.5, %v6470_v25 }
 0x599   :  { %6489 = vtanh.f32 %v7776_v39 }
 0x59a   :  { %6491 = vtanh.f32 %v7779_v52  ;;  %v4132_v57 = vadd.f32 0.5, %v4124_v29  ;;  %v6082_v29 = vld [vmem:[%s8383_s1 + $0x198] sm:$0xff]  }
 0x59b   :  { %6493 = vtanh.f32 %v7783_v48  ;;  %v6472_v27 = vpop.eup %6471 }
 0x59c   :  { %6495 = vtanh.f32 %v7786_v38  ;;  %v4126_v47 = vmul.f32 0.5, %v6472_v27  ;;  %v6079_v27 = vld [vmem:[%s8383_s1 + $0x180] sm:$0xff]  }
 0x59d   :  { %6497 = vtanh.f32 %v7790_v61  ;;  %v6474_v1 = vpop.eup %6473  ;;  %5609 = vmatmul.mubr.msk.bf16.gmra.mxu0 %vm520_vm1, %v6079_v27 }
 0x59e   :  { %v6476_v30 = vpop.eup %6475  ;;  %6499 = vtanh.f32 %v7794_v9  ;;  %v4127_v23 = vmul.f32 0.5, %v6474_v1  ;;  %v4134_v26 = vadd.f32 0.5, %v4126_v47  ;;  %1254 = vmatprep.mubr.bf16.mxu0 %v8408_v22  ;;  %v6080_v47 = vld [vmem:[%s8383_s1 + $0x188] sm:$0xff]  }
 0x59f   :  { %v6478_v15 = vpop.eup %6477  ;;  %v4125_v53 = vmul.f32 0.5, %v6476_v30 }
 0x5a0   :  { %v6480_v37 = vpop.eup %6479  ;;  %v4128_v31 = vmul.f32 0.5, %v6478_v15  ;;  %v4135_v45 = vadd.f32 0.5, %v4127_v23  ;;  %v6081_v23 = vld [vmem:[%s8383_s1 + $0x190] sm:$0xff]  }
 0x5a1   :  { %v6482_v35 = vpop.eup %6481  ;;  %v4123_v0 = vmul.f32 0.5, %v6480_v37  ;;  %v4133_v50 = vadd.f32 0.5, %v4125_v53 }
 0x5a2   :  { %v4129_v7 = vmul.f32 0.5, %v6482_v35  ;;  %v4136_v28 = vadd.f32 0.5, %v4128_v31 }
 0x5a3   :  { %v6484_v43 = vpop.eup %6483  ;;  %v4131_v46 = vadd.f32 0.5, %v4123_v0 }
 0x5a4   :  { %v6486_v60 = vpop.eup %6485  ;;  %v4130_v6 = vmul.f32 0.5, %v6484_v43  ;;  %v4137_v4 = vadd.f32 0.5, %v4129_v7  ;;  %v6083_v7 = vld [vmem:[%s8383_s1 + $0x1a0] sm:$0xff]  }
 0x5a5   :  { %v6488_v3 = vpop.eup %6487  ;;  %v4174_v44 = vmul.f32 %v6486_v60, %v4134_v26  ;;  %5610 = vmatmul.mubr.msk.bf16.gmra.mxu0 %vm520_vm1, %v6080_v47 }
 0x5a6   :  { %v6490_v33 = vpop.eup %6489  ;;  %v4138_v16 = vadd.f32 0.5, %v4130_v6  ;;  %v4176_v56 = vmul.f32 %v6488_v3, %v4136_v28  ;;  %1264 = vmatprep.mubr.bf16.mxu0 %v8408_v22  ;;  %v6084_v28 = vld [vmem:[%s8383_s1 + $0x1a8] sm:$0xff]  }
 0x5a7   :  { %v6492_v51 = vpop.eup %6491  ;;  %v4177_v17 = vmul.f32 %v6490_v33, %v4137_v4  ;;  %v6085_v33 = vld [vmem:[%s8383_s1 + $0x1b0] sm:$0xff]  }
 0x5a8   :  { %v6494_v49 = vpop.eup %6493  ;;  %v4178_v19 = vmul.f32 %v6492_v51, %v4138_v16 }
 0x5a9   :  { %v6496_v2 = vpop.eup %6495  ;;  %v4175_v18 = vmul.f32 %v6494_v49, %v4135_v45 }
 0x5aa   :  { %v6498_v36 = vpop.eup %6497  ;;  %v4230_v32 = vpack.c.bf16 %v4178_v19, %v4176_v56  ;;  %v4172_v55 = vmul.f32 %v6496_v2, %v4132_v57  ;;  %v6086_v19 = vld [vmem:[%s8383_s1 + $0x1b8] sm:$0xff]  }
 0x5ab   :  { %v4173_v14 = vmul.f32 %v6498_v36, %v4133_v50  ;;  %v4229_v5 = vpack.c.bf16 %v4177_v17, %v4175_v18  ;;  %v6500_v34 = vpop.eup %6499 }
 0x5ac   :  { %4243 = vmatprep.subr.bf16.mxu1 %v4230_v32  ;;  %v4228_v63 = vpack.c.bf16 %v4174_v44, %v4172_v55  ;;  %v4171_v62 = vmul.f32 %v6500_v34, %v4131_v46 }
 0x5ad   :  { %4244 = vmatpush1.bf16.msra.mxu1 %v4229_v5  ;;  %5611 = vmatmul.mubr.msk.bf16.gmra.mxu0 %vm520_vm1, %v6081_v23 }
 0x5ae   :  { %4245 = vmatprep.subr.bf16.mxu1 %v4228_v63  ;;  %v4227_v10 = vpack.c.bf16 %v4173_v14, %v4171_v62  ;;  %1274 = vmatprep.mubr.bf16.mxu0 %v8408_v22 }
 0x5b1   :  { %4246 = vmatpush1.bf16.msra.mxu1 %v4227_v10 }
 0x5b4   :  { %5813 = vmatmul.mubr.msk.bf16.vlgmr.msra.gmra.mxu1 %vm2501_vm2, %v7588_v59  ;;  %v8413_v59 = vld [vmem:[#allocation10_spill] sm:$0xff] }
 0x5b5   :  { %4273 = vmatprep.mubr.bf16.mxu1 %v8408_v22  ;;  %5612 = vmatmul.mubr.msk.bf16.gmra.mxu0 %vm520_vm1, %v6082_v29 }
 0x5b6   :  { %1284 = vmatprep.mubr.bf16.mxu0 %v8408_v22 }
 0x5bc   :  { %5814 = vmatmul.mubr.msk.bf16.gmra.mxu1 %vm2501_vm2, %v7596_v42  ;;  %v8414_v42 = vld [vmem:[#allocation11_spill] sm:$0xff] }
 0x5bd   :  { %4283 = vmatprep.mubr.bf16.mxu1 %v8408_v22  ;;  %5613 = vmatmul.mubr.msk.bf16.gmra.mxu0 %vm520_vm1, %v6083_v7 }
 0x5be   :  { %1294 = vmatprep.mubr.bf16.mxu0 %v8408_v22 }
 0x5c4   :  { %5815 = vmatmul.mubr.msk.bf16.gmra.mxu1 %vm2501_vm2, %v7604_v40  ;;  %v1166_v40 = vpop.f32.mrf.mxu0 }
 0x5c5   :  { %4293 = vmatprep.mubr.bf16.mxu1 %v8408_v22  ;;  %5614 = vmatmul.mubr.msk.bf16.gmra.mxu0 %vm520_vm1, %v6084_v28 }
 0x5c6   :  { %1304 = vmatprep.mubr.bf16.mxu0 %v8408_v22 }
 0x5cc   :  { %5816 = vmatmul.mubr.msk.bf16.gmra.mxu1 %vm2501_vm2, %v7612_v12  ;;  %v1168_v12 = vpop.f32.mrf.mxu0 }
 0x5cd   :  { %4303 = vmatprep.mubr.bf16.mxu1 %v8408_v22  ;;  %5615 = vmatmul.mubr.msk.bf16.gmra.mxu0 %vm520_vm1, %v6085_v33  ;;  %v5925_v50 = vpack.c.bf16 %v1168_v12, %v1166_v40 }
 0x5ce   :  { %1314 = vmatprep.mubr.bf16.mxu0 %v8408_v22 }
 0x5cf   :  { %v4195_v46 = vunpack.c.l.bf16 %v5925_v50  ;;  %v4196_v55 = vunpack.c.h.bf16 %v5925_v50 }
 0x5d4   :  { %5817 = vmatmul.mubr.msk.bf16.gmra.mxu1 %vm2501_vm2, %v7620_v13  ;;  %v1170_v13 = vpop.f32.mrf.mxu0 }
 0x5d5   :  { %4313 = vmatprep.mubr.bf16.mxu1 %v8408_v22  ;;  %5616 = vmatmul.mubr.msk.bf16.gmra.mxu0 %vm520_vm1, %v6086_v19 }
 0x5d6   :  { %v1172_v8 = vpop.f32.mrf.mxu0  ;;  %1324 = vmatprep.mubr.bf16.mxu0 %v8408_v22 }
 0x5d7   :  { %v5926_v44 = vpack.c.bf16 %v1172_v8, %v1170_v13 }
 0x5d8   :  { %v1176_v58 = vpop.f32.mrf.mxu0 }
 0x5d9   :  { %v4197_v34 = vunpack.c.l.bf16 %v5926_v44  ;;  %v4198_v40 = vunpack.c.h.bf16 %v5926_v44 }
 0x5da   :  { %v1178_v20 = vpop.f32.mrf.mxu0 }
 0x5db   :  { %v5927_v2 = vpack.c.bf16 %v1178_v20, %v1176_v58 }
 0x5dc   :  { %5818 = vmatmul.mubr.msk.bf16.gmra.mxu1 %vm2501_vm2, %v7628_v21  ;;  %v1180_v54 = vpop.f32.mrf.mxu0 }
 0x5dd   :  { %4323 = vmatprep.mubr.bf16.mxu1 %v8408_v22  ;;  %v4199_v62 = vunpack.c.l.bf16 %v5927_v2  ;;  %v4200_v58 = vunpack.c.h.bf16 %v5927_v2 }
 0x5de   :  { %v1182_v21 = vpop.f32.mrf.mxu0 }
 0x5df   :  { %v5928_v14 = vpack.c.bf16 %v1182_v21, %v1180_v54 }
 0x5e0   :  { %v1186_v41 = vpop.f32.mrf.mxu0 }
 0x5e1   :  { %v4201_v27 = vunpack.c.l.bf16 %v5928_v14  ;;  %v4202_v28 = vunpack.c.h.bf16 %v5928_v14 }
 0x5e2   :  { %v1188_v25 = vpop.f32.mrf.mxu0 }
 0x5e3   :  { %v5929_v63 = vpack.c.bf16 %v1188_v25, %v1186_v41 }
 0x5e4   :  { %5819 = vmatmul.mubr.msk.bf16.gmra.mxu1 %vm2501_vm2, %v8413_v59  ;;  %v7827_v1 = vpop.f32.mrf.mxu0 }
 0x5e5   :  { %4333 = vmatprep.mubr.bf16.mxu1 %v8408_v22  ;;  %v4203_v23 = vunpack.c.l.bf16 %v5929_v63 }
 0x5e6   :  { %v1192_v30 = vpop.f32.mrf.mxu0 }
 0x5e7   :  { %v5930_v20 = vpack.c.bf16 %v1192_v30, %v7827_v1 }
 0x5e8   :  { %v7831_v15 = vpop.f32.mrf.mxu0 }
 0x5e9   :  { %v4206_v30 = vunpack.c.h.bf16 %v5930_v20 }
 0x5ea   :  { %v1198_v37 = vpop.f32.mrf.mxu0 }
 0x5eb   :  { %v5931_v21 = vpack.c.bf16 %v1198_v37, %v7831_v15 }
 0x5ec   :  { %5820 = vmatmul.mubr.msk.bf16.gmra.mxu1 %vm2501_vm2, %v8414_v42  ;;  %v7841_v31 = vpop.f32.mrf.mxu0 }
 0x5ed   :  { %4604 = vmatprep.mubr.bf16.mxu1 %v8408_v22  ;;  %v4208_v37 = vunpack.c.h.bf16 %v5931_v21 }
 0x5ee   :  { %v7845_v35 = vpop.f32.mrf.mxu0 }
 0x5ef   :  { %v5932_v1 = vpack.c.bf16 %v7845_v35, %v7841_v31 }
 0x5f0   :  { %v7850_v43 = vpop.f32.mrf.mxu0 }
 0x5f2   :  { %v7854_v53 = vpop.f32.mrf.mxu0 }
 0x5f4   :  { %v7859_v60 = vpop.f32.mrf.mxu0 }
 0x5f6   :  { %v7863_v26 = vpop.f32.mrf.mxu0 }
 0x5f8   :  { %v7868_v6 = vpop.f32.mrf.mxu0 }
 0x5fa   :  { %v7872_v45 = vpop.f32.mrf.mxu0 }
 0x5fc   :  { %v7877_v16 = vpop.f32.mrf.mxu0 }
 0x5fe   :  { %v7881_v49 = vpop.f32.mrf.mxu0 }
 0x600   :  { %v7886_v36 = vpop.f32.mrf.mxu0 }
 0x602   :  { %v7890_v59 = vpop.f32.mrf.mxu0 }
 0x604   :  { %v7894_v41 = vpop.f32.mrf.mxu0 }
 0x606   :  { %v1232_v44 = vpop.f32.mrf.mxu0 }
 0x674   :  { %v4265_v3 = vpop.f32.mrf.mxu1 }
 0x675   :  { %v4344_v5 = vadd.f32 %v4265_v3, %v4195_v46  ;;  %v4207_v46 = vunpack.c.l.bf16 %v5931_v21 }
 0x676   :  { %v4267_v0 = vpop.f32.mrf.mxu1 }
 0x677   :  { %v4345_v42 = vadd.f32 %v4267_v0, %v4196_v55  ;;  %v4376_v47 = vmul.f32 0.5, %v4344_v5  ;;  %v4205_v55 = vunpack.c.l.bf16 %v5930_v20 }
 0x678   :  { %v4269_v4 = vpop.f32.mrf.mxu1 }
 0x679   :  { %v4346_v12 = vadd.f32 %v4269_v4, %v4197_v34  ;;  %v4377_v25 = vmul.f32 0.5, %v4345_v42  ;;  %v4204_v4 = vunpack.c.h.bf16 %v5929_v63  ;;  %6501 = vtanh.f32 %v4376_v47 }
 0x67a   :  { %v4271_v57 = vpop.f32.mrf.mxu1  ;;  %v4209_v63 = vunpack.c.l.bf16 %v5932_v1 }
 0x67b   :  { %v4347_v8 = vadd.f32 %v4271_v57, %v4198_v40  ;;  %v4378_v3 = vmul.f32 0.5, %v4346_v12  ;;  %6503 = vtanh.f32 %v4377_v25  ;;  %v5935_v25 = vpack.c.bf16 %v7872_v45, %v7868_v6 }
 0x67c   :  { %v4275_v51 = vpop.f32.mrf.mxu1 }
 0x67d   :  { %v4348_v54 = vadd.f32 %v4275_v51, %v4199_v62  ;;  %v4379_v57 = vmul.f32 0.5, %v4347_v8  ;;  %6505 = vtanh.f32 %v4378_v3  ;;  %v1236_v62 = vpop.f32.mrf.mxu0 }
 0x67e   :  { %v4277_v17 = vpop.f32.mrf.mxu1 }
 0x67f   :  { %v4349_v7 = vadd.f32 %v4277_v17, %v4200_v58  ;;  %v4380_v51 = vmul.f32 0.5, %v4348_v54  ;;  %6507 = vtanh.f32 %v4379_v57  ;;  %v4210_v58 = vunpack.c.h.bf16 %v5932_v1  ;;  %v1238_v21 = vpop.f32.mrf.mxu0 }
 0x680   :  { %v4279_v56 = vpop.f32.mrf.mxu1  ;;  %v5936_v57 = vpack.c.bf16 %v7881_v49, %v7877_v16 }
 0x681   :  { %v4350_v0 = vadd.f32 %v4279_v56, %v4201_v27  ;;  %v4381_v2 = vmul.f32 0.5, %v4349_v7  ;;  %6509 = vtanh.f32 %v4380_v51  ;;  %v4216_v51 = vunpack.c.h.bf16 %v5935_v25 }
 0x682   :  { %v4281_v18 = vpop.f32.mrf.mxu1 }
 0x683   :  { %v4351_v50 = vadd.f32 %v4281_v18, %v4202_v28  ;;  %v4382_v56 = vmul.f32 0.5, %v4350_v0  ;;  %6511 = vtanh.f32 %v4381_v2  ;;  %v1240_v0 = vpop.f32.mrf.mxu0 }
 0x684   :  { %v4285_v32 = vpop.f32.mrf.mxu1 }
 0x685   :  { %v4352_v15 = vadd.f32 %v4285_v32, %v4203_v23  ;;  %v4383_v18 = vmul.f32 0.5, %v4351_v50  ;;  %6513 = vtanh.f32 %v4382_v56  ;;  %v5934_v23 = vpack.c.bf16 %v7863_v26, %v7859_v60 }
 0x686   :  { %v4287_v10 = vpop.f32.mrf.mxu1  ;;  %v4215_v50 = vunpack.c.l.bf16 %v5935_v25 }
 0x687   :  { %v4353_v34 = vadd.f32 %v4287_v10, %v4204_v4  ;;  %v4408_v31 = vmul.f32 0.5, %v4352_v15  ;;  %6515 = vtanh.f32 %v4383_v18  ;;  %v6502_v4 = vpop.eup %6501  ;;  %v4214_v60 = vunpack.c.h.bf16 %v5934_v23 }
 0x688   :  { %v4289_v13 = vpop.f32.mrf.mxu1  ;;  %v6504_v26 = vpop.eup %6503  ;;  %v4213_v56 = vunpack.c.l.bf16 %v5934_v23 }
 0x689   :  { %v4354_v35 = vadd.f32 %v4289_v13, %v4205_v55  ;;  %v4409_v20 = vmul.f32 0.5, %v4353_v34  ;;  %6517 = vtanh.f32 %v4408_v31 }
 0x68a   :  { %v4291_v29 = vpop.f32.mrf.mxu1  ;;  %v6506_v6 = vpop.eup %6505 }
 0x68b   :  { %v4355_v17 = vadd.f32 %v4291_v29, %v4206_v30  ;;  %v4410_v47 = vmul.f32 0.5, %v4354_v35  ;;  %v7910_v30 = vpack.c.bf16 %v7890_v59, %v7886_v36  ;;  %v7915_v36 = vpack.c.bf16 %v1238_v21, %v1236_v62 }
 0x68c   :  { %v4295_v33 = vpop.f32.mrf.mxu1  ;;  %v6508_v15 = vpop.eup %6507  ;;  %v4394_v25 = vmul.f32 0.5, %v6506_v6 }
 0x68d   :  { %v4411_v42 = vmul.f32 0.5, %v4355_v17  ;;  %v4356_v40 = vadd.f32 %v4295_v33, %v4207_v46  ;;  %v5933_v33 = vpack.c.bf16 %v7854_v53, %v7850_v43  ;;  %v7913_v43 = vpack.c.bf16 %v1232_v44, %v7894_v41  ;;  %v1242_v53 = vpop.f32.mrf.mxu0 }
 0x68e   :  { %v4297_v19 = vpop.f32.mrf.mxu1  ;;  %v6510_v16 = vpop.eup %6509  ;;  %v4217_v17 = vunpack.c.l.bf16 %v5936_v57  ;;  %v4219_v34 = vunpack.c.l.bf16 %v7910_v30  ;;  %v7918_v41 = vpack.c.bf16 %v1242_v53, %v1240_v0 }
 0x68f   :  { %v4357_v14 = vadd.f32 %v4297_v19, %v4208_v37  ;;  %6519 = vtanh.f32 %v4411_v42  ;;  %v4412_v13 = vmul.f32 0.5, %v4356_v40  ;;  %v4211_v49 = vunpack.c.l.bf16 %v5933_v33 }
 0x690   :  { %v4299_v5 = vpop.f32.mrf.mxu1  ;;  %v4212_v19 = vunpack.c.h.bf16 %v5933_v33  ;;  %v6512_v46 = vpop.eup %6511  ;;  %v4225_v23 = vunpack.c.l.bf16 %v7918_v41 }
 0x691   :  { %v4413_v12 = vmul.f32 0.5, %v4357_v14  ;;  %v4358_v8 = vadd.f32 %v4299_v5, %v4209_v63  ;;  %v4218_v5 = vunpack.c.h.bf16 %v5936_v57  ;;  %v4220_v63 = vunpack.c.h.bf16 %v7910_v30 }
 0x692   :  { %v4301_v32 = vpop.f32.mrf.mxu1  ;;  %v6514_v59 = vpop.eup %6513  ;;  %v4226_v57 = vunpack.c.h.bf16 %v7918_v41 }
 0x693   :  { %v4359_v10 = vadd.f32 %v4301_v32, %v4210_v58  ;;  %6521 = vtanh.f32 %v4413_v12  ;;  %v4414_v29 = vmul.f32 0.5, %v4358_v8  ;;  %v4221_v32 = vunpack.c.l.bf16 %v7913_v43 }
 0x694   :  { %v7898_v27 = vpop.f32.mrf.mxu1  ;;  %6523 = vtanh.f32 %v4409_v20  ;;  %v6516_v44 = vpop.eup %6515  ;;  %v4222_v12 = vunpack.c.h.bf16 %v7913_v43  ;;  %v4392_v58 = vmul.f32 0.5, %v6502_v4  ;;  %v4393_v20 = vmul.f32 0.5, %v6504_v26 }
 0x695   :  { %6525 = vtanh.f32 %v4410_v47  ;;  %v4415_v28 = vmul.f32 0.5, %v4359_v10  ;;  %v4223_v10 = vunpack.c.l.bf16 %v7915_v36  ;;  %v4360_v21 = vadd.f32 %v7898_v27, %v4211_v49 }
 0x696   :  { %v4307_v54 = vpop.f32.mrf.mxu1  ;;  %6527 = vtanh.f32 %v4412_v13  ;;  %v6518_v42 = vpop.eup %6517  ;;  %v4224_v13 = vunpack.c.h.bf16 %v7915_v36  ;;  %v4397_v4 = vmul.f32 0.5, %v6512_v46  ;;  %v7928_v26 = vadd.f32 0.5, %v4392_v58 }
 0x697   :  { %6529 = vtanh.f32 %v4414_v29  ;;  %v4361_v31 = vadd.f32 %v4307_v54, %v4212_v19  ;;  %v7930_v27 = vadd.f32 0.5, %v4393_v20  ;;  %v4399_v6 = vmul.f32 0.5, %v6516_v44 }
 0x698   :  { %v4309_v7 = vpop.f32.mrf.mxu1  ;;  %6531 = vtanh.f32 %v4415_v28  ;;  %v4396_v28 = vmul.f32 0.5, %v6510_v16  ;;  %v7932_v43 = vadd.f32 0.5, %v4394_v25 }
 0x699   :  { %v4362_v40 = vadd.f32 %v4309_v7, %v4213_v56  ;;  %v4395_v7 = vmul.f32 0.5, %v6508_v15  ;;  %v4424_v15 = vmul.f32 0.5, %v6518_v42  ;;  %v4407_v44 = vadd.f32 0.5, %v4399_v6 }
 0x69a   :  { %v4311_v3 = vpop.f32.mrf.mxu1  ;;  %v4404_v16 = vadd.f32 0.5, %v4396_v28 }
 0x69b   :  { %v4363_v45 = vadd.f32 %v4311_v3, %v4214_v60  ;;  %v4403_v53 = vadd.f32 0.5, %v4395_v7 }
 0x69c   :  { %v4315_v1 = vpop.f32.mrf.mxu1  ;;  %v6520_v8 = vpop.eup %6519 }
 0x69d   :  { %v4364_v55 = vadd.f32 %v4315_v1, %v4215_v50  ;;  %6533 = vtanh.f32 %v4363_v45  ;;  %v4427_v33 = vmul.f32 0.5, %v6520_v8  ;;  %v4398_v50 = vmul.f32 0.5, %v6514_v59 }
 0x69e   :  { %v4317_v37 = vpop.f32.mrf.mxu1 }
 0x69f   :  { %v4365_v2 = vadd.f32 %v4317_v37, %v4216_v51  ;;  %v4435_v56 = vadd.f32 0.5, %v4427_v33 }
 0x6a0   :  { %v4319_v14 = vpop.f32.mrf.mxu1  ;;  %v6522_v54 = vpop.eup %6521 }
 0x6a1   :  { %v4366_v18 = vadd.f32 %v4319_v14, %v4217_v17  ;;  %6535 = vtanh.f32 %v4365_v2  ;;  %v6524_v29 = vpop.eup %6523  ;;  %v4429_v1 = vmul.f32 0.5, %v6522_v54  ;;  %v4405_v17 = vadd.f32 0.5, %v4397_v4 }
 0x6a2   :  { %v4321_v35 = vpop.f32.mrf.mxu1  ;;  %v6526_v0 = vpop.eup %6525  ;;  %v4425_v49 = vmul.f32 0.5, %v6524_v29  ;;  %v4406_v14 = vadd.f32 0.5, %v4398_v50 }
 0x6a3   :  { %6537 = vtanh.f32 %v4366_v18  ;;  %v4367_v62 = vadd.f32 %v4321_v35, %v4218_v5  ;;  %v6528_v60 = vpop.eup %6527  ;;  %v4426_v46 = vmul.f32 0.5, %v6526_v0  ;;  %v4437_v36 = vadd.f32 0.5, %v4429_v1 }
 0x6a4   :  { %6539 = vtanh.f32 %v4364_v55  ;;  %v4325_v47 = vpop.f32.mrf.mxu1  ;;  %v6530_v51 = vpop.eup %6529  ;;  %v4428_v5 = vmul.f32 0.5, %v6528_v60 }
 0x6a5   :  { %6541 = vtanh.f32 %v4367_v62  ;;  %v6532_v2 = vpop.eup %6531  ;;  %v4430_v59 = vmul.f32 0.5, %v6530_v51  ;;  %v4368_v29 = vadd.f32 %v4325_v47, %v4219_v34 }
 0x6a6   :  { %6543 = vtanh.f32 %v4361_v31  ;;  %v4327_v3 = vpop.f32.mrf.mxu1  ;;  %v7934_v31 = vadd.f32 0.5, %v4424_v15  ;;  %v4431_v62 = vmul.f32 0.5, %v6532_v2  ;;  %v4436_v28 = vadd.f32 0.5, %v4428_v5 }
 0x6a7   :  { %6545 = vtanh.f32 %v4362_v40  ;;  %v4369_v37 = vadd.f32 %v4327_v3, %v4220_v63  ;;  %v4433_v40 = vadd.f32 0.5, %v4425_v49  ;;  %v4485_v3 = vmul.f32 %v4437_v36, %v7772_v24 }
 0x6a8   :  { %v4329_v45 = vpop.f32.mrf.mxu1  ;;  %6547 = vtanh.f32 %v4360_v21  ;;  %v4434_v21 = vadd.f32 0.5, %v4426_v46  ;;  %v4438_v0 = vadd.f32 0.5, %v4430_v59  ;;  %v4484_v41 = vmul.f32 %v4436_v28, %v7783_v48 }
 0x6a9   :  { %v4449_v35 = vmul.f32 0.5, %v4369_v37  ;;  %v4370_v63 = vadd.f32 %v4329_v45, %v4221_v32  ;;  %v4439_v45 = vadd.f32 0.5, %v4431_v62  ;;  %v4480_v48 = vmul.f32 %v7934_v31, %v7794_v9 }
 0x6aa   :  { %v4331_v19 = vpop.f32.mrf.mxu1  ;;  %v6534_v42 = vpop.eup %6533  ;;  %v4486_v15 = vmul.f32 %v4438_v0, %v7776_v39 }
 0x6ab   :  { %v4371_v55 = vadd.f32 %v4331_v19, %v4222_v12  ;;  %v4483_v12 = vmul.f32 %v4435_v56, %v7769_v11  ;;  %v4491_v60 = vmul.f32 %v6534_v42, %v4403_v53  ;;  %6549 = vtanh.f32 %v4449_v35 }
 0x6ac   :  { %v4335_v18 = vpop.f32.mrf.mxu1 }
 0x6ad   :  { %v4451_v8 = vmul.f32 0.5, %v4371_v55  ;;  %v4372_v58 = vadd.f32 %v4335_v18, %v4223_v10  ;;  %v4450_v10 = vmul.f32 0.5, %v4370_v63  ;;  %v7945_v49 = vadd.f32 %v4491_v60, %v4483_v12 }
 0x6ae   :  { %v4337_v20 = vpop.f32.mrf.mxu1  ;;  %v6536_v54 = vpop.eup %6535  ;;  %v4481_v55 = vmul.f32 %v4433_v40, %v7786_v38 }
 0x6af   :  { %v4373_v25 = vadd.f32 %v4337_v20, %v4224_v13  ;;  %v4452_v32 = vmul.f32 0.5, %v4372_v58  ;;  %v4493_v51 = vmul.f32 %v6536_v54, %v4405_v17  ;;  %6551 = vtanh.f32 %v4451_v8 }
 0x6b0   :  { %v6538_v7 = vpop.eup %6537  ;;  %v4339_v4 = vpop.f32.mrf.mxu1  ;;  %v4448_v13 = vmul.f32 0.5, %v4368_v29  ;;  %v4487_v17 = vmul.f32 %v4439_v45, %v7779_v52 }
 0x6b1   :  { %v6540_v33 = vpop.eup %6539  ;;  %v4453_v50 = vmul.f32 0.5, %v4373_v25  ;;  %v4374_v11 = vadd.f32 %v4339_v4, %v4225_v23  ;;  %v4494_v47 = vmul.f32 %v6538_v7, %v4406_v14  ;;  %6553 = vtanh.f32 %v4452_v32 }
 0x6b2   :  { %v6542_v1 = vpop.eup %6541  ;;  %v4341_v30 = vpop.f32.mrf.mxu1  ;;  %v4492_v19 = vmul.f32 %v6540_v33, %v4404_v16  ;;  %v7949_v56 = vadd.f32 %v4493_v51, %v4485_v3  ;;  %v4482_v14 = vmul.f32 %v4434_v21, %v7790_v61 }
 0x6b3   :  { %v6544_v34 = vpop.eup %6543  ;;  %v4375_v24 = vadd.f32 %v4341_v30, %v4226_v57  ;;  %v4495_v37 = vmul.f32 %v6542_v1, %v4407_v44  ;;  %6555 = vtanh.f32 %v4453_v50  ;;  %v4454_v53 = vmul.f32 0.5, %v4374_v11 }
 0x6b4   :  { %v6546_v6 = vpop.eup %6545  ;;  %6557 = vtanh.f32 %v4450_v10  ;;  %v4489_v46 = vmul.f32 %v6544_v34, %v7930_v27  ;;  %v7953_v57 = vadd.f32 %v4494_v47, %v4486_v15  ;;  %v7961_v27 = vadd.f32 %v4492_v19, %v4484_v41  ;;  %v7981_v19 = vld [vmem:[%s8384_s2] sm:$0xff]   ;;  %v8021_v41 = vld [vmem:[%s8384_s2 + $0x28] sm:$0xff]  }
 0x6b5   :  { %v4455_v2 = vmul.f32 0.5, %v4375_v24  ;;  %v6548_v23 = vpop.eup %6547  ;;  %6559 = vtanh.f32 %v4454_v53  ;;  %v4490_v39 = vmul.f32 %v6546_v6, %v7932_v43  ;;  %v7956_v16 = vadd.f32 %v4495_v37, %v4487_v17  ;;  %v8005_v17 = vld [vmem:[%s8384_s2 + $0x18] sm:$0xff]   ;;  %8415 = vst [vmem:[#allocation10_spill] sm:$0xff] %v8021_v41 }
 0x6b6   :  { %6561 = vtanh.f32 %v4448_v13  ;;  %v4488_v52 = vmul.f32 %v6548_v23, %v7928_v26  ;;  %v7963_v5 = vadd.f32 %v4489_v46, %v4481_v55  ;;  %v7997_v23 = vld [vmem:[%s8384_s2 + $0x10] sm:$0xff]   ;;  %v8013_v46 = vld [vmem:[%s8384_s2 + $0x20] sm:$0xff]   ;;  %v8037_v55 = vld [vmem:[%s8384_s2 + $0x38] sm:$0xff]  }
 0x6b7   :  { %6563 = vtanh.f32 %v4455_v2  ;;  %v7968_v43 = vadd.f32 %v4490_v39, %v4482_v14  ;;  %v7989_v2 = vld [vmem:[%s8384_s2 + $0x8] sm:$0xff]   ;;  %v8029_v39 = vld [vmem:[%s8384_s2 + $0x30] sm:$0xff]   ;;  %8417 = vst [vmem:[#allocation12_spill] sm:$0xff] %v8037_v55  ;;  %v1246_v14 = vpop.f32.mrf.mxu0 }
 0x6b8   :  { %6565 = vtanh.f32 %v7945_v49  ;;  %v7972_v38 = vadd.f32 %v4488_v52, %v4480_v48  ;;  %v6550_v61 = vpop.eup %6549  ;;  %8416 = vst [vmem:[#allocation11_spill] sm:$0xff] %v8029_v39 }
 0x6b9   :  { %6567 = vtanh.f32 %v7949_v56  ;;  %v4465_v42 = vmul.f32 0.5, %v6550_v61  ;;  %v1248_v52 = vpop.f32.mrf.mxu0 }
 0x6ba   :  { %6569 = vtanh.f32 %v7953_v57 }
 0x6bb   :  { %6571 = vtanh.f32 %v7956_v16  ;;  %v4473_v3 = vadd.f32 0.5, %v4465_v42  ;;  %v1250_v48 = vpop.f32.mrf.mxu0 }
 0x6bc   :  { %6573 = vtanh.f32 %v7961_v27  ;;  %v6552_v26 = vpop.eup %6551 }
 0x6bd   :  { %6575 = vtanh.f32 %v7963_v5  ;;  %v4467_v18 = vmul.f32 0.5, %v6552_v26  ;;  %v1252_v61 = vpop.f32.mrf.mxu0 }
 0x6be   :  { %6577 = vtanh.f32 %v7968_v43  ;;  %v6554_v36 = vpop.eup %6553 }
 0x6bf   :  { %6579 = vtanh.f32 %v7972_v38  ;;  %v4468_v35 = vmul.f32 0.5, %v6554_v36  ;;  %v4475_v20 = vadd.f32 0.5, %v4467_v18  ;;  %v1256_v26 = vpop.f32.mrf.mxu0 }
 0x6c0   :  { %v6556_v59 = vpop.eup %6555 }
 0x6c1   :  { %v6558_v9 = vpop.eup %6557  ;;  %v4469_v44 = vmul.f32 0.5, %v6556_v59  ;;  %v4476_v7 = vadd.f32 0.5, %v4468_v35  ;;  %v1258_v36 = vpop.f32.mrf.mxu0 }
 0x6c2   :  { %v6560_v31 = vpop.eup %6559  ;;  %v4466_v8 = vmul.f32 0.5, %v6558_v9 }
 0x6c3   :  { %v6562_v63 = vpop.eup %6561  ;;  %v4470_v40 = vmul.f32 0.5, %v6560_v31  ;;  %v4477_v54 = vadd.f32 0.5, %v4469_v44  ;;  %v1260_v59 = vpop.f32.mrf.mxu0  ;;  %v6087_v31 = vld [vmem:[%s8383_s1 + $0x1c0] sm:$0xff]  }
 0x6c4   :  { %v6564_v62 = vpop.eup %6563  ;;  %v4464_v25 = vmul.f32 0.5, %v6562_v63  ;;  %v4474_v4 = vadd.f32 0.5, %v4466_v8  ;;  %5617 = vmatmul.mubr.msk.bf16.gmra.mxu0 %vm520_vm1, %v6087_v31  ;;  %v6089_v8 = vld [vmem:[%s8383_s1 + $0x1d0] sm:$0xff]  }
 0x6c5   :  { %v6566_v58 = vpop.eup %6565  ;;  %v4478_v21 = vadd.f32 0.5, %v4470_v40  ;;  %v4471_v12 = vmul.f32 0.5, %v6564_v62  ;;  %v1262_v9 = vpop.f32.mrf.mxu0  ;;  %1334 = vmatprep.mubr.bf16.mxu0 %v8408_v22  ;;  %v6088_v40 = vld [vmem:[%s8383_s1 + $0x1c8] sm:$0xff]  }
 0x6c6   :  { %v6568_v29 = vpop.eup %6567  ;;  %v4515_v1 = vmul.f32 %v6566_v58, %v4475_v20  ;;  %v4472_v51 = vadd.f32 0.5, %v4464_v25  ;;  %v5944_v31 = vpack.c.bf16 %v1262_v9, %v1260_v59 }
 0x6c7   :  { %v6570_v28 = vpop.eup %6569  ;;  %v4479_v0 = vadd.f32 0.5, %v4471_v12  ;;  %v4517_v10 = vmul.f32 %v6568_v29, %v4477_v54  ;;  %v1266_v18 = vpop.f32.mrf.mxu0  ;;  %v6090_v54 = vld [vmem:[%s8383_s1 + $0x1d8] sm:$0xff]   ;;  %v6091_v29 = vld [vmem:[%s8383_s1 + $0x1e0] sm:$0xff]  }
 0x6c8   :  { %v6572_v32 = vpop.eup %6571  ;;  %v4518_v33 = vmul.f32 %v6570_v28, %v4478_v21  ;;  %v6092_v28 = vld [vmem:[%s8383_s1 + $0x1e8] sm:$0xff]  }
 0x6c9   :  { %v6574_v60 = vpop.eup %6573  ;;  %v4519_v50 = vmul.f32 %v6572_v32, %v4479_v0  ;;  %v1268_v44 = vpop.f32.mrf.mxu0 }
 0x6ca   :  { %v6576_v45 = vpop.eup %6575  ;;  %v4516_v11 = vmul.f32 %v6574_v60, %v4476_v7  ;;  %v6093_v60 = vld [vmem:[%s8383_s1 + $0x1f0] sm:$0xff]  }
 0x6cb   :  { %v6578_v30 = vpop.eup %6577  ;;  %v4571_v34 = vpack.c.bf16 %v4519_v50, %v4517_v10  ;;  %v4513_v47 = vmul.f32 %v6576_v45, %v4473_v3  ;;  %v8045_v35 = vpop.f32.mrf.mxu0  ;;  %v5941_v45 = vpack.c.bf16 %v1248_v52, %v1246_v14 }
 0x6cc   :  { %v4514_v13 = vmul.f32 %v6578_v30, %v4474_v4  ;;  %v4570_v24 = vpack.c.bf16 %v4518_v33, %v4516_v11  ;;  %v6580_v6 = vpop.eup %6579  ;;  %5618 = vmatmul.mubr.msk.bf16.gmra.mxu0 %vm520_vm1, %v6088_v40  ;;  %v5945_v40 = vpack.c.bf16 %v1268_v44, %v1266_v18 }
 0x6cd   :  { %4584 = vmatprep.subr.bf16.mxu1 %v4571_v34  ;;  %v4569_v15 = vpack.c.bf16 %v4515_v1, %v4513_v47  ;;  %v4512_v37 = vmul.f32 %v6580_v6, %v4472_v51  ;;  %v1272_v63 = vpop.f32.mrf.mxu0  ;;  %1344 = vmatprep.mubr.bf16.mxu0 %v8408_v22  ;;  %v6094_v34 = vld [vmem:[%s8383_s1 + $0x1f8] sm:$0xff]   ;;  %v5942_v47 = vpack.c.bf16 %v1252_v61, %v1250_v48 }
 0x6ce   :  { %4585 = vmatpush1.bf16.msra.mxu1 %v4570_v24  ;;  %v4536_v24 = vunpack.c.l.bf16 %v5941_v45 }
 0x6cf   :  { %4586 = vmatprep.subr.bf16.mxu1 %v4569_v15  ;;  %v4568_v53 = vpack.c.bf16 %v4514_v13, %v4512_v37  ;;  %v8049_v42 = vpop.f32.mrf.mxu0  ;;  %v5943_v13 = vpack.c.bf16 %v1258_v36, %v1256_v26  ;;  %v4538_v52 = vunpack.c.l.bf16 %v5942_v47  ;;  %v4539_v61 = vunpack.c.h.bf16 %v5942_v47 }
 0x6d1   :  { %v1278_v62 = vpop.f32.mrf.mxu0 }
 0x6d2   :  { %4587 = vmatpush1.bf16.msra.mxu1 %v4568_v53  ;;  %v4537_v53 = vunpack.c.h.bf16 %v5941_v45  ;;  %v5947_v9 = vpack.c.bf16 %v1278_v62, %v8049_v42 }
 0x6d3   :  { %v8059_v58 = vpop.f32.mrf.mxu0 }
 0x6d4   :  { %5619 = vmatmul.mubr.msk.bf16.gmra.mxu0 %vm520_vm1, %v6089_v8  ;;  %v4540_v8 = vunpack.c.l.bf16 %v5943_v13  ;;  %v4549_v62 = vunpack.c.h.bf16 %v5947_v9 }
 0x6d5   :  { %5821 = vmatmul.mubr.msk.bf16.vlgmr.msra.gmra.mxu1 %vm2501_vm2, %v7981_v19  ;;  %1354 = vmatprep.mubr.bf16.mxu0 %v8408_v22  ;;  %v8063_v20 = vpop.f32.mrf.mxu0 }
 0x6d6   :  { %4614 = vmatprep.mubr.bf16.mxu1 %v8408_v22 }
 0x6d7   :  { %v8068_v21 = vpop.f32.mrf.mxu0 }
 0x6d9   :  { %v8072_v12 = vpop.f32.mrf.mxu0 }
 0x6db   :  { %v8077_v25 = vpop.f32.mrf.mxu0 }
 0x6dc   :  { %5620 = vmatmul.mubr.msk.bf16.gmra.mxu0 %vm520_vm1, %v6090_v54 }
 0x6dd   :  { %5822 = vmatmul.mubr.msk.bf16.gmra.mxu1 %vm2501_vm2, %v7989_v2  ;;  %1364 = vmatprep.mubr.bf16.mxu0 %v8408_v22  ;;  %v8081_v7 = vpop.f32.mrf.mxu0 }
 0x6de   :  { %4624 = vmatprep.mubr.bf16.mxu1 %v8408_v22 }
 0x6df   :  { %v8086_v3 = vpop.f32.mrf.mxu0 }
 0x6e1   :  { %v8090_v4 = vpop.f32.mrf.mxu0 }
 0x6e3   :  { %v8095_v50 = vpop.f32.mrf.mxu0 }
 0x6e4   :  { %5621 = vmatmul.mubr.msk.bf16.gmra.mxu0 %vm520_vm1, %v6091_v29 }
 0x6e5   :  { %5823 = vmatmul.mubr.msk.bf16.gmra.mxu1 %vm2501_vm2, %v7997_v23  ;;  %1374 = vmatprep.mubr.bf16.mxu0 %v8408_v22  ;;  %v8099_v11 = vpop.f32.mrf.mxu0 }
 0x6e6   :  { %4634 = vmatprep.mubr.bf16.mxu1 %v8408_v22 }
 0x6e7   :  { %v8104_v15 = vpop.f32.mrf.mxu0 }
 0x6e9   :  { %v8108_v29 = vpop.f32.mrf.mxu0 }
 0x6eb   :  { %v8112_v18 = vpop.f32.mrf.mxu0 }
 0x6ec   :  { %5622 = vmatmul.mubr.msk.bf16.gmra.mxu0 %vm520_vm1, %v6092_v28 }
 0x6ed   :  { %5824 = vmatmul.mubr.msk.bf16.gmra.mxu1 %vm2501_vm2, %v8005_v17  ;;  %1384 = vmatprep.mubr.bf16.mxu0 %v8408_v22 }
 0x6ee   :  { %4644 = vmatprep.mubr.bf16.mxu1 %v8408_v22 }
 0x6f4   :  { %5623 = vmatmul.mubr.msk.bf16.gmra.mxu0 %vm520_vm1, %v6093_v60  ;;  %v4541_v60 = vunpack.c.h.bf16 %v5943_v13 }
 0x6f5   :  { %5825 = vmatmul.mubr.msk.bf16.gmra.mxu1 %vm2501_vm2, %v8013_v46  ;;  %1394 = vmatprep.mubr.bf16.mxu0 %v8408_v22 }
 0x6f6   :  { %4654 = vmatprep.mubr.bf16.mxu1 %v8408_v22 }
 0x6fc   :  { %5624 = vmatmul.mubr.msk.bf16.gmra.mxu0 %vm520_vm1, %v6094_v34  ;;  %v4542_v34 = vunpack.c.l.bf16 %v5944_v31 }
 0x6fd   :  { %5826 = vmatmul.mubr.msk.bf16.gmra.mxu1 %vm2501_vm2, %v8021_v41  ;;  %1404 = vmatprep.mubr.bf16.mxu0 %v8408_v22  ;;  %v4543_v41 = vunpack.c.h.bf16 %v5944_v31  ;;  %v4548_v31 = vunpack.c.l.bf16 %v5947_v9 }
 0x6fe   :  { %4664 = vmatprep.mubr.bf16.mxu1 %v8408_v22 }
 0x705   :  { %5827 = vmatmul.mubr.msk.bf16.gmra.mxu1 %vm2501_vm2, %v8029_v39 }
 0x706   :  { %4674 = vmatprep.mubr.bf16.mxu1 %v8408_v22 }
 0x70d   :  { %5828 = vmatmul.mubr.msk.bf16.gmra.mxu1 %vm2501_vm2, %v8037_v55  ;;  %v5946_v55 = vpack.c.bf16 %v1272_v63, %v8045_v35  ;;  %v5948_v35 = vpack.c.bf16 %v8063_v20, %v8059_v58 }
 0x70e   :  { %4945 = vmatprep.mubr.bf16.mxu1 %v8408_v22 }
 0x70f   :  { %v4547_v63 = vunpack.c.h.bf16 %v5946_v55 }
 0x795   :  { %v4606_v0 = vpop.f32.mrf.mxu1 }
 0x796   :  { %v4685_v14 = vadd.f32 %v4606_v0, %v4536_v24  ;;  %v4544_v0 = vunpack.c.l.bf16 %v5945_v40 }
 0x797   :  { %v4608_v32 = vpop.f32.mrf.mxu1 }
 0x798   :  { %v4686_v48 = vadd.f32 %v4608_v32, %v4537_v53  ;;  %v4717_v45 = vmul.f32 0.5, %v4685_v14 }
 0x799   :  { %v4610_v33 = vpop.f32.mrf.mxu1 }
 0x79a   :  { %v4687_v26 = vadd.f32 %v4610_v33, %v4538_v52  ;;  %v4718_v44 = vmul.f32 0.5, %v4686_v48  ;;  %v4545_v33 = vunpack.c.h.bf16 %v5945_v40  ;;  %6581 = vtanh.f32 %v4717_v45  ;;  %v1312_v52 = vpop.f32.mrf.mxu0 }
 0x79b   :  { %v4612_v10 = vpop.f32.mrf.mxu1  ;;  %v4546_v40 = vunpack.c.l.bf16 %v5946_v55 }
 0x79c   :  { %v4688_v28 = vadd.f32 %v4612_v10, %v4539_v61  ;;  %v4719_v32 = vmul.f32 0.5, %v4687_v26  ;;  %6583 = vtanh.f32 %v4718_v44  ;;  %v4550_v26 = vunpack.c.l.bf16 %v5948_v35 }
 0x79d   :  { %v4616_v1 = vpop.f32.mrf.mxu1 }
 0x79e   :  { %v4689_v59 = vadd.f32 %v4616_v1, %v4540_v8  ;;  %v4720_v10 = vmul.f32 0.5, %v4688_v28  ;;  %6585 = vtanh.f32 %v4719_v32  ;;  %v1316_v28 = vpop.f32.mrf.mxu0  ;;  %v5950_v32 = vpack.c.bf16 %v8081_v7, %v8077_v25 }
 0x79f   :  { %v4618_v51 = vpop.f32.mrf.mxu1 }
 0x7a0   :  { %v4690_v39 = vadd.f32 %v4618_v51, %v4541_v60  ;;  %v4721_v1 = vmul.f32 0.5, %v4689_v59  ;;  %6587 = vtanh.f32 %v4720_v10  ;;  %v4551_v59 = vunpack.c.h.bf16 %v5948_v35  ;;  %v1318_v44 = vpop.f32.mrf.mxu0 }
 0x7a1   :  { %v4620_v30 = vpop.f32.mrf.mxu1  ;;  %v4555_v25 = vunpack.c.h.bf16 %v5950_v32 }
 0x7a2   :  { %v4691_v47 = vadd.f32 %v4620_v30, %v4542_v34  ;;  %v4722_v8 = vmul.f32 0.5, %v4690_v39  ;;  %6589 = vtanh.f32 %v4721_v1  ;;  %v1320_v35 = vpop.f32.mrf.mxu0  ;;  %v5949_v1 = vpack.c.bf16 %v8072_v12, %v8068_v21 }
 0x7a3   :  { %v4622_v6 = vpop.f32.mrf.mxu1  ;;  %v8131_v21 = vpack.c.bf16 %v1312_v52, %v8112_v18 }
 0x7a4   :  { %v4692_v13 = vadd.f32 %v4622_v6, %v4543_v41  ;;  %v4723_v30 = vmul.f32 0.5, %v4691_v47  ;;  %6591 = vtanh.f32 %v4722_v8  ;;  %v8128_v8 = vpack.c.bf16 %v8108_v29, %v8104_v15  ;;  %v1322_v12 = vpop.f32.mrf.mxu0 }
 0x7a5   :  { %v4626_v37 = vpop.f32.mrf.mxu1  ;;  %v8133_v15 = vpack.c.bf16 %v1318_v44, %v1316_v28  ;;  %v8136_v18 = vpack.c.bf16 %v1322_v12, %v1320_v35 }
 0x7a6   :  { %v4693_v42 = vadd.f32 %v4626_v37, %v4544_v0  ;;  %v4724_v41 = vmul.f32 0.5, %v4692_v13  ;;  %6593 = vtanh.f32 %v4723_v30 }
 0x7a7   :  { %v4628_v54 = vpop.f32.mrf.mxu1  ;;  %v4566_v35 = vunpack.c.l.bf16 %v8136_v18 }
 0x7a8   :  { %v4694_v6 = vadd.f32 %v4628_v54, %v4545_v33  ;;  %v4749_v58 = vmul.f32 0.5, %v4693_v42  ;;  %6595 = vtanh.f32 %v4724_v41  ;;  %v5951_v33 = vpack.c.bf16 %v8090_v4, %v8086_v3 }
 0x7a9   :  { %v4630_v36 = vpop.f32.mrf.mxu1  ;;  %v5952_v42 = vpack.c.bf16 %v8099_v11, %v8095_v50  ;;  %v4552_v11 = vunpack.c.l.bf16 %v5949_v1 }
 0x7aa   :  { %v4695_v20 = vadd.f32 %v4630_v36, %v4546_v40  ;;  %v4750_v55 = vmul.f32 0.5, %v4694_v6  ;;  %6597 = vtanh.f32 %v4749_v58  ;;  %v4553_v40 = vunpack.c.h.bf16 %v5949_v1 }
 0x7ab   :  { %v4632_v24 = vpop.f32.mrf.mxu1  ;;  %v4554_v6 = vunpack.c.l.bf16 %v5950_v32 }
 0x7ac   :  { %v4696_v51 = vadd.f32 %v4632_v24, %v4547_v63  ;;  %v4751_v0 = vmul.f32 0.5, %v4695_v20  ;;  %v6582_v63 = vpop.eup %6581 }
 0x7ad   :  { %v4636_v53 = vpop.f32.mrf.mxu1  ;;  %v6584_v7 = vpop.eup %6583 }
 0x7ae   :  { %v4752_v60 = vmul.f32 0.5, %v4696_v51  ;;  %v4697_v34 = vadd.f32 %v4636_v53, %v4548_v31  ;;  %v6586_v3 = vpop.eup %6585  ;;  %v4557_v51 = vunpack.c.h.bf16 %v5951_v33  ;;  %v4734_v32 = vmul.f32 0.5, %v6584_v7 }
 0x7af   :  { %v4638_v14 = vpop.f32.mrf.mxu1  ;;  %v6588_v31 = vpop.eup %6587  ;;  %v4735_v1 = vmul.f32 0.5, %v6586_v3 }
 0x7b0   :  { %v4698_v48 = vadd.f32 %v4638_v14, %v4549_v62  ;;  %6599 = vtanh.f32 %v4752_v60  ;;  %v4753_v36 = vmul.f32 0.5, %v4697_v34  ;;  %v4556_v62 = vunpack.c.l.bf16 %v5951_v33  ;;  %v6590_v50 = vpop.eup %6589 }
 0x7b1   :  { %v4640_v61 = vpop.f32.mrf.mxu1  ;;  %v6592_v41 = vpop.eup %6591  ;;  %v4560_v60 = vunpack.c.l.bf16 %v8128_v8  ;;  %v4564_v33 = vunpack.c.l.bf16 %v8133_v15 }
 0x7b2   :  { %v4754_v39 = vmul.f32 0.5, %v4698_v48  ;;  %v4699_v45 = vadd.f32 %v4640_v61, %v4550_v26  ;;  %v4558_v61 = vunpack.c.l.bf16 %v5952_v42  ;;  %v4559_v26 = vunpack.c.h.bf16 %v5952_v42 }
 0x7b3   :  { %v4642_v37 = vpop.f32.mrf.mxu1  ;;  %v6594_v29 = vpop.eup %6593  ;;  %v4736_v42 = vmul.f32 0.5, %v6588_v31  ;;  %v4738_v7 = vmul.f32 0.5, %v6592_v41 }
 0x7b4   :  { %v4700_v54 = vadd.f32 %v4642_v37, %v4551_v59  ;;  %6601 = vtanh.f32 %v4754_v39  ;;  %v4755_v47 = vmul.f32 0.5, %v4699_v45  ;;  %v4561_v45 = vunpack.c.h.bf16 %v8128_v8 }
 0x7b5   :  { %v8116_v9 = vpop.f32.mrf.mxu1  ;;  %6603 = vtanh.f32 %v4750_v55  ;;  %v6596_v52 = vpop.eup %6595  ;;  %v4562_v59 = vunpack.c.l.bf16 %v8131_v21 }
 0x7b6   :  { %6605 = vtanh.f32 %v4751_v0  ;;  %v4756_v10 = vmul.f32 0.5, %v4700_v54  ;;  %v4563_v54 = vunpack.c.h.bf16 %v8131_v21  ;;  %v4739_v21 = vmul.f32 0.5, %v6594_v29 }
 0x7b7   :  { %v4648_v24 = vpop.f32.mrf.mxu1  ;;  %6607 = vtanh.f32 %v4753_v36  ;;  %v6598_v55 = vpop.eup %6597  ;;  %v4733_v36 = vmul.f32 0.5, %v6582_v63  ;;  %v4740_v3 = vmul.f32 0.5, %v6596_v52 }
 0x7b8   :  { %6609 = vtanh.f32 %v4755_v47  ;;  %v4702_v34 = vadd.f32 %v4648_v24, %v4553_v40  ;;  %v4765_v31 = vmul.f32 0.5, %v6598_v55 }
 0x7b9   :  { %v4650_v53 = vpop.f32.mrf.mxu1  ;;  %6611 = vtanh.f32 %v4756_v10  ;;  %v4701_v10 = vadd.f32 %v8116_v9, %v4552_v11  ;;  %v8148_v9 = vadd.f32 0.5, %v4734_v32  ;;  %v4748_v52 = vadd.f32 0.5, %v4740_v3 }
 0x7ba   :  { %v4703_v0 = vadd.f32 %v4650_v53, %v4554_v6  ;;  %v8152_v55 = vadd.f32 0.5, %v4765_v31 }
 0x7bb   :  { %v4652_v13 = vpop.f32.mrf.mxu1 }
 0x7bc   :  { %v4704_v4 = vadd.f32 %v4652_v13, %v4555_v25  ;;  %v4565_v13 = vunpack.c.h.bf16 %v8133_v15  ;;  %v4737_v25 = vmul.f32 0.5, %v6590_v50 }
 0x7bd   :  { %v4656_v14 = vpop.f32.mrf.mxu1  ;;  %v6600_v44 = vpop.eup %6599 }
 0x7be   :  { %v4705_v58 = vadd.f32 %v4656_v14, %v4556_v62  ;;  %6613 = vtanh.f32 %v4704_v4  ;;  %v4768_v14 = vmul.f32 0.5, %v6600_v44  ;;  %v4567_v4 = vunpack.c.h.bf16 %v8136_v18 }
 0x7bf   :  { %v4658_v30 = vpop.f32.mrf.mxu1  ;;  %v4745_v41 = vadd.f32 0.5, %v4737_v25 }
 0x7c0   :  { %v4706_v48 = vadd.f32 %v4658_v30, %v4557_v51  ;;  %v8146_v30 = vadd.f32 0.5, %v4733_v36 }
 0x7c1   :  { %v4660_v20 = vpop.f32.mrf.mxu1  ;;  %v6602_v24 = vpop.eup %6601 }
 0x7c2   :  { %v4707_v37 = vadd.f32 %v4660_v20, %v4558_v61  ;;  %6615 = vtanh.f32 %v4706_v48  ;;  %v6604_v53 = vpop.eup %6603  ;;  %v4770_v12 = vmul.f32 0.5, %v6602_v24  ;;  %v8150_v48 = vadd.f32 0.5, %v4735_v1 }
 0x7c3   :  { %v4662_v39 = vpop.f32.mrf.mxu1  ;;  %v6606_v63 = vpop.eup %6605  ;;  %v4744_v61 = vadd.f32 0.5, %v4736_v42  ;;  %v4766_v6 = vmul.f32 0.5, %v6604_v53 }
 0x7c4   :  { %6617 = vtanh.f32 %v4707_v37  ;;  %v4708_v28 = vadd.f32 %v4662_v39, %v4559_v26  ;;  %v6608_v51 = vpop.eup %6607  ;;  %v4746_v26 = vadd.f32 0.5, %v4738_v7  ;;  %v4767_v15 = vmul.f32 0.5, %v6606_v63 }
 0x7c5   :  { %6619 = vtanh.f32 %v4705_v58  ;;  %v4666_v47 = vpop.f32.mrf.mxu1  ;;  %v6610_v40 = vpop.eup %6609  ;;  %v4776_v37 = vadd.f32 0.5, %v4768_v14  ;;  %v4747_v39 = vadd.f32 0.5, %v4739_v21  ;;  %v4769_v29 = vmul.f32 0.5, %v6608_v51 }
 0x7c6   :  { %6621 = vtanh.f32 %v4708_v28  ;;  %v6612_v20 = vpop.eup %6611  ;;  %v4771_v28 = vmul.f32 0.5, %v6610_v40  ;;  %v4774_v24 = vadd.f32 0.5, %v4766_v6  ;;  %v4709_v63 = vadd.f32 %v4666_v47, %v4560_v60 }
 0x7c7   :  { %6623 = vtanh.f32 %v4702_v34  ;;  %v4668_v62 = vpop.f32.mrf.mxu1  ;;  %v4777_v51 = vadd.f32 0.5, %v4769_v29 }
 0x7c8   :  { %6625 = vtanh.f32 %v4703_v0  ;;  %v4710_v50 = vadd.f32 %v4668_v62, %v4561_v45  ;;  %v4778_v0 = vadd.f32 0.5, %v4770_v12  ;;  %v4775_v62 = vadd.f32 0.5, %v4767_v15 }
 0x7c9   :  { %v4670_v11 = vpop.f32.mrf.mxu1  ;;  %6627 = vtanh.f32 %v4701_v10  ;;  %v4772_v10 = vmul.f32 0.5, %v6612_v20  ;;  %v4779_v12 = vadd.f32 0.5, %v4771_v28  ;;  %v4825_v18 = vmul.f32 %v4777_v51, %v7961_v27 }
 0x7ca   :  { %v4790_v45 = vmul.f32 0.5, %v4710_v50  ;;  %v4711_v36 = vadd.f32 %v4670_v11, %v4562_v59  ;;  %v4826_v21 = vmul.f32 %v4778_v0, %v7949_v56  ;;  %v4821_v27 = vmul.f32 %v8152_v55, %v7972_v38 }
 0x7cb   :  { %v4672_v58 = vpop.f32.mrf.mxu1  ;;  %v6614_v32 = vpop.eup %6613  ;;  %v4780_v6 = vadd.f32 0.5, %v4772_v10 }
 0x7cc   :  { %v4712_v34 = vadd.f32 %v4672_v58, %v4563_v54  ;;  %v4824_v54 = vmul.f32 %v4776_v37, %v7945_v49  ;;  %v4832_v3 = vmul.f32 %v6614_v32, %v4744_v61  ;;  %6629 = vtanh.f32 %v4790_v45 }
 0x7cd   :  { %v4676_v44 = vpop.f32.mrf.mxu1  ;;  %v4827_v61 = vmul.f32 %v4779_v12, %v7953_v57  ;;  %v4828_v0 = vmul.f32 %v4780_v6, %v7956_v16 }
 0x7ce   :  { %v4792_v53 = vmul.f32 0.5, %v4712_v34  ;;  %v4713_v1 = vadd.f32 %v4676_v44, %v4564_v33  ;;  %v4791_v33 = vmul.f32 0.5, %v4711_v36  ;;  %v8163_v34 = vadd.f32 %v4832_v3, %v4824_v54 }
 0x7cf   :  { %v4678_v42 = vpop.f32.mrf.mxu1  ;;  %v6616_v25 = vpop.eup %6615  ;;  %v4822_v44 = vmul.f32 %v4774_v24, %v7963_v5 }
 0x7d0   :  { %v4714_v7 = vadd.f32 %v4678_v42, %v4565_v13  ;;  %v4793_v59 = vmul.f32 0.5, %v4713_v1  ;;  %v4834_v58 = vmul.f32 %v6616_v25, %v4746_v26  ;;  %6631 = vtanh.f32 %v4792_v53 }
 0x7d1   :  { %v6618_v14 = vpop.eup %6617  ;;  %v4680_v11 = vpop.f32.mrf.mxu1  ;;  %v4789_v13 = vmul.f32 0.5, %v4709_v63 }
 0x7d2   :  { %v6620_v40 = vpop.eup %6619  ;;  %v4794_v31 = vmul.f32 0.5, %v4714_v7  ;;  %v4715_v49 = vadd.f32 %v4680_v11, %v4566_v35  ;;  %v4835_v47 = vmul.f32 %v6618_v14, %v4747_v39  ;;  %6633 = vtanh.f32 %v4793_v59 }
 0x7d3   :  { %v6622_v50 = vpop.eup %6621  ;;  %v4682_v8 = vpop.f32.mrf.mxu1  ;;  %v4833_v26 = vmul.f32 %v6620_v40, %v4745_v41  ;;  %v8167_v28 = vadd.f32 %v4834_v58, %v4826_v21 }
 0x7d4   :  { %v6624_v60 = vpop.eup %6623  ;;  %v4716_v56 = vadd.f32 %v4682_v8, %v4567_v4  ;;  %v4836_v15 = vmul.f32 %v6622_v50, %v4748_v52  ;;  %6635 = vtanh.f32 %v4794_v31  ;;  %v4795_v37 = vmul.f32 0.5, %v4715_v49 }
 0x7d5   :  { %v6626_v20 = vpop.eup %6625  ;;  %6637 = vtanh.f32 %v4791_v33  ;;  %v4830_v39 = vmul.f32 %v6624_v60, %v8148_v9  ;;  %v8171_v4 = vadd.f32 %v4835_v47, %v4827_v61  ;;  %v4823_v52 = vmul.f32 %v4775_v62, %v7968_v43 }
 0x7d6   :  { %v4796_v29 = vmul.f32 0.5, %v4716_v56  ;;  %v6628_v35 = vpop.eup %6627  ;;  %6639 = vtanh.f32 %v4795_v37  ;;  %v4831_v57 = vmul.f32 %v6626_v20, %v8150_v48  ;;  %v8174_v41 = vadd.f32 %v4836_v15, %v4828_v0 }
 0x7d7   :  { %6641 = vtanh.f32 %v4789_v13  ;;  %v4829_v16 = vmul.f32 %v6628_v35, %v8146_v30  ;;  %v8179_v9 = vadd.f32 %v4833_v26, %v4825_v18  ;;  %v8181_v45 = vadd.f32 %v4830_v39, %v4822_v44 }
 0x7d8   :  { %6643 = vtanh.f32 %v4796_v29  ;;  %v8186_v48 = vadd.f32 %v4831_v57, %v4823_v52 }
 0x7d9   :  { %6645 = vtanh.f32 %v8163_v34  ;;  %v8190_v5 = vadd.f32 %v4829_v16, %v4821_v27  ;;  %v6630_v43 = vpop.eup %6629 }
 0x7da   :  { %6647 = vtanh.f32 %v8167_v28  ;;  %v4806_v42 = vmul.f32 0.5, %v6630_v43 }
 0x7db   :  { %6649 = vtanh.f32 %v8171_v4 }
 0x7dc   :  { %6651 = vtanh.f32 %v8174_v41  ;;  %v4814_v3 = vadd.f32 0.5, %v4806_v42 }
 0x7dd   :  { %6653 = vtanh.f32 %v8179_v9  ;;  %v6632_v30 = vpop.eup %6631 }
 0x7de   :  { %6655 = vtanh.f32 %v8181_v45  ;;  %v4808_v55 = vmul.f32 0.5, %v6632_v30 }
 0x7df   :  { %6657 = vtanh.f32 %v8186_v48  ;;  %v6634_v36 = vpop.eup %6633 }
 0x7e0   :  { %6659 = vtanh.f32 %v8190_v5  ;;  %v4809_v53 = vmul.f32 0.5, %v6634_v36  ;;  %v4816_v7 = vadd.f32 0.5, %v4808_v55 }
 0x7e1   :  { %v6636_v32 = vpop.eup %6635 }
 0x7e2   :  { %v6638_v38 = vpop.eup %6637  ;;  %v4810_v24 = vmul.f32 0.5, %v6636_v32  ;;  %v4817_v11 = vadd.f32 0.5, %v4809_v53 }
 0x7e3   :  { %v6640_v10 = vpop.eup %6639  ;;  %v4807_v54 = vmul.f32 0.5, %v6638_v38  ;;  %v6095_v38 = vld [vmem:[%s8383_s1 + $0x200] sm:$0xff]  }
 0x7e4   :  { %v6642_v1 = vpop.eup %6641  ;;  %v4811_v25 = vmul.f32 0.5, %v6640_v10  ;;  %v4818_v14 = vadd.f32 0.5, %v4810_v24  ;;  %5625 = vmatmul.mubr.msk.bf16.gmra.mxu0 %vm520_vm1, %v6095_v38  ;;  %v6097_v10 = vld [vmem:[%s8383_s1 + $0x208] sm:$0xff]  }
 0x7e5   :  { %v6644_v62 = vpop.eup %6643  ;;  %v4805_v59 = vmul.f32 0.5, %v6642_v1  ;;  %v4815_v50 = vadd.f32 0.5, %v4807_v54  ;;  %1414 = vmatprep.mubr.bf16.mxu0 %v8408_v22 }
 0x7e6   :  { %v6646_v63 = vpop.eup %6645  ;;  %v4819_v51 = vadd.f32 0.5, %v4811_v25  ;;  %v4812_v21 = vmul.f32 0.5, %v6644_v62 }
 0x7e7   :  { %v6648_v12 = vpop.eup %6647  ;;  %v4856_v60 = vmul.f32 %v6646_v63, %v4816_v7  ;;  %v4813_v13 = vadd.f32 0.5, %v4805_v59  ;;  %v5359_v63 = vld [vmem:[%s8386_s4] sm:$0xff]  ;;  %v5361_v7 = vld [vmem:[%s8386_s4 + $0x10] sm:$0xff] }
 0x7e8   :  { %v6650_v40 = vpop.eup %6649  ;;  %v4820_v33 = vadd.f32 0.5, %v4812_v21  ;;  %v4858_v49 = vmul.f32 %v6648_v12, %v4818_v14  ;;  %v11_v14 = vstv %s8387_s5  ;;  %5369 = vperm.xlu0 %6014, %v5359_v63   ;;  %5379 = vperm.xlu1 %6015, %v5361_v7   ;;  %v5362_v21 = vld [vmem:[%s8386_s4 + $0x18] sm:$0xff] }
 0x7e9   :  { %v6652_v31 = vpop.eup %6651  ;;  %v4859_v6 = vmul.f32 %v6650_v40, %v4819_v51  ;;  %12 = vst [vmem:[#allocation3] sm:$0x1] %v11_v14  ;;  %v5360_v51 = vld [vmem:[%s8386_s4 + $0x8] sm:$0xff] }
 0x7ea   :  { %v6654_v58 = vpop.eup %6653  ;;  %v4860_v8 = vmul.f32 %v6652_v31, %v4820_v33  ;;  %v5364_v40 = vld [vmem:[%s8386_s4 + $0x28] sm:$0xff] }
 0x7eb   :  { %v6656_v47 = vpop.eup %6655  ;;  %v4857_v56 = vmul.f32 %v6654_v58, %v4817_v11  ;;  %v5363_v11 = vld [vmem:[%s8386_s4 + $0x20] sm:$0xff] }
 0x7ec   :  { %v6658_v20 = vpop.eup %6657  ;;  %v4912_v61 = vpack.c.bf16 %v4860_v8, %v4858_v49  ;;  %v4854_v15 = vmul.f32 %v6656_v47, %v4814_v3  ;;  %5626 = vmatmul.mubr.msk.bf16.gmra.mxu0 %vm520_vm1, %v6097_v10  ;;  %5374 = vperm.xlu0 %6014, %v5360_v51  }
 0x7ed   :  { %v4855_v37 = vmul.f32 %v6658_v20, %v4815_v50  ;;  %v4911_v26 = vpack.c.bf16 %v4859_v6, %v4857_v56  ;;  %v6660_v29 = vpop.eup %6659  ;;  %5384 = vperm.xlu1 %6015, %v5362_v21   ;;  %v5365_v50 = vld [vmem:[%s8386_s4 + $0x30] sm:$0xff]  ;;  %v5366_v6 = vld [vmem:[%s8386_s4 + $0x38] sm:$0xff] }
 0x7ee   :  { %4925 = vmatprep.subr.bf16.mxu1 %v4912_v61  ;;  %v4910_v35 = vpack.c.bf16 %v4856_v60, %v4854_v15  ;;  %v4853_v0 = vmul.f32 %v6660_v29, %v4813_v13 }
 0x7ef   :  { %4926 = vmatpush1.bf16.msra.mxu1 %v4911_v26 }
 0x7f0   :  { %4927 = vmatprep.subr.bf16.mxu1 %v4910_v35  ;;  %v4909_v39 = vpack.c.bf16 %v4855_v37, %v4853_v0  ;;  %5389 = vperm.xlu0 %6014, %v5363_v11   ;;  %v5449_v60 = vld [vmem:[#allocation3] sm:$0x1] }
 0x7f1   :  { %5394 = vperm.xlu1 %6015, %v5364_v40  }
 0x7f3   :  { %4928 = vmatpush1.bf16.msra.mxu1 %v4909_v39 }
 0x7f4   :  { %5399 = vperm.xlu0 %6014, %v5365_v50  }
 0x7f5   :  { %5404 = vperm.xlu1 %6015, %v5366_v6  }
 0x7f6   :  { %5829 = vmatmul.mubr.msk.bf16.vlgmr.msra.gmra.mxu1 %vm2501_vm2, %v7981_v19  ;;  %v8418_v19 = vld [vmem:[#allocation10_spill] sm:$0xff] }
 0x7f7   :  { %4955 = vmatprep.mubr.bf16.mxu1 %v8408_v22 }
 0x7f8   :  { %5452 = vperm.xlu0 %6014, %v5449_v60  }
 0x7fe   :  { %5830 = vmatmul.mubr.msk.bf16.gmra.mxu1 %vm2501_vm2, %v7989_v2  ;;  %v8419_v2 = vld [vmem:[#allocation11_spill] sm:$0xff] }
 0x7ff   :  { %4965 = vmatprep.mubr.bf16.mxu1 %v8408_v22 }
 0x806   :  { %5831 = vmatmul.mubr.msk.bf16.gmra.mxu1 %vm2501_vm2, %v7997_v23  ;;  %v8420_v23 = vld [vmem:[#allocation12_spill] sm:$0xff] }
 0x807   :  { %4975 = vmatprep.mubr.bf16.mxu1 %v8408_v22 }
 0x80e   :  { %5832 = vmatmul.mubr.msk.bf16.gmra.mxu1 %vm2501_vm2, %v8005_v17  ;;  %v1326_v17 = vpop.f32.mrf.mxu0 }
 0x80f   :  { %4985 = vmatprep.mubr.bf16.mxu1 %v8408_v22 }
 0x810   :  { %v1328_v18 = vpop.f32.mrf.mxu0 }
 0x811   :  { %v5957_v47 = vpack.c.bf16 %v1328_v18, %v1326_v17 }
 0x813   :  { %v4877_v37 = vunpack.c.l.bf16 %v5957_v47  ;;  %v4878_v0 = vunpack.c.h.bf16 %v5957_v47 }
 0x816   :  { %5833 = vmatmul.mubr.msk.bf16.gmra.mxu1 %vm2501_vm2, %v8013_v46  ;;  %v1330_v46 = vpop.f32.mrf.mxu0 }
 0x817   :  { %4995 = vmatprep.mubr.bf16.mxu1 %v8408_v22 }
 0x818   :  { %v1332_v57 = vpop.f32.mrf.mxu0 }
 0x819   :  { %v5958_v61 = vpack.c.bf16 %v1332_v57, %v1330_v46 }
 0x81a   :  { %v1336_v44 = vpop.f32.mrf.mxu0 }
 0x81b   :  { %v4880_v63 = vunpack.c.h.bf16 %v5958_v61 }
 0x81c   :  { %v1338_v52 = vpop.f32.mrf.mxu0 }
 0x81d   :  { %v5959_v15 = vpack.c.bf16 %v1338_v52, %v1336_v44 }
 0x81e   :  { %5834 = vmatmul.mubr.msk.bf16.gmra.mxu1 %vm2501_vm2, %v8418_v19  ;;  %v1340_v16 = vpop.f32.mrf.mxu0 }
 0x81f   :  { %5005 = vmatprep.mubr.bf16.mxu1 %v8408_v22  ;;  %v4881_v38 = vunpack.c.l.bf16 %v5959_v15  ;;  %v4882_v57 = vunpack.c.h.bf16 %v5959_v15 }
 0x820   :  { %v1342_v27 = vpop.f32.mrf.mxu0 }
 0x821   :  { %v5960_v39 = vpack.c.bf16 %v1342_v27, %v1340_v16 }
 0x822   :  { %v1346_v43 = vpop.f32.mrf.mxu0 }
 0x823   :  { %v4883_v52 = vunpack.c.l.bf16 %v5960_v39  ;;  %v4884_v40 = vunpack.c.h.bf16 %v5960_v39 }
 0x824   :  { %v1348_v30 = vpop.f32.mrf.mxu0 }
 0x826   :  { %5835 = vmatmul.mubr.msk.bf16.gmra.mxu1 %vm2501_vm2, %v8419_v2  ;;  %v8220_v36 = vpop.f32.mrf.mxu0  ;;  %v4879_v2 = vunpack.c.l.bf16 %v5958_v61 }
 0x827   :  { %5015 = vmatprep.mubr.bf16.mxu1 %v8408_v22 }
 0x828   :  { %v8222_v32 = vpop.f32.mrf.mxu0 }
 0x829   :  { %v5962_v44 = vpack.c.bf16 %v8222_v32, %v8220_v36 }
 0x82a   :  { %v8229_v55 = vpop.f32.mrf.mxu0 }
 0x82b   :  { %v4888_v32 = vunpack.c.h.bf16 %v5962_v44 }
 0x82c   :  { %v8231_v24 = vpop.f32.mrf.mxu0 }
 0x82d   :  { %v5963_v16 = vpack.c.bf16 %v8231_v24, %v8229_v55 }
 0x82e   :  { %5836 = vmatmul.mubr.msk.bf16.gmra.mxu1 %vm2501_vm2, %v8420_v23  ;;  %v8237_v53 = vpop.f32.mrf.mxu0  ;;  %v5961_v23 = vpack.c.bf16 %v1348_v30, %v1346_v43 }
 0x82f   :  { %5302 = vmatprep.mubr.bf16.mxu1 %v8408_v22  ;;  %v4890_v24 = vunpack.c.h.bf16 %v5963_v16 }
 0x830   :  { %v8239_v1 = vpop.f32.mrf.mxu0  ;;  %v4885_v27 = vunpack.c.l.bf16 %v5961_v23  ;;  %v4886_v50 = vunpack.c.h.bf16 %v5961_v23 }
 0x831   :  { %v5964_v36 = vpack.c.bf16 %v8239_v1, %v8237_v53 }
 0x832   :  { %v8241_v42 = vpop.f32.mrf.mxu0 }
 0x833   :  { %v4891_v23 = vunpack.c.l.bf16 %v5964_v36 }
 0x834   :  { %v8243_v25 = vpop.f32.mrf.mxu0 }
 0x836   :  { %v8245_v62 = vpop.f32.mrf.mxu0 }
 0x838   :  { %v8247_v54 = vpop.f32.mrf.mxu0 }
 0x83a   :  { %v8264_v12 = vpop.f32.mrf.mxu0 }
 0x83c   :  { %v8272_v33 = vpop.f32.mrf.mxu0 }
 0x83e   :  { %v8280_v49 = vpop.f32.mrf.mxu0 }
 0x840   :  { %v8282_v56 = vpop.f32.mrf.mxu0 }
 0x842   :  { %v8284_v29 = vpop.f32.mrf.mxu0 }
 0x844   :  { %v8286_v17 = vpop.f32.mrf.mxu0 }
 0x846   :  { %v8292_v30 = vpop.f32.mrf.mxu0 }
 0x848   :  { %v1392_v61 = vpop.f32.mrf.mxu0 }
 0x8b6   :  { %v4947_v59 = vpop.f32.mrf.mxu1 }
 0x8b7   :  { %v5026_v19 = vadd.f32 %v4947_v59, %v4877_v37  ;;  %v4889_v37 = vunpack.c.l.bf16 %v5963_v16 }
 0x8b8   :  { %v4949_v3 = vpop.f32.mrf.mxu1 }
 0x8b9   :  { %v5027_v18 = vadd.f32 %v4949_v3, %v4878_v0  ;;  %v5058_v51 = vmul.f32 0.5, %v5026_v19  ;;  %v4887_v0 = vunpack.c.l.bf16 %v5962_v44 }
 0x8ba   :  { %v4951_v31 = vpop.f32.mrf.mxu1 }
 0x8bb   :  { %v5028_v7 = vadd.f32 %v4951_v31, %v4879_v2  ;;  %v5059_v59 = vmul.f32 0.5, %v5027_v18  ;;  %6661 = vtanh.f32 %v5058_v51 }
 0x8bc   :  { %v4953_v58 = vpop.f32.mrf.mxu1 }
 0x8bd   :  { %v5029_v46 = vadd.f32 %v4953_v58, %v4880_v63  ;;  %v5060_v3 = vmul.f32 0.5, %v5028_v7  ;;  %6663 = vtanh.f32 %v5059_v59  ;;  %v5967_v59 = vpack.c.bf16 %v8272_v33, %v8264_v12 }
 0x8be   :  { %v4957_v8 = vpop.f32.mrf.mxu1 }
 0x8bf   :  { %v5030_v21 = vadd.f32 %v4957_v8, %v4881_v38  ;;  %v5061_v58 = vmul.f32 0.5, %v5029_v46  ;;  %6665 = vtanh.f32 %v5060_v3  ;;  %v1396_v38 = vpop.f32.mrf.mxu0 }
 0x8c0   :  { %v4959_v13 = vpop.f32.mrf.mxu1 }
 0x8c1   :  { %v5031_v11 = vadd.f32 %v4959_v13, %v4882_v57  ;;  %v5062_v8 = vmul.f32 0.5, %v5030_v21  ;;  %6667 = vtanh.f32 %v5061_v58  ;;  %v4892_v57 = vunpack.c.h.bf16 %v5964_v36  ;;  %v1398_v16 = vpop.f32.mrf.mxu0 }
 0x8c2   :  { %v4961_v20 = vpop.f32.mrf.mxu1  ;;  %v5968_v58 = vpack.c.bf16 %v8282_v56, %v8280_v49 }
 0x8c3   :  { %v5032_v31 = vadd.f32 %v4961_v20, %v4883_v52  ;;  %v5063_v15 = vmul.f32 0.5, %v5031_v11  ;;  %6669 = vtanh.f32 %v5062_v8  ;;  %v4898_v8 = vunpack.c.h.bf16 %v5967_v59 }
 0x8c4   :  { %v4963_v26 = vpop.f32.mrf.mxu1 }
 0x8c5   :  { %v5033_v60 = vadd.f32 %v4963_v26, %v4884_v40  ;;  %v5064_v20 = vmul.f32 0.5, %v5032_v31  ;;  %6671 = vtanh.f32 %v5063_v15  ;;  %v1400_v31 = vpop.f32.mrf.mxu0 }
 0x8c6   :  { %v4967_v35 = vpop.f32.mrf.mxu1 }
 0x8c7   :  { %v5034_v55 = vadd.f32 %v4967_v35, %v4885_v27  ;;  %v5065_v26 = vmul.f32 0.5, %v5033_v60  ;;  %6673 = vtanh.f32 %v5064_v20  ;;  %v5966_v27 = vpack.c.bf16 %v8247_v54, %v8245_v62 }
 0x8c8   :  { %v4969_v10 = vpop.f32.mrf.mxu1  ;;  %v4897_v60 = vunpack.c.l.bf16 %v5967_v59 }
 0x8c9   :  { %v5035_v2 = vadd.f32 %v4969_v10, %v4886_v50  ;;  %v5090_v53 = vmul.f32 0.5, %v5034_v55  ;;  %6675 = vtanh.f32 %v5065_v26  ;;  %v6662_v50 = vpop.eup %6661  ;;  %v4896_v62 = vunpack.c.h.bf16 %v5966_v27 }
 0x8ca   :  { %v4971_v14 = vpop.f32.mrf.mxu1  ;;  %v6664_v54 = vpop.eup %6663  ;;  %v4895_v20 = vunpack.c.l.bf16 %v5966_v27 }
 0x8cb   :  { %v5036_v1 = vadd.f32 %v4971_v14, %v4887_v0  ;;  %v5091_v44 = vmul.f32 0.5, %v5035_v2  ;;  %6677 = vtanh.f32 %v5090_v53 }
 0x8cc   :  { %v4973_v43 = vpop.f32.mrf.mxu1  ;;  %v6666_v12 = vpop.eup %6665 }
 0x8cd   :  { %v5037_v13 = vadd.f32 %v4973_v43, %v4888_v32  ;;  %v5092_v51 = vmul.f32 0.5, %v5036_v1  ;;  %v8308_v32 = vpack.c.bf16 %v8286_v17, %v8284_v29  ;;  %v8313_v29 = vpack.c.bf16 %v1398_v16, %v1396_v38 }
 0x8ce   :  { %v4977_v6 = vpop.f32.mrf.mxu1  ;;  %v6668_v55 = vpop.eup %6667  ;;  %v5076_v59 = vmul.f32 0.5, %v6666_v12 }
 0x8cf   :  { %v5093_v18 = vmul.f32 0.5, %v5037_v13  ;;  %v5038_v63 = vadd.f32 %v4977_v6, %v4889_v37  ;;  %v5965_v6 = vpack.c.bf16 %v8243_v25, %v8241_v42  ;;  %v8311_v42 = vpack.c.bf16 %v1392_v61, %v8292_v30  ;;  %v1402_v25 = vpop.f32.mrf.mxu0 }
 0x8d0   :  { %v4979_v47 = vpop.f32.mrf.mxu1  ;;  %v6670_v49 = vpop.eup %6669  ;;  %v4899_v13 = vunpack.c.l.bf16 %v5968_v58  ;;  %v4901_v2 = vunpack.c.l.bf16 %v8308_v32  ;;  %v8316_v30 = vpack.c.bf16 %v1402_v25, %v1400_v31 }
 0x8d1   :  { %v5039_v39 = vadd.f32 %v4979_v47, %v4890_v24  ;;  %6679 = vtanh.f32 %v5093_v18  ;;  %v5094_v14 = vmul.f32 0.5, %v5038_v63  ;;  %v4893_v56 = vunpack.c.l.bf16 %v5965_v6 }
 0x8d2   :  { %v4981_v19 = vpop.f32.mrf.mxu1  ;;  %v4894_v47 = vunpack.c.h.bf16 %v5965_v6  ;;  %v6672_v37 = vpop.eup %6671  ;;  %v4907_v27 = vunpack.c.l.bf16 %v8316_v30 }
 0x8d3   :  { %v5095_v7 = vmul.f32 0.5, %v5039_v39  ;;  %v5040_v46 = vadd.f32 %v4981_v19, %v4891_v23  ;;  %v4900_v19 = vunpack.c.h.bf16 %v5968_v58  ;;  %v4902_v23 = vunpack.c.h.bf16 %v8308_v32 }
 0x8d4   :  { %v4983_v35 = vpop.f32.mrf.mxu1  ;;  %v6674_v17 = vpop.eup %6673  ;;  %v4908_v58 = vunpack.c.h.bf16 %v8316_v30 }
 0x8d5   :  { %v5041_v10 = vadd.f32 %v4983_v35, %v4892_v57  ;;  %6681 = vtanh.f32 %v5095_v7  ;;  %v5096_v43 = vmul.f32 0.5, %v5040_v46  ;;  %v4903_v35 = vunpack.c.l.bf16 %v8311_v42 }
 0x8d6   :  { %v8296_v52 = vpop.f32.mrf.mxu1  ;;  %6683 = vtanh.f32 %v5091_v44  ;;  %v6676_v61 = vpop.eup %6675  ;;  %v4904_v7 = vunpack.c.h.bf16 %v8311_v42  ;;  %v5074_v57 = vmul.f32 0.5, %v6662_v50  ;;  %v5075_v44 = vmul.f32 0.5, %v6664_v54 }
 0x8d7   :  { %6685 = vtanh.f32 %v5092_v51  ;;  %v5097_v40 = vmul.f32 0.5, %v5041_v10  ;;  %v4905_v10 = vunpack.c.l.bf16 %v8313_v29  ;;  %v5042_v16 = vadd.f32 %v8296_v52, %v4893_v56 }
 0x8d8   :  { %v4989_v21 = vpop.f32.mrf.mxu1  ;;  %6687 = vtanh.f32 %v5094_v14  ;;  %v6678_v18 = vpop.eup %6677  ;;  %v4906_v14 = vunpack.c.h.bf16 %v8313_v29  ;;  %v5079_v50 = vmul.f32 0.5, %v6672_v37  ;;  %v8326_v54 = vadd.f32 0.5, %v5074_v57 }
 0x8d9   :  { %6689 = vtanh.f32 %v5096_v43  ;;  %v5043_v53 = vadd.f32 %v4989_v21, %v4894_v47  ;;  %v8328_v52 = vadd.f32 0.5, %v5075_v44  ;;  %v5081_v12 = vmul.f32 0.5, %v6676_v61 }
 0x8da   :  { %v4991_v11 = vpop.f32.mrf.mxu1  ;;  %6691 = vtanh.f32 %v5097_v40  ;;  %v5078_v40 = vmul.f32 0.5, %v6670_v49  ;;  %v8330_v42 = vadd.f32 0.5, %v5076_v59 }
 0x8db   :  { %v5044_v63 = vadd.f32 %v4991_v11, %v4895_v20  ;;  %v5077_v11 = vmul.f32 0.5, %v6668_v55  ;;  %v5106_v55 = vmul.f32 0.5, %v6678_v18  ;;  %v5089_v61 = vadd.f32 0.5, %v5081_v12 }
 0x8dc   :  { %v4993_v3 = vpop.f32.mrf.mxu1  ;;  %v5086_v49 = vadd.f32 0.5, %v5078_v40 }
 0x8dd   :  { %v5045_v33 = vadd.f32 %v4993_v3, %v4896_v62  ;;  %v5085_v25 = vadd.f32 0.5, %v5077_v11 }
 0x8de   :  { %v4997_v36 = vpop.f32.mrf.mxu1  ;;  %v6680_v46 = vpop.eup %6679 }
 0x8df   :  { %v5046_v0 = vadd.f32 %v4997_v36, %v4897_v60  ;;  %6693 = vtanh.f32 %v5045_v33  ;;  %v5109_v6 = vmul.f32 0.5, %v6680_v46  ;;  %v5080_v60 = vmul.f32 0.5, %v6674_v17 }
 0x8e0   :  { %v4999_v24 = vpop.f32.mrf.mxu1 }
 0x8e1   :  { %v5047_v15 = vadd.f32 %v4999_v24, %v4898_v8  ;;  %v5117_v20 = vadd.f32 0.5, %v5109_v6 }
 0x8e2   :  { %v5001_v39 = vpop.f32.mrf.mxu1  ;;  %v6682_v21 = vpop.eup %6681 }
 0x8e3   :  { %v5048_v26 = vadd.f32 %v5001_v39, %v4899_v13  ;;  %6695 = vtanh.f32 %v5047_v15  ;;  %v6684_v43 = vpop.eup %6683  ;;  %v5111_v36 = vmul.f32 0.5, %v6682_v21  ;;  %v5087_v13 = vadd.f32 0.5, %v5079_v50 }
 0x8e4   :  { %v5003_v1 = vpop.f32.mrf.mxu1  ;;  %v6686_v31 = vpop.eup %6685  ;;  %v5107_v56 = vmul.f32 0.5, %v6684_v43  ;;  %v5088_v39 = vadd.f32 0.5, %v5080_v60 }
 0x8e5   :  { %6697 = vtanh.f32 %v5048_v26  ;;  %v5049_v38 = vadd.f32 %v5003_v1, %v4900_v19  ;;  %v6688_v62 = vpop.eup %6687  ;;  %v5108_v37 = vmul.f32 0.5, %v6686_v31  ;;  %v5119_v29 = vadd.f32 0.5, %v5111_v36 }
 0x8e6   :  { %6699 = vtanh.f32 %v5046_v0  ;;  %v5007_v51 = vpop.f32.mrf.mxu1  ;;  %v6690_v8 = vpop.eup %6689  ;;  %v5110_v19 = vmul.f32 0.5, %v6688_v62 }
 0x8e7   :  { %6701 = vtanh.f32 %v5049_v38  ;;  %v6692_v15 = vpop.eup %6691  ;;  %v5112_v17 = vmul.f32 0.5, %v6690_v8  ;;  %v5050_v43 = vadd.f32 %v5007_v51, %v4901_v2 }
 0x8e8   :  { %6703 = vtanh.f32 %v5043_v53  ;;  %v5009_v3 = vpop.f32.mrf.mxu1  ;;  %v8332_v53 = vadd.f32 0.5, %v5106_v55  ;;  %v5113_v38 = vmul.f32 0.5, %v6692_v15  ;;  %v5118_v40 = vadd.f32 0.5, %v5110_v19 }
 0x8e9   :  { %6705 = vtanh.f32 %v5044_v63  ;;  %v5051_v24 = vadd.f32 %v5009_v3, %v4902_v23  ;;  %v5115_v63 = vadd.f32 0.5, %v5107_v56  ;;  %v5167_v3 = vmul.f32 %v5119_v29, %v8167_v28 }
 0x8ea   :  { %v5011_v33 = vpop.f32.mrf.mxu1  ;;  %6707 = vtanh.f32 %v5042_v16  ;;  %v5116_v16 = vadd.f32 0.5, %v5108_v37  ;;  %v5120_v31 = vadd.f32 0.5, %v5112_v17  ;;  %v5166_v30 = vmul.f32 %v5118_v40, %v8179_v9 }
 0x8eb   :  { %v5131_v1 = vmul.f32 0.5, %v5051_v24  ;;  %v5052_v23 = vadd.f32 %v5011_v33, %v4903_v35  ;;  %v5121_v33 = vadd.f32 0.5, %v5113_v38 }
 0x8ec   :  { %v5013_v47 = vpop.f32.mrf.mxu1  ;;  %v6694_v18 = vpop.eup %6693  ;;  %v5168_v55 = vmul.f32 %v5120_v31, %v8171_v4  ;;  %v5163_v4 = vmul.f32 %v5115_v63, %v8181_v45 }
 0x8ed   :  { %v5053_v0 = vadd.f32 %v5013_v47, %v4904_v7  ;;  %v5165_v7 = vmul.f32 %v5117_v20, %v8163_v34  ;;  %v5173_v62 = vmul.f32 %v6694_v18, %v5085_v25  ;;  %6709 = vtanh.f32 %v5131_v1 }
 0x8ee   :  { %v5017_v26 = vpop.f32.mrf.mxu1 }
 0x8ef   :  { %v5133_v46 = vmul.f32 0.5, %v5053_v0  ;;  %v5054_v57 = vadd.f32 %v5017_v26, %v4905_v10  ;;  %v5132_v10 = vmul.f32 0.5, %v5052_v23  ;;  %v5181_v56 = vadd.f32 %v5173_v62, %v5165_v7 }
 0x8f0   :  { %v5019_v44 = vpop.f32.mrf.mxu1  ;;  %v6696_v21 = vpop.eup %6695 }
 0x8f1   :  { %v5055_v59 = vadd.f32 %v5019_v44, %v4906_v14  ;;  %v5134_v35 = vmul.f32 0.5, %v5054_v57  ;;  %v5175_v8 = vmul.f32 %v6696_v21, %v5087_v13  ;;  %6711 = vtanh.f32 %v5133_v46 }
 0x8f2   :  { %v6698_v11 = vpop.eup %6697  ;;  %v5021_v50 = vpop.f32.mrf.mxu1  ;;  %v5130_v14 = vmul.f32 0.5, %v5050_v43 }
 0x8f3   :  { %v6700_v6 = vpop.eup %6699  ;;  %v5135_v60 = vmul.f32 0.5, %v5055_v59  ;;  %v5056_v34 = vadd.f32 %v5021_v50, %v4907_v27  ;;  %v5176_v51 = vmul.f32 %v6698_v11, %v5088_v39  ;;  %6713 = vtanh.f32 %v5134_v35 }
 0x8f4   :  { %v6702_v36 = vpop.eup %6701  ;;  %v5023_v32 = vpop.f32.mrf.mxu1  ;;  %v5174_v47 = vmul.f32 %v6700_v6, %v5086_v49  ;;  %v5169_v27 = vmul.f32 %v5121_v33, %v8174_v41  ;;  %v5183_v20 = vadd.f32 %v5175_v8, %v5167_v3  ;;  %v5164_v49 = vmul.f32 %v5116_v16, %v8186_v48 }
 0x8f5   :  { %v6704_v2 = vpop.eup %6703  ;;  %v5057_v28 = vadd.f32 %v5023_v32, %v4908_v58  ;;  %v5177_v24 = vmul.f32 %v6702_v36, %v5089_v61  ;;  %6715 = vtanh.f32 %v5135_v60  ;;  %v5136_v25 = vmul.f32 0.5, %v5056_v34 }
 0x8f6   :  { %v6706_v12 = vpop.eup %6705  ;;  %6717 = vtanh.f32 %v5132_v10  ;;  %v5171_v37 = vmul.f32 %v6704_v2, %v8328_v52  ;;  %v5184_v0 = vadd.f32 %v5176_v51, %v5168_v55  ;;  %v5182_v41 = vadd.f32 %v5174_v47, %v5166_v30  ;;  %v6098_v47 = vld [vmem:[%s8385_s3 + $0x8] sm:$0xff]  }
 0x8f7   :  { %v5137_v15 = vmul.f32 0.5, %v5057_v28  ;;  %v6708_v13 = vpop.eup %6707  ;;  %6719 = vtanh.f32 %v5136_v25  ;;  %v5172_v58 = vmul.f32 %v6706_v12, %v8330_v42  ;;  %v5185_v39 = vadd.f32 %v5177_v24, %v5169_v27  ;;  %v1406_v27 = vpop.f32.mrf.mxu0 }
 0x8f8   :  { %6721 = vtanh.f32 %v5130_v14  ;;  %v5170_v19 = vmul.f32 %v6708_v13, %v8326_v54  ;;  %v5179_v29 = vadd.f32 %v5171_v37, %v5163_v4  ;;  %v5162_v52 = vmul.f32 %v8332_v53, %v8190_v5  ;;  %v6100_v13 = vld [vmem:[%s8385_s3 + $0x18] sm:$0xff]  }
 0x8f9   :  { %6723 = vtanh.f32 %v5137_v15  ;;  %v5180_v9 = vadd.f32 %v5172_v58, %v5164_v49  ;;  %v6099_v15 = vld [vmem:[%s8385_s3 + $0x10] sm:$0xff]   ;;  %v1408_v37 = vpop.f32.mrf.mxu0 }
 0x8fa   :  { %6725 = vtanh.f32 %v5181_v56  ;;  %v5178_v42 = vadd.f32 %v5170_v19, %v5162_v52  ;;  %v6710_v17 = vpop.eup %6709  ;;  %v6096_v56 = vld [vmem:[%s8385_s3] sm:$0xff]   ;;  %v5973_v19 = vpack.c.bf16 %v1408_v37, %v1406_v27 }
 0x8fb   :  { %6727 = vtanh.f32 %v5183_v20  ;;  %v5147_v38 = vmul.f32 0.5, %v6710_v17  ;;  %v1410_v20 = vpop.f32.mrf.mxu0 }
 0x8fc   :  { %6729 = vtanh.f32 %v5184_v0  ;;  %v5222_v17 = vunpack.c.l.bf16 %v5973_v19 }
 0x8fd   :  { %6731 = vtanh.f32 %v5185_v39  ;;  %v5155_v3 = vadd.f32 0.5, %v5147_v38  ;;  %v1412_v30 = vpop.f32.mrf.mxu0 }
 0x8fe   :  { %6733 = vtanh.f32 %v5182_v41  ;;  %v6712_v45 = vpop.eup %6711  ;;  %v5974_v39 = vpack.c.bf16 %v1412_v30, %v1410_v20 }
 0x8ff   :  { %6735 = vtanh.f32 %v5179_v29  ;;  %v5149_v61 = vmul.f32 0.5, %v6712_v45  ;;  %v1416_v58 = vpop.f32.mrf.mxu0 }
 0x900   :  { %6737 = vtanh.f32 %v5180_v9  ;;  %v6714_v26 = vpop.eup %6713 }
 0x901   :  { %6739 = vtanh.f32 %v5178_v42  ;;  %v5150_v18 = vmul.f32 0.5, %v6714_v26  ;;  %v5157_v44 = vadd.f32 0.5, %v5149_v61  ;;  %v1418_v0 = vpop.f32.mrf.mxu0  ;;  %v5225_v42 = vunpack.c.h.bf16 %v5974_v39 }
 0x902   :  { %v6716_v48 = vpop.eup %6715  ;;  %v5975_v41 = vpack.c.bf16 %v1418_v0, %v1416_v58 }
 0x903   :  { %v6718_v54 = vpop.eup %6717  ;;  %v5151_v1 = vmul.f32 0.5, %v6716_v48  ;;  %v5158_v11 = vadd.f32 0.5, %v5150_v18  ;;  %v1420_v4 = vpop.f32.mrf.mxu0  ;;  %v5223_v48 = vunpack.c.h.bf16 %v5973_v19 }
 0x904   :  { %v6720_v23 = vpop.eup %6719  ;;  %v5148_v46 = vmul.f32 0.5, %v6718_v54  ;;  %v5226_v45 = vunpack.c.l.bf16 %v5975_v41 }
 0x905   :  { %v6722_v63 = vpop.eup %6721  ;;  %v5152_v5 = vmul.f32 0.5, %v6720_v23  ;;  %v5159_v21 = vadd.f32 0.5, %v5151_v1  ;;  %v1422_v52 = vpop.f32.mrf.mxu0  ;;  %v5227_v1 = vunpack.c.h.bf16 %v5975_v41 }
 0x906   :  { %v6724_v53 = vpop.eup %6723  ;;  %v5146_v59 = vmul.f32 0.5, %v6722_v63  ;;  %v5156_v50 = vadd.f32 0.5, %v5148_v46  ;;  %v5976_v26 = vpack.c.bf16 %v1422_v52, %v1420_v4  ;;  %v5370_v63 = vpop.permute.xlu0 %5369 }
 0x907   :  { %v6726_v57 = vpop.eup %6725  ;;  %v5160_v16 = vadd.f32 0.5, %v5152_v5  ;;  %v5153_v7 = vmul.f32 0.5, %v6724_v53 }
 0x908   :  { %v6728_v43 = vpop.eup %6727  ;;  %v5197_v36 = vmul.f32 %v6726_v57, %v5157_v44  ;;  %v5154_v8 = vadd.f32 0.5, %v5146_v59  ;;  %v5228_v53 = vunpack.c.l.bf16 %v5976_v26  ;;  %v5380_v59 = vpop.permute.xlu1 %5379 }
 0x909   :  { %v6730_v40 = vpop.eup %6729  ;;  %v5161_v31 = vadd.f32 0.5, %v5153_v7  ;;  %v5199_v10 = vmul.f32 %v6728_v43, %v5159_v21 }
 0x90a   :  { %v6732_v35 = vpop.eup %6731  ;;  %v5200_v6 = vmul.f32 %v6730_v40, %v5160_v16  ;;  %v5229_v16 = vunpack.c.h.bf16 %v5976_v26  ;;  %v8426_v26 = vld [vmem:[#allocation7_spill] sm:$0xff] }
 0x90b   :  { %v6734_v62 = vpop.eup %6733  ;;  %v5201_v60 = vmul.f32 %v6732_v35, %v5161_v31  ;;  %v8421_v31 = vld [vmem:[#allocation5_spill] sm:$0xff]  ;;  %v8422_v35 = vld [vmem:[#allocation6_spill] sm:$0xff] }
 0x90c   :  { %v6736_v33 = vpop.eup %6735  ;;  %v5198_v34 = vmul.f32 %v6734_v62, %v5158_v11 }
 0x90d   :  { %v6738_v32 = vpop.eup %6737  ;;  %v5213_v2 = vpack.c.bf16 %v5201_v60, %v5199_v10  ;;  %v5195_v51 = vmul.f32 %v6736_v33, %v5155_v3  ;;  %v5375_v10 = vpop.permute.xlu0 %5374 }
 0x90e   :  { %v5196_v14 = vmul.f32 %v6738_v32, %v5156_v50  ;;  %v5212_v28 = vpack.c.bf16 %v5200_v6, %v5198_v34  ;;  %v6740_v12 = vpop.eup %6739  ;;  %v5978_v50 = vpack.c.bf16 %v8422_v35, %v8421_v31  ;;  %v8423_v34 = vld [vmem:[#allocation4_spill] sm:$0xff] }
 0x90f   :  { %5282 = vmatprep.subr.bf16.mxu1 %v5213_v2  ;;  %v5211_v55 = vpack.c.bf16 %v5197_v36, %v5195_v51  ;;  %v5194_v24 = vmul.f32 %v6740_v12, %v5154_v8  ;;  %v5230_v32 = vunpack.c.l.bf16 %v8423_v34 }
 0x910   :  { %5283 = vmatpush1.bf16.msra.mxu1 %v5212_v28 }
 0x911   :  { %5284 = vmatprep.subr.bf16.mxu1 %v5211_v55  ;;  %v5210_v25 = vpack.c.bf16 %v5196_v14, %v5194_v24  ;;  %v5231_v14 = vunpack.c.h.bf16 %v8423_v34  ;;  %v5390_v4 = vpop.permute.xlu0 %5389 }
 0x914   :  { %5285 = vmatpush1.bf16.msra.mxu1 %v5210_v25 }
 0x917   :  { %5841 = vmatmul.mubr.msk.bf16.vlgmr.msra.gmra.mxu1 %vm2501_vm2, %v6096_v56 }
 0x918   :  { %5312 = vmatprep.mubr.bf16.mxu1 %v8408_v22 }
 0x91f   :  { %5842 = vmatmul.mubr.msk.bf16.gmra.mxu1 %vm2501_vm2, %v6098_v47  ;;  %v5385_v47 = vpop.permute.xlu1 %5384 }
 0x920   :  { %5322 = vmatprep.mubr.bf16.mxu1 %v8408_v22 }
 0x927   :  { %5843 = vmatmul.mubr.msk.bf16.gmra.mxu1 %vm2501_vm2, %v6099_v15 }
 0x928   :  { %5332 = vmatprep.mubr.bf16.mxu1 %v8408_v22  ;;  %v5224_v22 = vunpack.c.l.bf16 %v5974_v39 }
 0x92f   :  { %5844 = vmatmul.mubr.msk.bf16.gmra.mxu1 %vm2501_vm2, %v6100_v13  ;;  %v5232_v13 = vunpack.c.l.bf16 %v5978_v50 }
 0x9d7   :  { %v5304_v49 = vpop.f32.mrf.mxu1 }
 0x9d8   :  { %v5305_v38 = vadd.f32 %v5304_v49, %v5222_v17  ;;  %v5233_v49 = vunpack.c.h.bf16 %v5978_v50 }
 0x9d9   :  { %v5306_v29 = vpop.f32.mrf.mxu1 }
 0x9da   :  { %v5307_v46 = vadd.f32 %v5306_v29, %v5223_v48  ;;  %v5343_v11 = vmax.f32 %v5305_v38, 0.0  ;;  %v5234_v48 = vunpack.c.l.bf16 %v8426_v26 }
 0x9db   :  { %v5308_v9 = vpop.f32.mrf.mxu1 }
 0x9dc   :  { %v5309_v61 = vadd.f32 %v5308_v9, %v5224_v22  ;;  %v5344_v6 = vmax.f32 %v5307_v46, 0.0  ;;  %v5407_v28 = vmul.f32 %v5370_v63, %v5343_v11  ;;  %v8424_v22 = vld [vmem:[#allocation8_spill] sm:$0xff]  ;;  %v8425_v9 = vld [vmem:[#allocation9_spill] sm:$0xff] }
 0x9dd   :  { %v5310_v54 = vpop.f32.mrf.mxu1 }
 0x9de   :  { %v5311_v23 = vadd.f32 %v5310_v54, %v5225_v42  ;;  %v5345_v44 = vmax.f32 %v5309_v61, 0.0  ;;  %v5408_v25 = vmul.f32 %v5370_v63, %v5344_v6  ;;  %v5980_v42 = vpack.c.bf16 %v8425_v9, %v8424_v22  ;;  %v5395_v63 = vpop.permute.xlu1 %5394 }
 0x9df   :  { %v5314_v18 = vpop.f32.mrf.mxu1 }
 0x9e0   :  { %v5315_v5 = vadd.f32 %v5314_v18, %v5226_v45  ;;  %v5346_v7 = vmax.f32 %v5311_v23, 0.0  ;;  %v5409_v33 = vmul.f32 %v5375_v10, %v5345_v44  ;;  %v5237_v35 = vunpack.c.h.bf16 %v5980_v42 }
 0x9e1   :  { %v5316_v57 = vpop.f32.mrf.mxu1 }
 0x9e2   :  { %v5317_v21 = vadd.f32 %v5316_v57, %v5227_v1  ;;  %v5347_v40 = vmax.f32 %v5315_v5, 0.0  ;;  %v5410_v2 = vmul.f32 %v5375_v10, %v5346_v7  ;;  %v5423_v27 = vadd.f32 %v5409_v33, %v5407_v28 }
 0x9e3   :  { %v5318_v43 = vpop.f32.mrf.mxu1  ;;  %v5235_v5 = vunpack.c.h.bf16 %v8426_v26  ;;  %v5236_v7 = vunpack.c.l.bf16 %v5980_v42 }
 0x9e4   :  { %v5319_v3 = vadd.f32 %v5318_v43, %v5228_v53  ;;  %v5348_v62 = vmax.f32 %v5317_v21, 0.0  ;;  %v5411_v12 = vmul.f32 %v5380_v59, %v5347_v40  ;;  %v5436_v58 = vadd.f32 %v5410_v2, %v5408_v25 }
 0x9e5   :  { %v5320_v60 = vpop.f32.mrf.mxu1  ;;  %v5455_v25 = vlaneseq }
 0x9e6   :  { %v5349_v36 = vmax.f32 %v5319_v3, 0.0  ;;  %v5321_v8 = vadd.f32 %v5320_v60, %v5229_v16  ;;  %v5412_v56 = vmul.f32 %v5380_v59, %v5348_v62  ;;  %v5424_v19 = vadd.f32 %v5423_v27, %v5411_v12  ;;  %v5400_v3 = vpop.permute.xlu0 %5399 }
 0x9e7   :  { %v5324_v51 = vpop.f32.mrf.mxu1  ;;  %v5456_v27 = vshrl.u32 %v5455_v25, 7  ;;  %vm5481_vm3 = vcmp.lt.s32.totalorder %v5455_v25, 256 }
 0x9e8   :  { %v5350_v55 = vmax.f32 %v5321_v8, 0.0  ;;  %v5325_v24 = vadd.f32 %v5324_v51, %v5230_v32  ;;  %v5413_v20 = vmul.f32 %v5385_v47, %v5349_v36  ;;  %v5437_v17 = vadd.f32 %v5436_v58, %v5412_v56  ;;  %v5405_v32 = vpop.permute.xlu1 %5404 }
 0x9e9   :  { %v5326_v15 = vpop.f32.mrf.mxu1 }
 0x9ea   :  { %v5351_v37 = vmax.f32 %v5325_v24, 0.0  ;;  %v5327_v30 = vadd.f32 %v5326_v15, %v5231_v14  ;;  %v5414_v0 = vmul.f32 %v5385_v47, %v5350_v55  ;;  %v5425_v54 = vadd.f32 %v5424_v19, %v5413_v20 }
 0x9eb   :  { %v5328_v39 = vpop.f32.mrf.mxu1  ;;  %v6766_v20 = vmov 1966171168  }
 0x9ec   :  { %v5352_v41 = vmax.f32 %v5327_v30, 0.0  ;;  %v5415_v29 = vmul.f32 %v5390_v4, %v5351_v37  ;;  %v5329_v52 = vadd.f32 %v5328_v39, %v5232_v13  ;;  %v5438_v18 = vadd.f32 %v5437_v17, %v5414_v0 }
 0x9ed   :  { %v5330_v45 = vpop.f32.mrf.mxu1  ;;  %v5465_v30 = vunpack.c.l.s4 %v6766_v20  ;;  %v5457_v0 = vsub.s32 0, %v5456_v27 }
 0x9ee   :  { %v5416_v61 = vmul.f32 %v5390_v4, %v5352_v41  ;;  %v5353_v1 = vmax.f32 %v5329_v52, 0.0  ;;  %v5331_v23 = vadd.f32 %v5330_v45, %v5233_v49  ;;  %v5426_v53 = vadd.f32 %v5425_v54, %v5415_v29  ;;  %v5453_v49 = vpop.permute.xlu0 %5452 }
 0x9ef   :  { %v5334_v38 = vpop.f32.mrf.mxu1  ;;  %v5466_v19 = vunpack.c.0.s8 %v5465_v30  ;;  %v5458_v22 = vrot.slane %v5453_v49, %v5457_v0 }
 0x9f0   :  { %v5354_v46 = vmax.f32 %v5331_v23, 0.0  ;;  %v5417_v57 = vmul.f32 %v5395_v63, %v5353_v1  ;;  %v5335_v44 = vadd.f32 %v5334_v38, %v5234_v48  ;;  %v5439_v21 = vadd.f32 %v5438_v18, %v5416_v61 }
 0x9f1   :  { %v5336_v16 = vpop.f32.mrf.mxu1  ;;  %v5469_v9 = vsub.s32 %v5466_v19, %v5456_v27 }
 0x9f2   :  { %v5418_v43 = vmul.f32 %v5395_v63, %v5354_v46  ;;  %v5427_v59 = vadd.f32 %v5426_v53, %v5417_v57  ;;  %v5355_v11 = vmax.f32 %v5335_v44, 0.0  ;;  %v5337_v40 = vadd.f32 %v5336_v16, %v5235_v5 }
 0x9f3   :  { %v5338_v31 = vpop.f32.mrf.mxu1 }
 0x9f4   :  { %v5440_v50 = vadd.f32 %v5439_v21, %v5418_v43  ;;  %v5356_v6 = vmax.f32 %v5337_v40, 0.0  ;;  %v5419_v62 = vmul.f32 %v5400_v3, %v5355_v11  ;;  %v5339_v10 = vadd.f32 %v5338_v31, %v5236_v7 }
 0x9f5   :  { %v5340_v60 = vpop.f32.mrf.mxu1 }
 0x9f6   :  { %v5420_v36 = vmul.f32 %v5400_v3, %v5356_v6  ;;  %v5428_v33 = vadd.f32 %v5427_v59, %v5419_v62  ;;  %v5357_v8 = vmax.f32 %v5339_v10, 0.0  ;;  %v5341_v34 = vadd.f32 %v5340_v60, %v5237_v35 }
 0x9f8   :  { %v5441_v2 = vadd.f32 %v5440_v50, %v5420_v36  ;;  %v5358_v51 = vmax.f32 %v5341_v34, 0.0  ;;  %v5421_v14 = vmul.f32 %v5405_v32, %v5357_v8 }
 0x9fa   :  { %v5422_v28 = vmul.f32 %v5405_v32, %v5358_v51  ;;  %v5429_v12 = vadd.f32 %v5428_v33, %v5421_v14 }
 0x9fc   :  { %v5430_v55 = vrot.slane %v5429_v12, 4  ;;  %v5442_v24 = vadd.f32 %v5441_v2, %v5422_v28 }
 0x9fe   :  { %v5431_v56 = vadd.f32 %v5430_v55, %v5429_v12  ;;  %v5443_v47 = vrot.slane %v5442_v24, 4 }
 0xa00   :  { %v5432_v15 = vrot.slane %v5431_v56, 2  ;;  %v5444_v13 = vadd.f32 %v5443_v47, %v5442_v24 }
 0xa02   :  { %v5445_v37 = vrot.slane %v5444_v13, 2  ;;  %v5433_v58 = vadd.f32 %v5432_v15, %v5431_v56 }
 0xa04   :  { %v5434_v4 = vrot.slane %v5433_v58, 1  ;;  %v5446_v39 = vadd.f32 %v5445_v37, %v5444_v13 }
 0xa06   :  { %v5435_v41 = vadd.f32 %v5434_v4, %v5433_v58  ;;  %v5447_v29 = vrot.slane %v5446_v39, 1 }
 0xa08   :  { %v5448_v52 = vadd.f32 %v5447_v29, %v5446_v39  ;;  %v5459_v42 = vadd.f32 %v5458_v22, %v5435_v41 }
 0xa0a   :  { %v5460_v17 = vadd.f32 %v5458_v22, %v5448_v52 }
 0xa0c   :  { %v5463_v45 = vcombine.low %v5459_v42, %v5460_v17 }
 0xa0e   :  { %v5470_v26 = vrot.slane %v5463_v45, %v5469_v9 }
 0xa10   :  { %v5477_v48 = vrot.slane %v5470_v26, %v5469_v9 }
 0xa12   :  { %5483 = vst.msk [vmem:[%s8388_s6] sm:$0x3] %vm5481_vm3, %v5477_v48 }

</bundles_post_ra>
